<compile_context>
chip_gen: v6e
topology: v6e:2x2x1
jax: 0.10.0
libtpu: 0.0.40
codegen_flags: <defaults>
</compile_context>

<pallas_src>
import jax
import jax.numpy as jnp
import numpy as np
from jax.experimental import pallas as pl
from jax.experimental.pallas import tpu as pltpu


# ----------------------------- fused Pallas kernel ---------------------------

def _vgg7_kernel(p1_ref, w1_ref, b1_ref, w2_ref, b2_ref, w3_ref, b3_ref,
                 fw1_ref, fb1_ref, fw2_ref, fb2_ref, o_ref,
                 pad1, a2s, pad2):
    f32, bf16 = jnp.float32, jnp.bfloat16

    # ---- layer 1: conv1 (im2col GEMM, pool-grouped rows) + bias + ReLU + 2x2 maxpool
    # Output channels padded 64 -> 128 (zero weight cols / zero bias), so the padded
    # channels are exactly 0 and later multiply zero weight rows in conv2.
    a1 = jnp.dot(p1_ref[0], w1_ref[...], preferred_element_type=f32)      # (256, 128)
    a1 = jnp.maximum(a1 + b1_ref[...], 0.0)
    a1 = jnp.maximum(jnp.maximum(a1[0:64], a1[64:128]),
                     jnp.maximum(a1[128:192], a1[192:256]))               # (64, 128)
    a1 = a1.astype(bf16)

    # Scatter pooled act1 into a zero-padded flat 8x8-with-border buffer (pitch 10).
    # Pixel (y, x) lives at row 10*y + x + 12 (even starts -> packing-aligned bf16
    # stores; the left x-border reuses the previous row's right-border zeros).
    pad1[...] = jnp.zeros_like(pad1)          # bf16: whole 26 KB buffer ~= 7 stores
    for i in range(8):
        pad1[10 * i + 12:10 * i + 20, :] = a1[8 * i:8 * i + 8, :]

    # ---- layer 2: conv2 as 3 GEMMs (one per dy), dx folded into K (K = 384)
    parts = []
    for dy in range(3):
        lhs = jnp.concatenate(
            [pad1[10 * dy + dx + 1:10 * dy + dx + 81, :] for dx in range(3)],
            axis=1)                                                       # (80, 384) bf16
        parts.append(jnp.dot(lhs, w2_ref[dy], preferred_element_type=f32))
    acc2 = parts[0] + parts[1] + parts[2]                                 # (80, 128)
    a2s[...] = jnp.maximum(acc2 + b2_ref[...], 0.0)   # row m = 10*y + x (x < 8 valid)

    # Vectorized 2x2 max-pool of conv2: per pooled output row, 4 strided (4,128)
    # loads + 3 maxes, stored straight into the zero-padded conv3 input buffer.
    # Pixel (i, j) lives at row 8*i + j + 10 (even starts, pitch 8).
    pad2[...] = jnp.zeros_like(pad2)
    for i in range(4):
        r = 20 * i
        v = jnp.maximum(
            jnp.maximum(a2s[pl.ds(r, 4, 2), :], a2s[pl.ds(r + 1, 4, 2), :]),
            jnp.maximum(a2s[pl.ds(r + 10, 4, 2), :], a2s[pl.ds(r + 11, 4, 2), :]))
        pad2[8 * i + 10:8 * i + 14, :] = v.astype(bf16)

    # ---- layer 3: conv3 as ONE GEMM (3x3 folded into K = 1152) + bias + ReLU
    #      + global average pool
    lhs3 = jnp.concatenate(
        [pad2[8 * dy + dx + 1:8 * dy + dx + 29, :]
         for dy in range(3) for dx in range(3)], axis=1)                  # (28, 1152) bf16
    a3 = jnp.dot(lhs3, w3_ref[...], preferred_element_type=f32)           # (28, 256)
    a3 = jnp.maximum(a3 + b3_ref[...], 0.0)           # row m = 8*y + x (x < 4 valid)
    valid = a3[0:4] + a3[8:12] + a3[16:20] + a3[24:28]                    # (4, 256)
    feat = jnp.sum(valid, axis=0, keepdims=True) * (1.0 / 16.0)           # (1, 256)

    # ---- classifier MLP (fused); fc2 padded to 128 lanes -> unmasked output store
    h = jnp.dot(feat.astype(bf16), fw1_ref[...], preferred_element_type=f32)
    h = jnp.maximum(h + fb1_ref[...], 0.0)
    out = jnp.dot(h.astype(bf16), fw2_ref[...], preferred_element_type=f32) + fb2_ref[...]
    o_ref[0] = out                                                        # (1, 128)


# ------------------------------ JAX wrapper -----------------------------------

def _conv1_patches(x_nhw):
    """(N,16,16) -> (N,256,16) im2col, rows grouped by 2x2-pool offset, K padded to 16."""
    N, H, W = x_nhw.shape
    xp = jnp.pad(x_nhw, ((0, 0), (1, 1), (1, 1)))
    cols = []
    for dy in range(3):
        for dx in range(3):
            s = xp[:, dy:dy + H, dx:dx + W]                                   # (N,16,16)
            s = s.reshape(N, H // 2, 2, W // 2, 2).transpose(0, 2, 4, 1, 3)   # (N,a,b,i,j)
            cols.append(s.reshape(N, H * W))                                  # (N,256)
    cols += [jnp.zeros_like(cols[0])] * 7                                     # pad K 9 -> 16
    return jnp.stack(cols, axis=-1)                                           # (N,256,16)


def vgg7_forward(x_nchw, p):
    N = x_nchw.shape[0]
    bf16 = jnp.bfloat16

    patches = _conv1_patches(x_nchw[:, 0]).astype(bf16)                       # (N,256,16)
    # conv1: K padded 9->16, out-channels padded 64->128 with zeros
    w1 = jnp.pad(p["w1"].reshape(9, 64), ((0, 7), (0, 64))).astype(bf16)      # (16,128)
    b1 = jnp.pad(p["b1"], (0, 64)).reshape(1, 128)
    # conv2: cin padded 64->128, dx folded into K -> (3, 384, 128)
    w2 = jnp.pad(p["w2"], ((0, 0), (0, 0), (0, 64), (0, 0))) \
            .reshape(3, 3 * 128, 128).astype(bf16)
    b2 = p["b2"].reshape(1, 128)
    # conv3: full 3x3 folded into K -> (1152, 256)
    w3 = p["w3"].reshape(9 * 128, 256).astype(bf16)
    b3 = p["b3"].reshape(1, 256)
    fw1 = p["fc1_w"].astype(bf16)                                             # (256,64)
    fb1 = p["fc1_b"].reshape(1, 64)
    # fc2 padded to 128 output lanes for a lane-dense store
    fw2 = jnp.pad(p["fc2_w"], ((0, 0), (0, 126))).astype(bf16)                # (64,128)
    fb2 = jnp.pad(p["fc2_b"], (0, 126)).reshape(1, 128)

    out = pl.pallas_call(
        _vgg7_kernel,
        out_shape=jax.ShapeDtypeStruct((N, 1, 128), jnp.float32),
        grid=(N,),
        in_specs=[
            pl.BlockSpec((1, 256, 16), lambda n: (n, 0, 0)),     # conv1 patches
            pl.BlockSpec((16, 128), lambda n: (0, 0)),           # w1
            pl.BlockSpec((1, 128), lambda n: (0, 0)),            # b1
            pl.BlockSpec((3, 384, 128), lambda n: (0, 0, 0)),    # w2 (dy, dx*cin, cout)
            pl.BlockSpec((1, 128), lambda n: (0, 0)),            # b2
            pl.BlockSpec((1152, 256), lambda n: (0, 0)),         # w3 (dy*dx*cin, cout)
            pl.BlockSpec((1, 256), lambda n: (0, 0)),            # b3
            pl.BlockSpec((256, 64), lambda n: (0, 0)),           # fc1_w
            pl.BlockSpec((1, 64), lambda n: (0, 0)),             # fc1_b
            pl.BlockSpec((64, 128), lambda n: (0, 0)),           # fc2_w (padded)
            pl.BlockSpec((1, 128), lambda n: (0, 0)),            # fc2_b (padded)
        ],
        out_specs=pl.BlockSpec((1, 1, 128), lambda n: (n, 0, 0)),
        scratch_shapes=[
            pltpu.VMEM((104, 128), jnp.bfloat16),  # zero-padded pooled act1 (pitch 10)
            pltpu.VMEM((80, 128), jnp.float32),    # conv2 pre-pool activation
            pltpu.VMEM((48, 128), jnp.bfloat16),   # zero-padded pooled act2 (pitch 8)
        ],
        compiler_params=pltpu.CompilerParams(dimension_semantics=("parallel",)),
    )(patches, w1, b1, w2, b2, w3, b3, fw1, fb1, fw2, fb2)
    return out.reshape(N, 128)[:, :2]


# --------------------------- params / reference -------------------------------

def _uniform(key, shape, fan_in):
    bound = 1.0 / np.sqrt(fan_in)
    return jax.random.uniform(key, shape, jnp.float32, -bound, bound)


def init_params(key):
    ks = jax.random.split(key, 10)
    return {
        # conv weights in HWIO layout (PyTorch stores OIHW; same math)
        "w1": _uniform(ks[0], (3, 3, 1, 64), 9 * 1),
        "b1": _uniform(ks[1], (64,), 9 * 1),
        "w2": _uniform(ks[2], (3, 3, 64, 128), 9 * 64),
        "b2": _uniform(ks[3], (128,), 9 * 64),
        "w3": _uniform(ks[4], (3, 3, 128, 256), 9 * 128),
        "b3": _uniform(ks[5], (256,), 9 * 128),
        # linear weights as (in, out)
        "fc1_w": _uniform(ks[6], (256, 64), 256),
        "fc1_b": _uniform(ks[7], (64,), 256),
        "fc2_w": _uniform(ks[8], (64, 2), 64),
        "fc2_b": _uniform(ks[9], (2,), 64),
    }


def vgg7_reference(x_nchw, p):
    """Pure-JAX f32 reference (mirrors the PyTorch forward)."""
    hi = jax.lax.Precision.HIGHEST
    x = jnp.transpose(x_nchw, (0, 2, 3, 1))

    def conv(x, w, b):
        y = jax.lax.conv_general_dilated(
            x, w, (1, 1), "SAME",
            dimension_numbers=("NHWC", "HWIO", "NHWC"), precision=hi)
        return jnp.maximum(y + b, 0.0)

    def pool(x):
        N, H, W, C = x.shape
        return x.reshape(N, H // 2, 2, W // 2, 2, C).max(axis=(2, 4))

    x = pool(conv(x, p["w1"], p["b1"]))
    x = pool(conv(x, p["w2"], p["b2"]))
    x = conv(x, p["w3"], p["b3"]).mean(axis=(1, 2))              # (N, 256)
    h = jnp.maximum(jnp.dot(x, p["fc1_w"], precision=hi) + p["fc1_b"], 0.0)
    return jnp.dot(h, p["fc2_w"], precision=hi) + p["fc2_b"]


# --------------------------------- main ----------------------------------------

if __name__ == "__main__":
    key = jax.random.PRNGKey(0)
    k_in, k_par = jax.random.split(key)
    x = jax.random.normal(k_in, (2, 1, 16, 16), jnp.float32)     # NCHW, like PyTorch
    params = init_params(k_par)

    fwd = jax.jit(vgg7_forward)
    out = jax.block_until_ready(fwd(x, params))
    ref = jax.block_until_ready(vgg7_reference(x, params))

    assert out.shape == (2, 2), out.shape
    o, r = np.asarray(out), np.asarray(ref)
    if not np.allclose(o, r, atol=2e-2, rtol=2e-2):   # bf16 MXU inputs, f32 accumulation
        raise AssertionError(f"mismatch: max abs err={np.abs(o - r).max()}")
    print("KERNEL_OK")
</pallas_src>

<mosaic_0001>
module attributes {stable_mosaic.version = 11 : i64} {
  func.func @_vgg7_kernel(%arg0: i32, %arg1: memref<1x256x16xbf16, #tpu.memory_space<vmem>>, %arg2: memref<16x128xbf16, #tpu.memory_space<vmem>>, %arg3: memref<1x128xf32, #tpu.memory_space<vmem>>, %arg4: memref<3x384x128xbf16, #tpu.memory_space<vmem>>, %arg5: memref<1x128xf32, #tpu.memory_space<vmem>>, %arg6: memref<1152x256xbf16, #tpu.memory_space<vmem>>, %arg7: memref<1x256xf32, #tpu.memory_space<vmem>>, %arg8: memref<256x64xbf16, #tpu.memory_space<vmem>>, %arg9: memref<1x64xf32, #tpu.memory_space<vmem>>, %arg10: memref<64x128xbf16, #tpu.memory_space<vmem>>, %arg11: memref<1x128xf32, #tpu.memory_space<vmem>>, %arg12: memref<1x1x128xf32, #tpu.memory_space<vmem>>, %arg13: memref<104x128xbf16, #tpu.memory_space<vmem>>, %arg14: memref<80x128xf32, #tpu.memory_space<vmem>>, %arg15: memref<48x128xbf16, #tpu.memory_space<vmem>>) attributes {dimension_semantics = [#tpu.dimension_semantics<parallel>], iteration_bounds = array<i64: 2>, scalar_prefetch = 0 : i64, scratch_operands = 3 : i64, tpu.core_type = #tpu.core_type<tc>, window_params = [{transform_indices = @transform_0, window_bounds = array<i64: 1, 256, 16>}, {pipeline_mode = #tpu.pipeline_mode<synchronous>, transform_indices = @transform_1, window_bounds = array<i64: 16, 128>}, {pipeline_mode = #tpu.pipeline_mode<synchronous>, transform_indices = @transform_2, window_bounds = array<i64: 1, 128>}, {pipeline_mode = #tpu.pipeline_mode<synchronous>, transform_indices = @transform_3, window_bounds = array<i64: 3, 384, 128>}, {pipeline_mode = #tpu.pipeline_mode<synchronous>, transform_indices = @transform_4, window_bounds = array<i64: 1, 128>}, {pipeline_mode = #tpu.pipeline_mode<synchronous>, transform_indices = @transform_5, window_bounds = array<i64: 1152, 256>}, {pipeline_mode = #tpu.pipeline_mode<synchronous>, transform_indices = @transform_6, window_bounds = array<i64: 1, 256>}, {pipeline_mode = #tpu.pipeline_mode<synchronous>, transform_indices = @transform_7, window_bounds = array<i64: 256, 64>}, {pipeline_mode = #tpu.pipeline_mode<synchronous>, transform_indices = @transform_8, window_bounds = array<i64: 1, 64>}, {pipeline_mode = #tpu.pipeline_mode<synchronous>, transform_indices = @transform_9, window_bounds = array<i64: 64, 128>}, {pipeline_mode = #tpu.pipeline_mode<synchronous>, transform_indices = @transform_10, window_bounds = array<i64: 1, 128>}, {transform_indices = @transform_11, window_bounds = array<i64: 1, 1, 128>}]} {
    %c0 = arith.constant 0 : index
    %c0_0 = arith.constant 0 : index
    %c0_1 = arith.constant 0 : index
    %0 = vector.load %arg1[%c0, %c0_0, %c0_1] : memref<1x256x16xbf16, #tpu.memory_space<vmem>>, vector<1x256x16xbf16>
    %1 = vector.shape_cast %0 : vector<1x256x16xbf16> to vector<256x16xbf16>
    %c0_2 = arith.constant 0 : index
    %c0_3 = arith.constant 0 : index
    %2 = vector.load %arg2[%c0_2, %c0_3] : memref<16x128xbf16, #tpu.memory_space<vmem>>, vector<16x128xbf16>
    %cst = arith.constant dense<0.000000e+00> : vector<256x128xf32>
    %3 = tpu.matmul %1, %2, %cst {dimension_numbers = #tpu.dot_dimension_numbers<[1], [0], [0], [1], [0, 0, 1, 1], [], []>} : vector<256x16xbf16>, vector<16x128xbf16>, vector<256x128xf32> -> vector<256x128xf32>
    %c0_4 = arith.constant 0 : index
    %c0_5 = arith.constant 0 : index
    %4 = vector.load %arg3[%c0_4, %c0_5] : memref<1x128xf32, #tpu.memory_space<vmem>>, vector<1x128xf32>
    %5 = vector.broadcast %4 : vector<1x128xf32> to vector<256x128xf32>
    %6 = arith.addf %3, %5 : vector<256x128xf32>
    %cst_6 = arith.constant 0.000000e+00 : f32
    %7 = vector.broadcast %cst_6 : f32 to vector<256x128xf32>
    %8 = arith.maximumf %6, %7 : vector<256x128xf32>
    %9 = vector.extract_strided_slice %8 {offsets = [0, 0], sizes = [64, 128], strides = [1, 1]} : vector<256x128xf32> to vector<64x128xf32>
    %10 = vector.extract_strided_slice %8 {offsets = [64, 0], sizes = [64, 128], strides = [1, 1]} : vector<256x128xf32> to vector<64x128xf32>
    %11 = arith.maximumf %9, %10 : vector<64x128xf32>
    %12 = vector.extract_strided_slice %8 {offsets = [128, 0], sizes = [64, 128], strides = [1, 1]} : vector<256x128xf32> to vector<64x128xf32>
    %13 = vector.extract_strided_slice %8 {offsets = [192, 0], sizes = [64, 128], strides = [1, 1]} : vector<256x128xf32> to vector<64x128xf32>
    %14 = arith.maximumf %12, %13 : vector<64x128xf32>
    %15 = arith.maximumf %11, %14 : vector<64x128xf32>
    %16 = arith.truncf %15 : vector<64x128xf32> to vector<64x128xbf16>
    %cst_7 = arith.constant 0.000000e+00 : bf16
    %17 = vector.broadcast %cst_7 : bf16 to vector<104x128xbf16>
    %c0_8 = arith.constant 0 : index
    %c0_9 = arith.constant 0 : index
    %18 = vector.load %arg13[%c0_8, %c0_9] : memref<104x128xbf16, #tpu.memory_space<vmem>>, vector<104x128xbf16>
    tpu.vector_store %arg13[%c0_8, %c0_9], %17 {strides = array<i32>} : memref<104x128xbf16, #tpu.memory_space<vmem>>, vector<104x128xbf16>,
    %19 = vector.extract_strided_slice %16 {offsets = [0, 0], sizes = [8, 128], strides = [1, 1]} : vector<64x128xbf16> to vector<8x128xbf16>
    %c12 = arith.constant 12 : index
    %c0_10 = arith.constant 0 : index
    %20 = vector.load %arg13[%c12, %c0_10] : memref<104x128xbf16, #tpu.memory_space<vmem>>, vector<8x128xbf16>
    tpu.vector_store %arg13[%c12, %c0_10], %19 {strides = array<i32>} : memref<104x128xbf16, #tpu.memory_space<vmem>>, vector<8x128xbf16>,
    %21 = vector.extract_strided_slice %16 {offsets = [8, 0], sizes = [8, 128], strides = [1, 1]} : vector<64x128xbf16> to vector<8x128xbf16>
    %c22 = arith.constant 22 : index
    %c0_11 = arith.constant 0 : index
    %22 = vector.load %arg13[%c22, %c0_11] : memref<104x128xbf16, #tpu.memory_space<vmem>>, vector<8x128xbf16>
    tpu.vector_store %arg13[%c22, %c0_11], %21 {strides = array<i32>} : memref<104x128xbf16, #tpu.memory_space<vmem>>, vector<8x128xbf16>,
    %23 = vector.extract_strided_slice %16 {offsets = [16, 0], sizes = [8, 128], strides = [1, 1]} : vector<64x128xbf16> to vector<8x128xbf16>
    %c32 = arith.constant 32 : index
    %c0_12 = arith.constant 0 : index
    %24 = vector.load %arg13[%c32, %c0_12] : memref<104x128xbf16, #tpu.memory_space<vmem>>, vector<8x128xbf16>
    tpu.vector_store %arg13[%c32, %c0_12], %23 {strides = array<i32>} : memref<104x128xbf16, #tpu.memory_space<vmem>>, vector<8x128xbf16>,
    %25 = vector.extract_strided_slice %16 {offsets = [24, 0], sizes = [8, 128], strides = [1, 1]} : vector<64x128xbf16> to vector<8x128xbf16>
    %c42 = arith.constant 42 : index
    %c0_13 = arith.constant 0 : index
    %26 = vector.load %arg13[%c42, %c0_13] : memref<104x128xbf16, #tpu.memory_space<vmem>>, vector<8x128xbf16>
    tpu.vector_store %arg13[%c42, %c0_13], %25 {strides = array<i32>} : memref<104x128xbf16, #tpu.memory_space<vmem>>, vector<8x128xbf16>,
    %27 = vector.extract_strided_slice %16 {offsets = [32, 0], sizes = [8, 128], strides = [1, 1]} : vector<64x128xbf16> to vector<8x128xbf16>
    %c52 = arith.constant 52 : index
    %c0_14 = arith.constant 0 : index
    %28 = vector.load %arg13[%c52, %c0_14] : memref<104x128xbf16, #tpu.memory_space<vmem>>, vector<8x128xbf16>
    tpu.vector_store %arg13[%c52, %c0_14], %27 {strides = array<i32>} : memref<104x128xbf16, #tpu.memory_space<vmem>>, vector<8x128xbf16>,
    %29 = vector.extract_strided_slice %16 {offsets = [40, 0], sizes = [8, 128], strides = [1, 1]} : vector<64x128xbf16> to vector<8x128xbf16>
    %c62 = arith.constant 62 : index
    %c0_15 = arith.constant 0 : index
    %30 = vector.load %arg13[%c62, %c0_15] : memref<104x128xbf16, #tpu.memory_space<vmem>>, vector<8x128xbf16>
    tpu.vector_store %arg13[%c62, %c0_15], %29 {strides = array<i32>} : memref<104x128xbf16, #tpu.memory_space<vmem>>, vector<8x128xbf16>,
    %31 = vector.extract_strided_slice %16 {offsets = [48, 0], sizes = [8, 128], strides = [1, 1]} : vector<64x128xbf16> to vector<8x128xbf16>
    %c72 = arith.constant 72 : index
    %c0_16 = arith.constant 0 : index
    %32 = vector.load %arg13[%c72, %c0_16] : memref<104x128xbf16, #tpu.memory_space<vmem>>, vector<8x128xbf16>
    tpu.vector_store %arg13[%c72, %c0_16], %31 {strides = array<i32>} : memref<104x128xbf16, #tpu.memory_space<vmem>>, vector<8x128xbf16>,
    %33 = vector.extract_strided_slice %16 {offsets = [56, 0], sizes = [8, 128], strides = [1, 1]} : vector<64x128xbf16> to vector<8x128xbf16>
    %c82 = arith.constant 82 : index
    %c0_17 = arith.constant 0 : index
    %34 = vector.load %arg13[%c82, %c0_17] : memref<104x128xbf16, #tpu.memory_space<vmem>>, vector<8x128xbf16>
    tpu.vector_store %arg13[%c82, %c0_17], %33 {strides = array<i32>} : memref<104x128xbf16, #tpu.memory_space<vmem>>, vector<8x128xbf16>,
    %c1 = arith.constant 1 : index
    %c0_18 = arith.constant 0 : index
    %35 = vector.load %arg13[%c1, %c0_18] : memref<104x128xbf16, #tpu.memory_space<vmem>>, vector<80x128xbf16>
    %c2 = arith.constant 2 : index
    %c0_19 = arith.constant 0 : index
    %36 = vector.load %arg13[%c2, %c0_19] : memref<104x128xbf16, #tpu.memory_space<vmem>>, vector<80x128xbf16>
    %c3 = arith.constant 3 : index
    %c0_20 = arith.constant 0 : index
    %37 = vector.load %arg13[%c3, %c0_20] : memref<104x128xbf16, #tpu.memory_space<vmem>>, vector<80x128xbf16>
    %38 = tpu.concatenate %35, %36, %37 in 1 : vector<80x128xbf16>, vector<80x128xbf16>, vector<80x128xbf16> -> vector<80x384xbf16>
    %c0_21 = arith.constant 0 : index
    %c0_22 = arith.constant 0 : index
    %c0_23 = arith.constant 0 : index
    %39 = vector.load %arg4[%c0_21, %c0_22, %c0_23] : memref<3x384x128xbf16, #tpu.memory_space<vmem>>, vector<1x384x128xbf16>
    %40 = vector.shape_cast %39 : vector<1x384x128xbf16> to vector<384x128xbf16>
    %cst_24 = arith.constant dense<0.000000e+00> : vector<80x128xf32>
    %41 = tpu.matmul %38, %40, %cst_24 {dimension_numbers = #tpu.dot_dimension_numbers<[1], [0], [0], [1], [0, 0, 1, 1], [], []>} : vector<80x384xbf16>, vector<384x128xbf16>, vector<80x128xf32> -> vector<80x128xf32>
    %c11 = arith.constant 11 : index
    %c0_25 = arith.constant 0 : index
    %42 = vector.load %arg13[%c11, %c0_25] : memref<104x128xbf16, #tpu.memory_space<vmem>>, vector<80x128xbf16>
    %c12_26 = arith.constant 12 : index
    %c0_27 = arith.constant 0 : index
    %43 = vector.load %arg13[%c12_26, %c0_27] : memref<104x128xbf16, #tpu.memory_space<vmem>>, vector<80x128xbf16>
    %c13 = arith.constant 13 : index
    %c0_28 = arith.constant 0 : index
    %44 = vector.load %arg13[%c13, %c0_28] : memref<104x128xbf16, #tpu.memory_space<vmem>>, vector<80x128xbf16>
    %45 = tpu.concatenate %42, %43, %44 in 1 : vector<80x128xbf16>, vector<80x128xbf16>, vector<80x128xbf16> -> vector<80x384xbf16>
    %c1_29 = arith.constant 1 : index
    %c0_30 = arith.constant 0 : index
    %c0_31 = arith.constant 0 : index
    %46 = vector.load %arg4[%c1_29, %c0_30, %c0_31] : memref<3x384x128xbf16, #tpu.memory_space<vmem>>, vector<1x384x128xbf16>
    %47 = vector.shape_cast %46 : vector<1x384x128xbf16> to vector<384x128xbf16>
    %cst_32 = arith.constant dense<0.000000e+00> : vector<80x128xf32>
    %48 = tpu.matmul %45, %47, %cst_32 {dimension_numbers = #tpu.dot_dimension_numbers<[1], [0], [0], [1], [0, 0, 1, 1], [], []>} : vector<80x384xbf16>, vector<384x128xbf16>, vector<80x128xf32> -> vector<80x128xf32>
    %c21 = arith.constant 21 : index
    %c0_33 = arith.constant 0 : index
    %49 = vector.load %arg13[%c21, %c0_33] : memref<104x128xbf16, #tpu.memory_space<vmem>>, vector<80x128xbf16>
    %c22_34 = arith.constant 22 : index
    %c0_35 = arith.constant 0 : index
    %50 = vector.load %arg13[%c22_34, %c0_35] : memref<104x128xbf16, #tpu.memory_space<vmem>>, vector<80x128xbf16>
    %c23 = arith.constant 23 : index
    %c0_36 = arith.constant 0 : index
    %51 = vector.load %arg13[%c23, %c0_36] : memref<104x128xbf16, #tpu.memory_space<vmem>>, vector<80x128xbf16>
    %52 = tpu.concatenate %49, %50, %51 in 1 : vector<80x128xbf16>, vector<80x128xbf16>, vector<80x128xbf16> -> vector<80x384xbf16>
    %c2_37 = arith.constant 2 : index
    %c0_38 = arith.constant 0 : index
    %c0_39 = arith.constant 0 : index
    %53 = vector.load %arg4[%c2_37, %c0_38, %c0_39] : memref<3x384x128xbf16, #tpu.memory_space<vmem>>, vector<1x384x128xbf16>
    %54 = vector.shape_cast %53 : vector<1x384x128xbf16> to vector<384x128xbf16>
    %cst_40 = arith.constant dense<0.000000e+00> : vector<80x128xf32>
    %55 = tpu.matmul %52, %54, %cst_40 {dimension_numbers = #tpu.dot_dimension_numbers<[1], [0], [0], [1], [0, 0, 1, 1], [], []>} : vector<80x384xbf16>, vector<384x128xbf16>, vector<80x128xf32> -> vector<80x128xf32>
    %56 = arith.addf %41, %48 : vector<80x128xf32>
    %57 = arith.addf %56, %55 : vector<80x128xf32>
    %c0_41 = arith.constant 0 : index
    %c0_42 = arith.constant 0 : index
    %58 = vector.load %arg5[%c0_41, %c0_42] : memref<1x128xf32, #tpu.memory_space<vmem>>, vector<1x128xf32>
    %59 = vector.broadcast %58 : vector<1x128xf32> to vector<80x128xf32>
    %60 = arith.addf %57, %59 : vector<80x128xf32>
    %cst_43 = arith.constant 0.000000e+00 : f32
    %61 = vector.broadcast %cst_43 : f32 to vector<80x128xf32>
    %62 = arith.maximumf %60, %61 : vector<80x128xf32>
    %c0_44 = arith.constant 0 : index
    %c0_45 = arith.constant 0 : index
    %63 = vector.load %arg14[%c0_44, %c0_45] : memref<80x128xf32, #tpu.memory_space<vmem>>, vector<80x128xf32>
    tpu.vector_store %arg14[%c0_44, %c0_45], %62 {strides = array<i32>} : memref<80x128xf32, #tpu.memory_space<vmem>>, vector<80x128xf32>,
    %cst_46 = arith.constant 0.000000e+00 : bf16
    %64 = vector.broadcast %cst_46 : bf16 to vector<48x128xbf16>
    %c0_47 = arith.constant 0 : index
    %c0_48 = arith.constant 0 : index
    %65 = vector.load %arg15[%c0_47, %c0_48] : memref<48x128xbf16, #tpu.memory_space<vmem>>, vector<48x128xbf16>
    tpu.vector_store %arg15[%c0_47, %c0_48], %64 {strides = array<i32>} : memref<48x128xbf16, #tpu.memory_space<vmem>>, vector<48x128xbf16>,
    %c0_49 = arith.constant 0 : index
    %c0_50 = arith.constant 0 : index
    %66 = tpu.strided_load %arg14[%c0_49, %c0_50] {strides = array<i32: 2, 1>} : memref<80x128xf32, #tpu.memory_space<vmem>>, vector<4x128xf32>
    %c1_51 = arith.constant 1 : index
    %c0_52 = arith.constant 0 : index
    %67 = tpu.strided_load %arg14[%c1_51, %c0_52] {strides = array<i32: 2, 1>} : memref<80x128xf32, #tpu.memory_space<vmem>>, vector<4x128xf32>
    %68 = arith.maximumf %66, %67 : vector<4x128xf32>
    %c10 = arith.constant 10 : index
    %c0_53 = arith.constant 0 : index
    %69 = tpu.strided_load %arg14[%c10, %c0_53] {strides = array<i32: 2, 1>} : memref<80x128xf32, #tpu.memory_space<vmem>>, vector<4x128xf32>
    %c11_54 = arith.constant 11 : index
    %c0_55 = arith.constant 0 : index
    %70 = tpu.strided_load %arg14[%c11_54, %c0_55] {strides = array<i32: 2, 1>} : memref<80x128xf32, #tpu.memory_space<vmem>>, vector<4x128xf32>
    %71 = arith.maximumf %69, %70 : vector<4x128xf32>
    %72 = arith.maximumf %68, %71 : vector<4x128xf32>
    %73 = arith.truncf %72 : vector<4x128xf32> to vector<4x128xbf16>
    %c10_56 = arith.constant 10 : index
    %c0_57 = arith.constant 0 : index
    %74 = vector.load %arg15[%c10_56, %c0_57] : memref<48x128xbf16, #tpu.memory_space<vmem>>, vector<4x128xbf16>
    tpu.vector_store %arg15[%c10_56, %c0_57], %73 {strides = array<i32>} : memref<48x128xbf16, #tpu.memory_space<vmem>>, vector<4x128xbf16>,
    %c20 = arith.constant 20 : index
    %c0_58 = arith.constant 0 : index
    %75 = tpu.strided_load %arg14[%c20, %c0_58] {strides = array<i32: 2, 1>} : memref<80x128xf32, #tpu.memory_space<vmem>>, vector<4x128xf32>
    %c21_59 = arith.constant 21 : index
    %c0_60 = arith.constant 0 : index
    %76 = tpu.strided_load %arg14[%c21_59, %c0_60] {strides = array<i32: 2, 1>} : memref<80x128xf32, #tpu.memory_space<vmem>>, vector<4x128xf32>
    %77 = arith.maximumf %75, %76 : vector<4x128xf32>
    %c30 = arith.constant 30 : index
    %c0_61 = arith.constant 0 : index
    %78 = tpu.strided_load %arg14[%c30, %c0_61] {strides = array<i32: 2, 1>} : memref<80x128xf32, #tpu.memory_space<vmem>>, vector<4x128xf32>
    %c31 = arith.constant 31 : index
    %c0_62 = arith.constant 0 : index
    %79 = tpu.strided_load %arg14[%c31, %c0_62] {strides = array<i32: 2, 1>} : memref<80x128xf32, #tpu.memory_space<vmem>>, vector<4x128xf32>
    %80 = arith.maximumf %78, %79 : vector<4x128xf32>
    %81 = arith.maximumf %77, %80 : vector<4x128xf32>
    %82 = arith.truncf %81 : vector<4x128xf32> to vector<4x128xbf16>
    %c18 = arith.constant 18 : index
    %c0_63 = arith.constant 0 : index
    %83 = vector.load %arg15[%c18, %c0_63] : memref<48x128xbf16, #tpu.memory_space<vmem>>, vector<4x128xbf16>
    tpu.vector_store %arg15[%c18, %c0_63], %82 {strides = array<i32>} : memref<48x128xbf16, #tpu.memory_space<vmem>>, vector<4x128xbf16>,
    %c40 = arith.constant 40 : index
    %c0_64 = arith.constant 0 : index
    %84 = tpu.strided_load %arg14[%c40, %c0_64] {strides = array<i32: 2, 1>} : memref<80x128xf32, #tpu.memory_space<vmem>>, vector<4x128xf32>
    %c41 = arith.constant 41 : index
    %c0_65 = arith.constant 0 : index
    %85 = tpu.strided_load %arg14[%c41, %c0_65] {strides = array<i32: 2, 1>} : memref<80x128xf32, #tpu.memory_space<vmem>>, vector<4x128xf32>
    %86 = arith.maximumf %84, %85 : vector<4x128xf32>
    %c50 = arith.constant 50 : index
    %c0_66 = arith.constant 0 : index
    %87 = tpu.strided_load %arg14[%c50, %c0_66] {strides = array<i32: 2, 1>} : memref<80x128xf32, #tpu.memory_space<vmem>>, vector<4x128xf32>
    %c51 = arith.constant 51 : index
    %c0_67 = arith.constant 0 : index
    %88 = tpu.strided_load %arg14[%c51, %c0_67] {strides = array<i32: 2, 1>} : memref<80x128xf32, #tpu.memory_space<vmem>>, vector<4x128xf32>
    %89 = arith.maximumf %87, %88 : vector<4x128xf32>
    %90 = arith.maximumf %86, %89 : vector<4x128xf32>
    %91 = arith.truncf %90 : vector<4x128xf32> to vector<4x128xbf16>
    %c26 = arith.constant 26 : index
    %c0_68 = arith.constant 0 : index
    %92 = vector.load %arg15[%c26, %c0_68] : memref<48x128xbf16, #tpu.memory_space<vmem>>, vector<4x128xbf16>
    tpu.vector_store %arg15[%c26, %c0_68], %91 {strides = array<i32>} : memref<48x128xbf16, #tpu.memory_space<vmem>>, vector<4x128xbf16>,
    %c60 = arith.constant 60 : index
    %c0_69 = arith.constant 0 : index
    %93 = tpu.strided_load %arg14[%c60, %c0_69] {strides = array<i32: 2, 1>} : memref<80x128xf32, #tpu.memory_space<vmem>>, vector<4x128xf32>
    %c61 = arith.constant 61 : index
    %c0_70 = arith.constant 0 : index
    %94 = tpu.strided_load %arg14[%c61, %c0_70] {strides = array<i32: 2, 1>} : memref<80x128xf32, #tpu.memory_space<vmem>>, vector<4x128xf32>
    %95 = arith.maximumf %93, %94 : vector<4x128xf32>
    %c70 = arith.constant 70 : index
    %c0_71 = arith.constant 0 : index
    %96 = tpu.strided_load %arg14[%c70, %c0_71] {strides = array<i32: 2, 1>} : memref<80x128xf32, #tpu.memory_space<vmem>>, vector<4x128xf32>
    %c71 = arith.constant 71 : index
    %c0_72 = arith.constant 0 : index
    %97 = tpu.strided_load %arg14[%c71, %c0_72] {strides = array<i32: 2, 1>} : memref<80x128xf32, #tpu.memory_space<vmem>>, vector<4x128xf32>
    %98 = arith.maximumf %96, %97 : vector<4x128xf32>
    %99 = arith.maximumf %95, %98 : vector<4x128xf32>
    %100 = arith.truncf %99 : vector<4x128xf32> to vector<4x128xbf16>
    %c34 = arith.constant 34 : index
    %c0_73 = arith.constant 0 : index
    %101 = vector.load %arg15[%c34, %c0_73] : memref<48x128xbf16, #tpu.memory_space<vmem>>, vector<4x128xbf16>
    tpu.vector_store %arg15[%c34, %c0_73], %100 {strides = array<i32>} : memref<48x128xbf16, #tpu.memory_space<vmem>>, vector<4x128xbf16>,
    %c1_74 = arith.constant 1 : index
    %c0_75 = arith.constant 0 : index
    %102 = vector.load %arg15[%c1_74, %c0_75] : memref<48x128xbf16, #tpu.memory_space<vmem>>, vector<28x128xbf16>
    %c2_76 = arith.constant 2 : index
    %c0_77 = arith.constant 0 : index
    %103 = vector.load %arg15[%c2_76, %c0_77] : memref<48x128xbf16, #tpu.memory_space<vmem>>, vector<28x128xbf16>
    %c3_78 = arith.constant 3 : index
    %c0_79 = arith.constant 0 : index
    %104 = vector.load %arg15[%c3_78, %c0_79] : memref<48x128xbf16, #tpu.memory_space<vmem>>, vector<28x128xbf16>
    %c9 = arith.constant 9 : index
    %c0_80 = arith.constant 0 : index
    %105 = vector.load %arg15[%c9, %c0_80] : memref<48x128xbf16, #tpu.memory_space<vmem>>, vector<28x128xbf16>
    %c10_81 = arith.constant 10 : index
    %c0_82 = arith.constant 0 : index
    %106 = vector.load %arg15[%c10_81, %c0_82] : memref<48x128xbf16, #tpu.memory_space<vmem>>, vector<28x128xbf16>
    %c11_83 = arith.constant 11 : index
    %c0_84 = arith.constant 0 : index
    %107 = vector.load %arg15[%c11_83, %c0_84] : memref<48x128xbf16, #tpu.memory_space<vmem>>, vector<28x128xbf16>
    %c17 = arith.constant 17 : index
    %c0_85 = arith.constant 0 : index
    %108 = vector.load %arg15[%c17, %c0_85] : memref<48x128xbf16, #tpu.memory_space<vmem>>, vector<28x128xbf16>
    %c18_86 = arith.constant 18 : index
    %c0_87 = arith.constant 0 : index
    %109 = vector.load %arg15[%c18_86, %c0_87] : memref<48x128xbf16, #tpu.memory_space<vmem>>, vector<28x128xbf16>
    %c19 = arith.constant 19 : index
    %c0_88 = arith.constant 0 : index
    %110 = vector.load %arg15[%c19, %c0_88] : memref<48x128xbf16, #tpu.memory_space<vmem>>, vector<28x128xbf16>
    %111 = tpu.concatenate %102, %103, %104, %105, %106, %107, %108, %109, %110 in 1 : vector<28x128xbf16>, vector<28x128xbf16>, vector<28x128xbf16>, vector<28x128xbf16>, vector<28x128xbf16>, vector<28x128xbf16>, vector<28x128xbf16>, vector<28x128xbf16>, vector<28x128xbf16> -> vector<28x1152xbf16>
    %c0_89 = arith.constant 0 : index
    %c0_90 = arith.constant 0 : index
    %112 = vector.load %arg6[%c0_89, %c0_90] : memref<1152x256xbf16, #tpu.memory_space<vmem>>, vector<1152x256xbf16>
    %cst_91 = arith.constant dense<0.000000e+00> : vector<28x256xf32>
    %113 = tpu.matmul %111, %112, %cst_91 {dimension_numbers = #tpu.dot_dimension_numbers<[1], [0], [0], [1], [0, 0, 1, 1], [], []>} : vector<28x1152xbf16>, vector<1152x256xbf16>, vector<28x256xf32> -> vector<28x256xf32>
    %c0_92 = arith.constant 0 : index
    %c0_93 = arith.constant 0 : index
    %114 = vector.load %arg7[%c0_92, %c0_93] : memref<1x256xf32, #tpu.memory_space<vmem>>, vector<1x256xf32>
    %115 = vector.broadcast %114 : vector<1x256xf32> to vector<28x256xf32>
    %116 = arith.addf %113, %115 : vector<28x256xf32>
    %cst_94 = arith.constant 0.000000e+00 : f32
    %117 = vector.broadcast %cst_94 : f32 to vector<28x256xf32>
    %118 = arith.maximumf %116, %117 : vector<28x256xf32>
    %119 = vector.extract_strided_slice %118 {offsets = [0, 0], sizes = [4, 256], strides = [1, 1]} : vector<28x256xf32> to vector<4x256xf32>
    %120 = vector.extract_strided_slice %118 {offsets = [8, 0], sizes = [4, 256], strides = [1, 1]} : vector<28x256xf32> to vector<4x256xf32>
    %121 = arith.addf %119, %120 : vector<4x256xf32>
    %122 = vector.extract_strided_slice %118 {offsets = [16, 0], sizes = [4, 256], strides = [1, 1]} : vector<28x256xf32> to vector<4x256xf32>
    %123 = arith.addf %121, %122 : vector<4x256xf32>
    %124 = vector.extract_strided_slice %118 {offsets = [24, 0], sizes = [4, 256], strides = [1, 1]} : vector<28x256xf32> to vector<4x256xf32>
    %125 = arith.addf %123, %124 : vector<4x256xf32>
    %cst_95 = arith.constant dense<0.000000e+00> : vector<256xf32>
    %126 = vector.multi_reduction <add>, %125, %cst_95 [0] : vector<4x256xf32> to vector<256xf32>
    %127 = vector.shape_cast %126 : vector<256xf32> to vector<1x256xf32>
    %cst_96 = arith.constant 6.250000e-02 : f32
    %128 = vector.broadcast %cst_96 : f32 to vector<1x256xf32>
    %129 = arith.mulf %127, %128 : vector<1x256xf32>
    %130 = arith.truncf %129 : vector<1x256xf32> to vector<1x256xbf16>
    %c0_97 = arith.constant 0 : index
    %c0_98 = arith.constant 0 : index
    %131 = vector.load %arg8[%c0_97, %c0_98] : memref<256x64xbf16, #tpu.memory_space<vmem>>, vector<256x64xbf16>
    %cst_99 = arith.constant dense<0.000000e+00> : vector<1x64xf32>
    %132 = tpu.matmul %130, %131, %cst_99 {dimension_numbers = #tpu.dot_dimension_numbers<[1], [0], [0], [1], [0, 0, 1, 1], [], []>} : vector<1x256xbf16>, vector<256x64xbf16>, vector<1x64xf32> -> vector<1x64xf32>
    %c0_100 = arith.constant 0 : index
    %c0_101 = arith.constant 0 : index
    %133 = vector.load %arg9[%c0_100, %c0_101] : memref<1x64xf32, #tpu.memory_space<vmem>>, vector<1x64xf32>
    %134 = arith.addf %132, %133 : vector<1x64xf32>
    %cst_102 = arith.constant 0.000000e+00 : f32
    %135 = vector.broadcast %cst_102 : f32 to vector<1x64xf32>
    %136 = arith.maximumf %134, %135 : vector<1x64xf32>
    %137 = arith.truncf %136 : vector<1x64xf32> to vector<1x64xbf16>
    %c0_103 = arith.constant 0 : index
    %c0_104 = arith.constant 0 : index
    %138 = vector.load %arg10[%c0_103, %c0_104] : memref<64x128xbf16, #tpu.memory_space<vmem>>, vector<64x128xbf16>
    %cst_105 = arith.constant dense<0.000000e+00> : vector<1x128xf32>
    %139 = tpu.matmul %137, %138, %cst_105 {dimension_numbers = #tpu.dot_dimension_numbers<[1], [0], [0], [1], [0, 0, 1, 1], [], []>} : vector<1x64xbf16>, vector<64x128xbf16>, vector<1x128xf32> -> vector<1x128xf32>
    %c0_106 = arith.constant 0 : index
    %c0_107 = arith.constant 0 : index
    %140 = vector.load %arg11[%c0_106, %c0_107] : memref<1x128xf32, #tpu.memory_space<vmem>>, vector<1x128xf32>
    %141 = arith.addf %139, %140 : vector<1x128xf32>
    %c0_108 = arith.constant 0 : index
    %c0_109 = arith.constant 0 : index
    %c0_110 = arith.constant 0 : index
    %142 = vector.load %arg12[%c0_108, %c0_109, %c0_110] : memref<1x1x128xf32, #tpu.memory_space<vmem>>, vector<1x1x128xf32>
    %143 = vector.shape_cast %142 : vector<1x1x128xf32> to vector<1x128xf32>
    %144 = vector.shape_cast %141 : vector<1x128xf32> to vector<1x1x128xf32>
    tpu.vector_store %arg12[%c0_108, %c0_109, %c0_110], %144 {strides = array<i32>} : memref<1x1x128xf32, #tpu.memory_space<vmem>>, vector<1x1x128xf32>,
    return
  }
  func.func @transform_0(%arg0: i32) -> (i32, i32, i32) {
    %c0_i32 = arith.constant 0 : i32
    %c0_i32_0 = arith.constant 0 : i32
    %c0_i32_1 = arith.constant 0 : i32
    return %arg0, %c0_i32, %c0_i32_0 : i32, i32, i32
  }
  func.func @transform_1(%arg0: i32) -> (i32, i32) {
    %c0_i32 = arith.constant 0 : i32
    %c0_i32_0 = arith.constant 0 : i32
    %c0_i32_1 = arith.constant 0 : i32
    return %c0_i32, %c0_i32_0 : i32, i32
  }
  func.func @transform_2(%arg0: i32) -> (i32, i32) {
    %c0_i32 = arith.constant 0 : i32
    %c0_i32_0 = arith.constant 0 : i32
    %c0_i32_1 = arith.constant 0 : i32
    return %c0_i32, %c0_i32_0 : i32, i32
  }
  func.func @transform_3(%arg0: i32) -> (i32, i32, i32) {
    %c0_i32 = arith.constant 0 : i32
    %c0_i32_0 = arith.constant 0 : i32
    %c0_i32_1 = arith.constant 0 : i32
    %c0_i32_2 = arith.constant 0 : i32
    return %c0_i32, %c0_i32_0, %c0_i32_1 : i32, i32, i32
  }
  func.func @transform_4(%arg0: i32) -> (i32, i32) {
    %c0_i32 = arith.constant 0 : i32
    %c0_i32_0 = arith.constant 0 : i32
    %c0_i32_1 = arith.constant 0 : i32
    return %c0_i32, %c0_i32_0 : i32, i32
  }
  func.func @transform_5(%arg0: i32) -> (i32, i32) {
    %c0_i32 = arith.constant 0 : i32
    %c0_i32_0 = arith.constant 0 : i32
    %c0_i32_1 = arith.constant 0 : i32
    return %c0_i32, %c0_i32_0 : i32, i32
  }
  func.func @transform_6(%arg0: i32) -> (i32, i32) {
    %c0_i32 = arith.constant 0 : i32
    %c0_i32_0 = arith.constant 0 : i32
    %c0_i32_1 = arith.constant 0 : i32
    return %c0_i32, %c0_i32_0 : i32, i32
  }
  func.func @transform_7(%arg0: i32) -> (i32, i32) {
    %c0_i32 = arith.constant 0 : i32
    %c0_i32_0 = arith.constant 0 : i32
    %c0_i32_1 = arith.constant 0 : i32
    return %c0_i32, %c0_i32_0 : i32, i32
  }
  func.func @transform_8(%arg0: i32) -> (i32, i32) {
    %c0_i32 = arith.constant 0 : i32
    %c0_i32_0 = arith.constant 0 : i32
    %c0_i32_1 = arith.constant 0 : i32
    return %c0_i32, %c0_i32_0 : i32, i32
  }
  func.func @transform_9(%arg0: i32) -> (i32, i32) {
    %c0_i32 = arith.constant 0 : i32
    %c0_i32_0 = arith.constant 0 : i32
    %c0_i32_1 = arith.constant 0 : i32
    return %c0_i32, %c0_i32_0 : i32, i32
  }
  func.func @transform_10(%arg0: i32) -> (i32, i32) {
    %c0_i32 = arith.constant 0 : i32
    %c0_i32_0 = arith.constant 0 : i32
    %c0_i32_1 = arith.constant 0 : i32
    return %c0_i32, %c0_i32_0 : i32, i32
  }
  func.func @transform_11(%arg0: i32) -> (i32, i32, i32) {
    %c0_i32 = arith.constant 0 : i32
    %c0_i32_0 = arith.constant 0 : i32
    %c0_i32_1 = arith.constant 0 : i32
    return %arg0, %c0_i32, %c0_i32_0 : i32, i32, i32
  }
}

</mosaic_0001>

<bundles_post_ra>
// kernel: vgg7_forward.1
= control target key start
LH: loop header
LB: loop body
LE: loop exit
PB: predicated region body
PF: predicated region fallthrough
CT: control target
= control target key end

     0   :  { %s7350_s0 = inlined_call_operand.vmem [shape: bf16[2,256,16], index: 0, kind: input, shape index: {}]   ;;  %s7351_s1 = inlined_call_operand.vmem [shape: bf16[16,128], index: 1, kind: input, shape index: {}]   ;;  %s7352_s2 = inlined_call_operand.vmem [shape: f32[1,128], index: 2, kind: input, shape index: {}]   ;;  %s7353_s3 = inlined_call_operand.vmem [shape: bf16[3,384,128], index: 3, kind: input, shape index: {}]   ;;  %s7354_s4 = inlined_call_operand.vmem [shape: f32[1,128], index: 4, kind: input, shape index: {}]   ;;  %s7355_s5 = inlined_call_operand.vmem [shape: bf16[1152,256], index: 5, kind: input, shape index: {}]   ;;  %s7356_s6 = inlined_call_operand.vmem [shape: f32[1,256], index: 6, kind: input, shape index: {}]   ;;  %s7357_s7 = inlined_call_operand.vmem [shape: bf16[256,64], index: 7, kind: input, shape index: {}]   ;;  %s7358_s8 = inlined_call_operand.vmem [shape: f32[1,64], index: 8, kind: input, shape index: {}]   ;;  %s7359_s9 = inlined_call_operand.vmem [shape: bf16[64,128], index: 9, kind: input, shape index: {}]   ;;  %s7360_s10 = inlined_call_operand.vmem [shape: f32[1,128], index: 10, kind: input, shape index: {}]   ;;  %s7361_s11 = inlined_call_operand.hbm [shape: f32[2,1,128], index: 11, kind: output, shape index: {}]  }
   0x1   :  { %7362 = sst [smem:[#allocation8_spill]] %s7350_s0 }
   0x2   :  { %16 = vsyncpa [#allocation6], 0 }
   0x3   :  { %18 = vsyncpa [#allocation6 + $0x1], 0  ;;  %s5765_s17 = smov 0   ;;  %s5767_s18 = smov 0  }
   0x4   :  { %s5769_s19 = smov 0   ;;  %s5771_s20 = smov 0  }
   0x5 LB: > { %s5786_s21 = sadd.s32 4294967295, %s5699_s20   ;;  %s4426_s22 = sadd.s32 4294967294, %s5699_s20   ;;  %s5699_s20 = sphi %s5771_s20, %s7369_s20   ;;  %s5695_s19 = sphi %s5769_s19, %s7368_s19   ;;  %s5691_s18 = sphi %s5767_s18, %s7367_s18   ;;  %s5687_s17 = sphi %s5765_s17, %s7366_s17  }
   0x6   : > { %s5790_s23 = sadd.s32 1, %s5699_s20   ;;  %s267_s24 = sadd.s32 1, %s5695_s19 }
   0x7   : > { %s264_s25 = ssub.s32 %s5699_s20, %s5790_s23  ;;  %p277_p0 = scmp.ne.s32.totalorder %s5695_s19, %s5691_s18 }
   0x8   : > { %p265_p1 = scmp.eq.s32.totalorder %s264_s25, 0  ;;  %p278_p2 = scmp.eq.s32.totalorder %s5786_s21, 1 }
   0x9   : > { %p283_p3 = scmp.ne.s32.totalorder %s5691_s18, %s5687_s17  ;;  %p284_p4 = scmp.eq.s32.totalorder %s4426_s22, 1 }
   0xa   : > { %s5801_s26 = scalar_select %p265_p1, %s5695_s19, %s267_s24  }
   0xb   : > { %p5803_p5 = por %p278_p2, %p277_p0  ;;  %p5807_p6 = por %p284_p4, %p283_p3 }
   0xc   : > { %p4429_p7 = scmp.ge.s32.totalorder %s5699_s20, 1  ;;  %p340_p8 = scmp.lt.s32.totalorder %s5699_s20, 3 }
   0xe   : > { %p341_p9 = pnand %p4429_p7, %p340_p8 }
   0xf   : > { %p379_p10 = scmp.lt.s32.totalorder (!%p341_p9), %s5786_s21, 1  ;;  %s7365_s0 = sld [smem:[#allocation8_spill]] (!%p341_p9) }
  0x10   : > { %344 = sbr.rel (%p341_p9) target bundleno = 1409 (0x581), region = 64  ;;  %s377_s22 = sand.u32 (!%p341_p9), 1, %s5691_s18  }
  0x11   : > { %s4846_s29 = sshll.u32 (!%p341_p9), %s5786_s21, 4  ;;  %s378_s30 = scalar_lea.vmem (!%p341_p9), [#allocation5], %s377_s22 }
  0x12   : > { %s7309_s15 = scalar_lea.hbm (!%p341_p9), %s7361_s11, %s4846_s29 }
  0x15   : > { %v5277_v0 = vld [vmem:[%s7351_s1] sm:$0xff]   ;;  %vm512_vm0 = vcmask 130048   ;;  %s380_s12 = scalar_select %p379_p10, %s5786_s21, 1  ;;  %v5701_v17 = vmov 0.0   ;;  %v5294_v18 = vld [vmem:[%s7353_s3 + $0x178] sm:$0xff]   ;;  %v5295_v19 = vld [vmem:[%s7353_s3 + $0x170] sm:$0xff]  }
  0x16   : > { %5081 = vmatprep.subr.bf16.mxu0 %v5277_v0  ;;  %v5702_v20 = vmov 0   ;;  %v5298_v21 = vld [vmem:[%s7353_s3 + $0x138] sm:$0xff]   ;;  %v5300_v23 = vld [vmem:[%s7353_s3 + $0x130] sm:$0xff]   ;;  %v5296_v24 = vld [vmem:[%s7353_s3 + $0x168] sm:$0xff]   ;;  %vm5703_vm1 = vmmov 0   ;;  %vm943_vm2 = vcmask 1046528  }
  0x17   : > { %5082 = vmatpush3.bf16.msra.mxu0 %v5277_v0  ;;  %s4849_s13 = sshll.u32 %s380_s12, 7  ;;  %783 = vst [vmem:[#allocation2 + $0x4] sm:$0xf] %v5702_v20  ;;  %784 = vst [vmem:[#allocation2 + $0x8] sm:$0xf] %v5702_v20  ;;  %v5299_v22 = vld [vmem:[%s7353_s3 + $0xf8] sm:$0xff]   ;;  %4877 = vmatprep.subr.bf16.mxu1 %v5298_v21 }
  0x18   : > { %s5821_s16 = scalar_lea.vmem %s7365_s0, %s4849_s13  ;;  %5115 = vmatprep.subr.bf16.mxu0 %v5701_v17  ;;  %782 = vst [vmem:[#allocation2] sm:$0xf] %v5702_v20  ;;  %785 = vst [vmem:[#allocation2 + $0xc] sm:$0xf] %v5702_v20  ;;  %4878 = vmatpush3.bf16.msra.mxu1 %v5299_v22  ;;  %v5301_v25 = vld [vmem:[%s7353_s3 + $0xf0] sm:$0xff]   ;;  %v5303_v26 = vld [vmem:[%s7353_s3 + $0x128] sm:$0xff]  }
  0x19   : > { %v5278_v1 = vld [vmem:[%s5821_s16] sm:$0xff]   ;;  %v5279_v2 = vld [vmem:[%s5821_s16 + $0x8] sm:$0xff]   ;;  %v5280_v3 = vld [vmem:[%s5821_s16 + $0x10] sm:$0xff]   ;;  %786 = vst [vmem:[#allocation2 + $0x10] sm:$0xf] %v5702_v20  ;;  %4879 = vmatprep.subr.bf16.mxu1 %v5300_v23  ;;  %vm4090_vm6 = vcmask 1043456  }
  0x1a   : > { %5083 = vmatprep.mubr.msk.bf16.mxu0 %vm512_vm0, %v5278_v1  ;;  %v5281_v4 = vld [vmem:[%s5821_s16 + $0x18] sm:$0xff]   ;;  %v5282_v5 = vld [vmem:[%s5821_s16 + $0x20] sm:$0xff]   ;;  %v5283_v6 = vld [vmem:[%s5821_s16 + $0x28] sm:$0xff]   ;;  %787 = vst [vmem:[#allocation2 + $0x14] sm:$0xf] %v5702_v20  ;;  %vm4313_vm7 = vcmask 523264  }
  0x1b   : > { %5084 = vmatmul.mubr.msk.bf16.vlgmr.msra.gmra.mxu0 %vm512_vm0, %v5279_v2  ;;  %v5284_v7 = vld [vmem:[%s5821_s16 + $0x30] sm:$0xff]   ;;  %v5285_v8 = vld [vmem:[%s5821_s16 + $0x38] sm:$0xff]   ;;  %v5286_v9 = vld [vmem:[%s5821_s16 + $0x40] sm:$0xff]   ;;  %788 = vst [vmem:[#allocation2 + $0x18] sm:$0xf] %v5702_v20  ;;  %s4371_s12 = sshll.u32 %s378_s30, 4  ;;  %s7311_s12 = int_to_ptr.vmem [resolvable:$true] %s4371_s12 }
  0x1c   : > { %5087 = vmatprep.mubr.msk.bf16.mxu0 %vm512_vm0, %v5280_v3  ;;  %v5287_v10 = vld [vmem:[%s5821_s16 + $0x48] sm:$0xff]   ;;  %v5288_v11 = vld [vmem:[%s5821_s16 + $0x50] sm:$0xff]   ;;  %v5289_v12 = vld [vmem:[%s5821_s16 + $0x58] sm:$0xff]   ;;  %5116 = vmatpush3.bf16.msra.mxu0 %v5294_v18  ;;  %789 = vst [vmem:[#allocation2 + $0x1c] sm:$0xf] %v5702_v20  ;;  %s5639_s24 = scalar_lea.vmem %s7311_s12, 16 }
  0x1d   : > { %v5290_v13 = vld [vmem:[%s5821_s16 + $0x60] sm:$0xff]   ;;  %v5291_v14 = vld [vmem:[%s5821_s16 + $0x68] sm:$0xff]   ;;  %v5292_v15 = vld [vmem:[%s5821_s16 + $0x70] sm:$0xff]   ;;  %5117 = vmatprep.subr.bf16.mxu0 %v5701_v17  ;;  %790 = vst [vmem:[#allocation2 + $0x20] sm:$0xf] %v5702_v20  ;;  %4880 = vmatpush3.bf16.msra.mxu1 %v5301_v25  ;;  %p5640_p11 = scmp.ne.s32.totalorder %s7311_s12, %s5639_s24  ;;  %s5704_s21 = smov [#allocation5]  }
  0x1e   : > { %v5293_v16 = vld [vmem:[%s5821_s16 + $0x78] sm:$0xff]   ;;  %791 = vst [vmem:[#allocation2 + $0x24] sm:$0xf] %v5702_v20  ;;  %792 = vst [vmem:[#allocation2 + $0x28] sm:$0xf] %v5702_v20  ;;  %v5304_v27 = vld [vmem:[%s7353_s3 + $0xe8] sm:$0xff]   ;;  %4881 = vmatprep.subr.bf16.mxu1 %v5303_v26 }
  0x1f   : > { %793 = vst [vmem:[#allocation2 + $0x2c] sm:$0xf] %v5702_v20  ;;  %794 = vst [vmem:[#allocation2 + $0x30] sm:$0xf] %v5702_v20  ;;  %v5297_v28 = vld [vmem:[%s7353_s3 + $0x160] sm:$0xff]   ;;  %v5302_v31 = vld [vmem:[%s7353_s3 + $0x158] sm:$0xff]   ;;  %p5641_p12 = pnand %p5640_p11, %p5803_p5 }
  0x20   : > { %5118 = vmatpush3.bf16.msra.mxu0 %v5295_v19  ;;  %2615 = vst [vmem:[#allocation4] sm:$0xf] %v5702_v20  ;;  %2616 = vst [vmem:[#allocation4 + $0x4] sm:$0xf] %v5702_v20  ;;  %v5305_v29 = vld [vmem:[%s7353_s3 + $0x120] sm:$0xff]   ;;  %v5307_v32 = vld [vmem:[%s7353_s3 + $0x150] sm:$0xff]  }
  0x21   : > { %5119 = vmatprep.subr.bf16.mxu0 %v5701_v17  ;;  %2617 = vst [vmem:[#allocation4 + $0x8] sm:$0xf] %v5702_v20  ;;  %2618 = vst [vmem:[#allocation4 + $0xc] sm:$0xf] %v5702_v20  ;;  %4882 = vmatpush3.bf16.msra.mxu1 %v5304_v27  ;;  %v5306_v30 = vld [vmem:[%s7353_s3 + $0xe0] sm:$0xff]   ;;  %v5308_v33 = vld [vmem:[%s7353_s3 + $0x118] sm:$0xff]   ;;  %p5642_p13 = pneg %p5641_p12 }
  0x22   : > { %2619 = vst [vmem:[#allocation4 + $0x10] sm:$0xf] %v5702_v20  ;;  %2620 = vst [vmem:[#allocation4 + $0x14] sm:$0xf] %v5702_v20  ;;  %4883 = vmatprep.subr.bf16.mxu1 %v5305_v29  ;;  %v5309_v34 = vld [vmem:[%s7353_s3 + $0xd8] sm:$0xff]   ;;  %v5310_v35 = vld [vmem:[%s7353_s3 + $0x110] sm:$0xff]  }
  0x23   : > { %5088 = vmatmul.mubr.msk.bf16.gmra.mxu0 %vm512_vm0, %v5281_v4  ;;  %v5311_v36 = vld [vmem:[%s7353_s3 + $0xd0] sm:$0xff]   ;;  %v5312_v37 = vld [vmem:[%s7353_s3 + $0x148] sm:$0xff]   ;;  %v5315_v40 = vld [vmem:[%s7353_s3 + $0x140] sm:$0xff]   ;;  %vm893_vm3 = vsmask.f32 7424  ;;  %s4359_s16 = scalar_lea.sflag [#allocation6], %s377_s22 }
  0x24   : > { %5091 = vmatprep.mubr.msk.bf16.mxu0 %vm512_vm0, %v5282_v5  ;;  %5120 = vmatpush3.bf16.msra.mxu0 %v5296_v24  ;;  %v5313_v38 = vld [vmem:[%s7353_s3 + $0x108] sm:$0xff]   ;;  %v5316_v41 = vld [vmem:[%s7353_s3 + $0x100] sm:$0xff]   ;;  %v5321_v43 = vld [vmem:[%s7353_s3 + $0x1f8] sm:$0xff]   ;;  %vm1133_vm4 = vsmask.f32 6400  ;;  %s5643_s25 = sshll.u32 %s5704_s21, 4  ;;  %s5644_s25 = int_to_ptr.vmem [resolvable:$false] %s5643_s25 }
  0x25   : > { %5121 = vmatprep.subr.bf16.mxu0 %v5701_v17  ;;  %4884 = vmatpush3.bf16.msra.mxu1 %v5306_v30  ;;  %v5314_v39 = vld [vmem:[%s7353_s3 + $0xc8] sm:$0xff]   ;;  %v5317_v42 = vld [vmem:[%s7353_s3 + $0xc0] sm:$0xff]   ;;  %vm1727_vm5 = vsmask.f32 5376  ;;  %s5645_s13 = scalar_lea.vmem %s5644_s25, 32  ;;  %p5646_p0 = scmp.lt.s32.totalorder %s7311_s12, %s5644_s25 }
  0x26   : > { %4885 = vmatprep.subr.bf16.mxu1 %v5308_v33  ;;  %v5964_v63 = vld [vmem:[#allocation2 + $0x30] ss:$0 sps:$4 sm:$0x77]   ;;  %v5969_v0 = vld [vmem:[%s7352_s2] ss:$0 sm:$0xff]  ;;  %p5647_p1 = scmp.lt.s32.totalorder %s5645_s13, %s5639_s24 }
  0x27   : > { %v5371_v2 = vld [vmem:[#allocation2 + $0x30] ss:$0 sps:$4 sm:$0xff]   ;;  %v1657_v4 = vshll.u32 %v5964_v63, 16  ;;  %v1661_v21 = vshrl.u32 %v5964_v63, 16 }
  0x28   : > { %5122 = vmatpush3.bf16.msra.mxu0 %v5297_v28  ;;  %p5648_p2 = por %p5647_p1, %p5646_p0 }
  0x29   : > { %5123 = vmatprep.subr.bf16.mxu0 %v5701_v17  ;;  %4886 = vmatpush3.bf16.msra.mxu1 %v5309_v34 }
  0x2a   : > { %4887 = vmatprep.subr.bf16.mxu1 %v5310_v35  ;;  %p5649_p3 = pnand %p5648_p2, %p5642_p13 }
  0x2b   : > { %5092 = vmatmul.mubr.msk.bf16.gmra.mxu0 %vm512_vm0, %v5283_v6 }
  0x2c   : > { %5095 = vmatprep.mubr.msk.bf16.mxu0 %vm512_vm0, %v5284_v7  ;;  %5124 = vmatpush3.bf16.msra.mxu0 %v5302_v31 }
  0x2d   : > { %5125 = vmatprep.subr.bf16.mxu0 %v5701_v17  ;;  %4888 = vmatpush3.bf16.msra.mxu1 %v5311_v36 }
  0x2e   : > { %4889 = vmatprep.subr.bf16.mxu1 %v5313_v38 }
  0x30   : > { %5126 = vmatpush3.bf16.msra.mxu0 %v5307_v32 }
  0x31   : > { %5127 = vmatprep.subr.bf16.mxu0 %v5701_v17  ;;  %4890 = vmatpush3.bf16.msra.mxu1 %v5314_v39 }
  0x32   : > { %4891 = vmatprep.subr.bf16.mxu1 %v5316_v41 }
  0x33   : > { %5096 = vmatmul.mubr.msk.bf16.gmra.mxu0 %vm512_vm0, %v5285_v8 }
  0x34   : > { %5099 = vmatprep.mubr.msk.bf16.mxu0 %vm512_vm0, %v5286_v9  ;;  %5128 = vmatpush3.bf16.msra.mxu0 %v5312_v37 }
  0x35   : > { %5129 = vmatprep.subr.bf16.mxu0 %v5701_v17  ;;  %4892 = vmatpush3.bf16.msra.mxu1 %v5317_v42 }
  0x36   : > { %4936 = vmatprep.subr.bf16.mxu1 %v5321_v43 }
  0x38   : > { %5130 = vmatpush3.bf16.msra.mxu0 %v5315_v40 }
  0x39   : > { %5151 = vmatprep.subr.bf16.mxu0 %v5701_v17 }
  0x3b   : > { %5100 = vmatmul.mubr.msk.bf16.gmra.mxu0 %vm512_vm0, %v5287_v10 }
  0x3c   : > { %5103 = vmatprep.mubr.msk.bf16.mxu0 %vm512_vm0, %v5288_v11 }
  0x43   : > { %5104 = vmatmul.mubr.msk.bf16.gmra.mxu0 %vm512_vm0, %v5289_v12  ;;  %v5982_v12 = vrot.slane %v5371_v2, 1 }
  0x44   : > { %5107 = vmatprep.mubr.msk.bf16.mxu0 %vm512_vm0, %v5290_v13 }
  0x45   : > { %v1854_v30 = vshrl.u32 %v5982_v12, 16 }
  0x4b   : > { %5108 = vmatmul.mubr.msk.bf16.gmra.mxu0 %vm512_vm0, %v5291_v14 }
  0x4c   : > { %5111 = vmatprep.mubr.msk.bf16.mxu0 %vm512_vm0, %v5292_v15  ;;  %v5991_v15 = vrot.slane %v1657_v4, 1 }
  0x4e   : > { %v6009_v35 = vor.u32 %v1661_v21, %v5991_v15 }
  0x53   : > { %5112 = vmatmul.mubr.msk.bf16.gmra.mxu0 %vm512_vm0, %v5293_v16 }
  0x54   : > { %5131 = vmatprep.mubr.msk.bf16.mxu0 %vm5703_vm1, %v5701_v17 }
  0xdb   : > { %v5085_v44 = vpop.f32.mrf.mxu0 }
  0xdc   : > { %v604_v5 = vadd.f32 %v5085_v44, %v5969_v0 }
  0xdd   : > { %v595_v45 = vpop.f32.mrf.mxu0 }
  0xde   : > { %v596_v6 = vadd.f32 %v5969_v0, %v595_v45  ;;  %v724_v16 = vmax.f32 %v604_v5, 0.0 }
  0xdf   : > { %v5086_v46 = vpop.f32.mrf.mxu0 }
  0xe0   : > { %v607_v7 = vadd.f32 %v5086_v46, %v5969_v0  ;;  %v722_v18 = vmax.f32 %v596_v6, 0.0 }
  0xe1   : > { %v598_v47 = vpop.f32.mrf.mxu0 }
  0xe2   : > { %v599_v9 = vadd.f32 %v5969_v0, %v598_v47  ;;  %v725_v22 = vmax.f32 %v607_v7, 0.0 }
  0xe3   : > { %v5089_v48 = vpop.f32.mrf.mxu0 }
  0xe4   : > { %v5985_v13 = vadd.f32 %v5089_v48, %v5969_v0  ;;  %v723_v27 = vmax.f32 %v599_v9, 0.0 }
  0xe5   : > { %v611_v49 = vpop.f32.mrf.mxu0 }
  0xe6   : > { %v612_v19 = vadd.f32 %v5969_v0, %v611_v49  ;;  %v728_v31 = vmax.f32 %v5985_v13, 0.0 }
  0xe7   : > { %v5090_v50 = vpop.f32.mrf.mxu0 }
  0xe8   : > { %v5996_v23 = vadd.f32 %v5090_v50, %v5969_v0  ;;  %v726_v36 = vmax.f32 %v612_v19, 0.0 }
  0xe9   : > { %v614_v51 = vpop.f32.mrf.mxu0 }
  0xea   : > { %v5999_v24 = vadd.f32 %v5969_v0, %v614_v51  ;;  %v729_v40 = vmax.f32 %v5996_v23, 0.0  ;;  %v1848_v23 = vshll.u32 %v6009_v35, 16 }
  0xeb   : > { %v5093_v52 = vpop.f32.mrf.mxu0 }
  0xec   : > { %v636_v10 = vadd.f32 %v5093_v52, %v5969_v0  ;;  %v727_v41 = vmax.f32 %v5999_v24, 0.0 }
  0xed   : > { %v627_v53 = vpop.f32.mrf.mxu0 }
  0xee   : > { %v628_v11 = vadd.f32 %v5969_v0, %v627_v53  ;;  %v732_v28 = vmax.f32 %v636_v10, 0.0 }
  0xef   : > { %v5094_v54 = vpop.f32.mrf.mxu0 }
  0xf0   : > { %v639_v25 = vadd.f32 %v5094_v54, %v5969_v0  ;;  %v730_v29 = vmax.f32 %v628_v11, 0.0  ;;  %v756_v45 = vmax.f32 %v724_v16, %v732_v28 }
  0xf1   : > { %v630_v55 = vpop.f32.mrf.mxu0 }
  0xf2   : > { %v631_v32 = vadd.f32 %v5969_v0, %v630_v55  ;;  %v733_v42 = vmax.f32 %v639_v25, 0.0  ;;  %v754_v46 = vmax.f32 %v722_v18, %v730_v29 }
  0xf3   : > { %v5097_v56 = vpop.f32.mrf.mxu0 }
  0xf4   : > { %v731_v49 = vmax.f32 %v631_v32, 0.0  ;;  %v6019_v50 = vadd.f32 %v5097_v56, %v5969_v0 }
  0xf5   : > { %v643_v57 = vpop.f32.mrf.mxu0 }
  0xf6   : > { %v644_v33 = vadd.f32 %v5969_v0, %v643_v57  ;;  %v755_v10 = vmax.f32 %v723_v27, %v731_v49  ;;  %v736_v11 = vmax.f32 %v6019_v50, 0.0 }
  0xf7   : > { %v5960_v58 = vpop.f32.mrf.mxu0 }
  0xf8   : > { %v734_v51 = vmax.f32 %v644_v33, 0.0 }
  0xf9   : > { %v5962_v59 = vpop.f32.mrf.mxu0 }
  0xfa   : > { %v647_v2 = vadd.f32 %v5969_v0, %v5962_v59  ;;  %v758_v16 = vmax.f32 %v726_v36, %v734_v51 }
  0xfb   : > { %v5101_v60 = vpop.f32.mrf.mxu0 }
  0xfc   : > { %v668_v37 = vadd.f32 %v5101_v60, %v5969_v0  ;;  %v735_v59 = vmax.f32 %v647_v2, 0.0 }
  0xfd   : > { %v659_v61 = vpop.f32.mrf.mxu0 }
  0xfe   : > { %v660_v38 = vadd.f32 %v5969_v0, %v659_v61  ;;  %v740_v54 = vmax.f32 %v668_v37, 0.0  ;;  %v757_v61 = vmax.f32 %v725_v22, %v733_v42 }
  0xff   : > { %v5102_v62 = vpop.f32.mrf.mxu0 }
 0x100   : > { %v671_v43 = vadd.f32 %v5102_v62, %v5969_v0  ;;  %v738_v55 = vmax.f32 %v660_v38, 0.0  ;;  %v655_v62 = vadd.f32 %v5960_v58, %v5969_v0 }
 0x101   : > { %v662_v1 = vpop.f32.mrf.mxu0 }
 0x102   : > { %v663_v52 = vadd.f32 %v5969_v0, %v662_v1  ;;  %v741_v5 = vmax.f32 %v671_v43, 0.0  ;;  %v737_v29 = vmax.f32 %v655_v62, 0.0 }
 0x103   : > { %v5971_v3 = vpop.f32.mrf.mxu0 }
 0x104   : > { %v739_v18 = vmax.f32 %v663_v52, 0.0  ;;  %v684_v32 = vadd.f32 %v5971_v3, %v5969_v0 }
 0x105   : > { %v5977_v8 = vpop.f32.mrf.mxu0 }
 0x106   : > { %v676_v33 = vadd.f32 %v5969_v0, %v5977_v8  ;;  %v744_v50 = vmax.f32 %v684_v32, 0.0 }
 0x107   : > { %v5987_v14 = vpop.f32.mrf.mxu0 }
 0x108   : > { %v742_v8 = vmax.f32 %v676_v33, 0.0 }
 0x109   : > { %v678_v26 = vpop.f32.mrf.mxu0 }
 0x10a   : > { %v679_v42 = vadd.f32 %v5969_v0, %v678_v26 }
 0x10b   : > { %v5109_v34 = vpop.f32.mrf.mxu0 }
 0x10c   : > { %v700_v39 = vadd.f32 %v5109_v34, %v5969_v0  ;;  %v743_v62 = vmax.f32 %v679_v42, 0.0  ;;  %v6065_v42 = vrot.slane %v1661_v21, 2 }
 0x10d   : > { %v691_v44 = vpop.f32.mrf.mxu0 }
 0x10e   : > { %v748_v47 = vmax.f32 %v700_v39, 0.0  ;;  %v692_v48 = vadd.f32 %v5969_v0, %v691_v44  ;;  %v687_v39 = vadd.f32 %v5987_v14, %v5969_v0 }
 0x10f   : > { %v5110_v53 = vpop.f32.mrf.mxu0 }
 0x110   : > { %v746_v57 = vmax.f32 %v692_v48, 0.0  ;;  %v703_v60 = vadd.f32 %v5110_v53, %v5969_v0  ;;  %v764_v56 = vmax.f32 %v740_v54, %v748_v47 }
 0x111   : > { %v694_v6 = vpop.f32.mrf.mxu0 }
 0x112   : > { %v762_v7 = vmax.f32 %v738_v55, %v746_v57  ;;  %v749_v9 = vmax.f32 %v703_v60, 0.0  ;;  %v695_v1 = vadd.f32 %v5969_v0, %v694_v6  ;;  %v772_v27 = vmax.f32 %v756_v45, %v764_v56 }
 0x113   : > { %v5113_v19 = vpop.f32.mrf.mxu0  ;;  %v745_v55 = vmax.f32 %v687_v39, 0.0  ;;  %v760_v56 = vmax.f32 %v728_v31, %v736_v11  ;;  %v1845_v31 = vshrl.u32 %v6009_v35, 16 }
 0x114   : > { %v770_v22 = vmax.f32 %v754_v46, %v762_v7  ;;  %v765_v25 = vmax.f32 %v741_v5, %v749_v9  ;;  %v747_v28 = vmax.f32 %v695_v1, 0.0  ;;  %v716_v58 = vadd.f32 %v5113_v19, %v5969_v0 }
 0x115   : > { %v707_v34 = vpop.f32.mrf.mxu0  ;;  %v761_v7 = vmax.f32 %v729_v40, %v737_v29  ;;  %v1857_v19 = vshll.u32 %v5982_v12, 16 }
 0x116   : > { %v4850_v37 = vpack.c.bf16 %v770_v22, %v770_v22  ;;  %v773_v38 = vmax.f32 %v757_v61, %v765_v25  ;;  %v763_v36 = vmax.f32 %v739_v18, %v747_v28  ;;  %v752_v43 = vmax.f32 %v716_v58, 0.0 }
 0x117   : > { %v708_v44 = vadd.f32 %v5969_v0, %v707_v34  ;;  %v5114_v46 = vpop.f32.mrf.mxu0  ;;  %v6051_v58 = vrot.slane %v1854_v30, 2  ;;  %v6053_v29 = vrot.slane %v1857_v19, 3 }
 0x118   : > { %v798_v47 = vrot.slane %v4850_v37, 6  ;;  %v779_v48 = vpack.c.bf16 %v773_v38, %v772_v27  ;;  %v4852_v3 = vpack.c.bf16 %v773_v38, %v773_v38  ;;  %v771_v49 = vmax.f32 %v755_v10, %v763_v36 }
 0x119   : > { %v750_v51 = vmax.f32 %v708_v44, 0.0  ;;  %v719_v45 = vadd.f32 %v5114_v46, %v5969_v0  ;;  %v710_v52 = vpop.f32.mrf.mxu0  ;;  %v768_v57 = vmax.f32 %v744_v50, %v752_v43  ;;  %v6055_v27 = vrot.slane %v1845_v31, 2 }
 0x11a   : > { %v799_v53 = vrot.slane %v798_v47, 4  ;;  %802 = vst [vmem:[#allocation2 + $0x4] sm:$0xc] %v798_v47  ;;  %812 = vst [vmem:[#allocation2 + $0x10] sm:$0xf] %v779_v48  ;;  %v816_v14 = vrot.slane %v4852_v3, 7  ;;  %v4851_v54 = vpack.c.bf16 %v771_v49, %v771_v49  ;;  %v711_v26 = vadd.f32 %v5969_v0, %v710_v52 }
 0x11b   : > { %v766_v60 = vmax.f32 %v742_v8, %v750_v51  ;;  %v753_v61 = vmax.f32 %v719_v45, 0.0  ;;  %v759_v0 = vmax.f32 %v727_v41, %v735_v59  ;;  %v776_v22 = vmax.f32 %v760_v56, %v768_v57  ;;  %v6077_v49 = vld [vmem:[#allocation2 + $0x28] ss:$0 sps:$4 sm:$0x11]  }
 0x11c   : > { %803 = vst [vmem:[#allocation2 + $0x8] sm:$0x3] %v799_v53  ;;  %v817_v2 = vrot.slane %v816_v14, 4  ;;  %820 = vst [vmem:[#allocation2 + $0x14] sm:$0xe] %v816_v14  ;;  %v806_v5 = vrot.slane %v4851_v54, 5  ;;  %v1860_v51 = vor.u32 %v6053_v29, %v6051_v58 }
 0x11d   : > { %v751_v6 = vmax.f32 %v711_v26, 0.0  ;;  %v774_v9 = vmax.f32 %v758_v16, %v766_v60  ;;  %v769_v1 = vmax.f32 %v745_v55, %v753_v61  ;;  %v6057_v37 = vrot.slane %v1848_v23, 3 }
 0x11e   : > { %821 = vst [vmem:[#allocation2 + $0x18] sm:$0x1] %v817_v2  ;;  %v807_v10 = vrot.slane %v806_v5, 4  ;;  %810 = vst [vmem:[#allocation2 + $0x8] sm:$0x8] %v806_v5  ;;  %v6071_v47 = vrot.slane %v1657_v4, 3 }
 0x11f   : > { %v767_v18 = vmax.f32 %v743_v62, %v751_v6  ;;  %v4853_v25 = vpack.c.bf16 %v774_v9, %v774_v9  ;;  %v777_v28 = vmax.f32 %v761_v7, %v769_v1  ;;  %v1851_v8 = vor.u32 %v6057_v37, %v6055_v27  ;;  %v5384_v27 = vld [vmem:[%s7353_s3] sm:$0xff]  }
 0x120   : > { %811 = vst [vmem:[#allocation2 + $0xc] sm:$0x7] %v807_v10  ;;  %v934_v62 = vshll.u32 %v6077_v49, 16  ;;  %v5358_v49 = vld [vmem:[%s7353_s3 + $0x30] sm:$0xff]  }
 0x121   : > { %v775_v13 = vmax.f32 %v759_v0, %v767_v18  ;;  %v825_v40 = vrot.slane %v4853_v25, 6  ;;  %v781_v11 = vpack.c.bf16 %v777_v28, %v776_v22  ;;  %v4855_v16 = vpack.c.bf16 %v777_v28, %v777_v28  ;;  %v853_v41 = vld [vmem:[#allocation2 + $0x10] sm:$0xf]  ;;  %v1006_v35 = vld [vmem:[#allocation2 + $0x4] sm:$0xc] }
 0x122   : > { %v1003_v39 = vld [vmem:[#allocation2 + $0x4] sm:$0xe] }
 0x123   : > { %v4854_v24 = vpack.c.bf16 %v775_v13, %v775_v13  ;;  %v826_v59 = vrot.slane %v825_v40, 4  ;;  %829 = vst [vmem:[#allocation2 + $0x18] sm:$0xc] %v825_v40  ;;  %839 = vst [vmem:[#allocation2 + $0x24] sm:$0xf] %v781_v11  ;;  %v843_v32 = vrot.slane %v4855_v16, 7 }
 0x124   : > { %v854_v33 = vld [vmem:[#allocation2 + $0x14] sm:$0xf] }
 0x125   : > { %v833_v34 = vrot.slane %v4854_v24, 5  ;;  %v6059_v38 = vcombine.low %v853_v41, %v854_v33  ;;  %830 = vst [vmem:[#allocation2 + $0x1c] sm:$0x3] %v826_v59  ;;  %v844_v36 = vrot.slane %v843_v32, 4  ;;  %847 = vst [vmem:[#allocation2 + $0x28] sm:$0xe] %v843_v32 }
 0x126   : > { %v6061_v30 = vld [vmem:[#allocation2 + $0x8] sm:$0xf]  ;;  %v6075_v3 = vld [vmem:[#allocation2 + $0x10] sm:$0xff]  }
 0x127   : > { %v834_v43 = vrot.slane %v833_v34, 4  ;;  %837 = vst [vmem:[#allocation2 + $0x1c] sm:$0x8] %v833_v34  ;;  %v4486_v44 = vcombine.low %v1006_v35, %v6061_v30  ;;  %v4480_v46 = vcombine.low %v1003_v39, %v6061_v30  ;;  %848 = vst [vmem:[#allocation2 + $0x2c] sm:$0x1] %v844_v36  ;;  %v1625_v61 = vshll.u32 %v6075_v3, 16 }
 0x128   : > { %v6073_v48 = vld [vmem:[#allocation2 + $0xc] sm:$0xf] }
 0x129   : > { %838 = vst [vmem:[#allocation2 + $0x20] sm:$0x7] %v834_v43  ;;  %v4481_v21 = vcombine.low %v6073_v48, %v853_v41  ;;  %v1026_v50 = vshll.u32 %v4486_v44, 16  ;;  %v1073_v63 = vrot.slane %v4486_v44, 1  ;;  %v1024_v4 = vshrl.u32 %v4486_v44, 16 }
 0x12a   : > { %v1135_v45 = vshrl.u32 %v4480_v46, 16  ;;  %v1138_v52 = vshll.u32 %v4480_v46, 16  ;;  %v6084_v53 = vld [vmem:[#allocation2 + $0x18] sm:$0xf] }
 0x12b   : > { %v1074_v14 = vrot.slane %v4481_v21, 1  ;;  %v1028_v54 = vrot.slane %v1026_v50, 1  ;;  %v1031_v26 = vshll.u32 %v4481_v21, 16  ;;  %v1035_v55 = vshrl.u32 %v4481_v21, 16 }
 0x12c   : > { %v4482_v57 = vcombine.low %v854_v33, %v6084_v53  ;;  %v1137_v60 = vrot.slane %v1135_v45, 1  ;;  %v1140_v56 = vrot.slane %v1138_v52, 2  ;;  %v1004_v44 = vld [vmem:[#allocation2 + $0x28] sm:$0xf] }
 0x12d   : > { %v1075_v2 = vsel %vm943_vm2, %v1073_v63, %v1074_v14  ;;  %v1029_v5 = vor.u32 %v1028_v54, %v1024_v4  ;;  %v1033_v6 = vrot.slane %v1031_v26, 1  ;;  %v1142_v19 = vrot.slane %v1035_v55, 1  ;;  %v5327_v4 = vld [vmem:[%s7353_s3 + $0x238] sm:$0xff]  }
 0x12e   : > { %v1076_v7 = vrot.slane %v4482_v57, 1  ;;  %v1164_v9 = vshrl.u32 %v1075_v2, 16  ;;  %v1167_v1 = vshll.u32 %v1075_v2, 16  ;;  %v1039_v0 = vshll.u32 %v4482_v57, 16  ;;  %v6091_v25 = vld [vmem:[#allocation2 + $0x1c] sm:$0xf] }
 0x12f   : > { %v1034_v10 = vsel %vm893_vm3, %v1029_v5, %v1033_v6  ;;  %v1037_v18 = vor.u32 %v1035_v55, %v1033_v6  ;;  %v1143_v22 = vrot.slane %v1031_v26, 2  ;;  %v1141_v33 = vor.u32 %v1140_v56, %v1137_v60 }
 0x130   : > { %v1077_v28 = vsel %vm943_vm2, %v1074_v14, %v1076_v7  ;;  %v1166_v13 = vrot.slane %v1164_v9, 1  ;;  %v1169_v31 = vrot.slane %v1167_v1, 2  ;;  %v1041_v23 = vrot.slane %v1039_v0, 1  ;;  %v6094_v40 = vld [vmem:[#allocation2 + $0x20] sm:$0xf] }
 0x131   : > { %v1172_v11 = vshrl.u32 %v1077_v28, 16  ;;  %v1175_v16 = vshll.u32 %v1077_v28, 16  ;;  %v1147_v24 = vshrl.u32 %v1034_v10, 16  ;;  %v1150_v41 = vshll.u32 %v1034_v10, 16  ;;  %v6110_v9 = vld [vmem:[#allocation2 + $0x24] sm:$0xf] }
 0x132   : > { %v1170_v59 = vor.u32 %v1169_v31, %v1166_v13  ;;  %v1042_v32 = vsel %vm893_vm3, %v1037_v18, %v1041_v23  ;;  %v6099_v34 = vcombine.low %v6091_v25, %v6094_v40  ;;  %v6101_v50 = vor.u32 %v1143_v22, %v1142_v19  ;;  %v5323_v10 = vld [vmem:[%s7353_s3 + $0x1b8] sm:$0xff]   ;;  %v5324_v18 = vld [vmem:[%s7353_s3 + $0x1f0] sm:$0xff]  }
 0x133   : > { %v1174_v35 = vrot.slane %v1172_v11, 1  ;;  %v1177_v36 = vrot.slane %v1175_v16, 2  ;;  %v1149_v39 = vrot.slane %v1147_v24, 1  ;;  %v1152_v43 = vrot.slane %v1150_v41, 2  ;;  %v5331_v31 = vld [vmem:[%s7353_s3 + $0x230] sm:$0xff]  }
 0x134   : > { %v1155_v46 = vshrl.u32 %v1042_v32, 16  ;;  %v1158_v21 = vshll.u32 %v1042_v32, 16  ;;  %v1043_v63 = vshrl.u32 %v4482_v57, 16  ;;  %v1047_v14 = vshll.u32 %v6099_v34, 16 }
 0x135   : > { %v1178_v45 = vor.u32 %v1177_v36, %v1174_v35  ;;  %v1153_v52 = vor.u32 %v1152_v43, %v1149_v39  ;;  %v1078_v54 = vrot.slane %v6099_v34, 1  ;;  %v1181_v57 = vrot.slane %v1039_v0, 2  ;;  %v5339_v32 = vld [vmem:[#allocation2 + $0x2c] ss:$0 sps:$4 sm:$0x77]  }
 0x136   : > { %v1157_v26 = vrot.slane %v1155_v46, 1  ;;  %v1160_v55 = vrot.slane %v1158_v21, 2  ;;  %v1045_v60 = vor.u32 %v1043_v63, %v1041_v23  ;;  %v1180_v2 = vrot.slane %v1043_v63, 1  ;;  %v6130_v23 = vld [vmem:[#allocation2 + $0x2c] ss:$0 sps:$4 sm:$0x33]  }
 0x137   : > { %v1179_v5 = vsel %vm1133_vm4, %v1170_v59, %v1178_v45  ;;  %v1049_v6 = vrot.slane %v1047_v14, 1  ;;  %v1079_v56 = vsel %vm943_vm2, %v1076_v7, %v1078_v54  ;;  %v6119_v28 = vcombine.low %v6110_v9, %v1004_v44  ;;  %v5326_v63 = vld [vmem:[%s7353_s3 + $0x1b0] sm:$0xff]  }
 0x138   : > { %5132 = vmatmul.mubr.bf16.vlgmr.msra.gmra.mxu0 %v1179_v5  ;;  %v1161_v1 = vor.u32 %v1160_v55, %v1157_v26  ;;  %v1194_v19 = vshrl.u32 %v1079_v56, 16  ;;  %v1197_v22 = vshll.u32 %v1079_v56, 16  ;;  %v1145_v7 = vsel %vm1133_vm4, %v1141_v33, %v6101_v50 }
 0x139   : > { %5135 = vmatprep.mubr.msk.bf16.mxu0 %vm5703_vm1, %v5701_v17  ;;  %v1050_v0 = vsel %vm893_vm3, %v1045_v60, %v1049_v6  ;;  %5152 = vmatpush3.bf16.msra.mxu0 %v5327_v4  ;;  %v1051_v13 = vshrl.u32 %v6099_v34, 16  ;;  %v6134_v11 = vrot.slane %v1625_v61, 1  ;;  %v6138_v34 = vor.u32 %v1181_v57, %v1180_v2  ;;  %v5329_v60 = vld [vmem:[%s7353_s3 + $0x1e8] sm:$0xff]  }
 0x13a   : > { %v1162_v16 = vsel %vm1133_vm4, %v1153_v52, %v1161_v1  ;;  %v1185_v24 = vshrl.u32 %v1050_v0, 16  ;;  %v1188_v41 = vshll.u32 %v1050_v0, 16  ;;  %v1196_v59 = vrot.slane %v1194_v19, 1  ;;  %5153 = vmatprep.subr.bf16.mxu0 %v5701_v17 }
 0x13b   : > { %1459 = vmatprep.mubr.bf16.mxu1 %v1162_v16  ;;  %v1199_v33 = vrot.slane %v1197_v22, 2  ;;  %v1053_v35 = vor.u32 %v1051_v13, %v1049_v6  ;;  %v1055_v36 = vshll.u32 %v6119_v28, 16  ;;  %v1080_v44 = vrot.slane %v6119_v28, 1 }
 0x13c   : > { %1460 = vmatmul.mubr.bf16.vlgmr.msra.gmra.mxu1 %v1145_v7  ;;  %v1187_v39 = vrot.slane %v1185_v24, 1  ;;  %v1190_v43 = vrot.slane %v1188_v41, 2  ;;  %v1203_v46 = vrot.slane %v1047_v14, 2  ;;  %v1202_v52 = vrot.slane %v1051_v13, 1 }
 0x13d   : > { %4937 = vmatpush3.bf16.msra.mxu1 %v5323_v10  ;;  %v6142_v21 = vor.u32 %v1199_v33, %v1196_v59  ;;  %v1057_v4 = vrot.slane %v1055_v36, 1  ;;  %5154 = vmatpush3.bf16.msra.mxu0 %v5331_v31  ;;  %v1063_v26 = vshll.u32 %v6130_v23, 16  ;;  %v1081_v14 = vsel %vm943_vm2, %v1078_v54, %v1080_v44  ;;  %v5336_v33 = vld [vmem:[%s7353_s3 + $0x220] sm:$0xff]  }
 0x13e   : > { %4938 = vmatprep.subr.bf16.mxu1 %v5324_v18  ;;  %v1191_v55 = vor.u32 %v1190_v43, %v1187_v39  ;;  %5155 = vmatprep.subr.bf16.mxu0 %v5701_v17  ;;  %v1059_v2 = vshrl.u32 %v6119_v28, 16  ;;  %v6154_v5 = vrot.slane %v5339_v32, 1  ;;  %v1216_v57 = vshrl.u32 %v1081_v14, 16  ;;  %v5333_v18 = vld [vmem:[%s7353_s3 + $0x228] sm:$0xff]  }
 0x13f   : > { %v1201_v6 = vsel %vm1133_vm4, %v1178_v45, %v6142_v21  ;;  %v1058_v56 = vsel %vm893_vm3, %v1053_v35, %v1057_v4  ;;  %v1219_v10 = vshll.u32 %v1081_v14, 16  ;;  %v1183_v54 = vsel %vm1133_vm4, %v6101_v50, %v6138_v34  ;;  %v5330_v45 = vld [vmem:[%s7353_s3 + $0x1a8] sm:$0xff]   ;;  %v5332_v50 = vld [vmem:[%s7353_s3 + $0x1e0] sm:$0xff]  }
 0x140   : > { %v1192_v19 = vsel %vm1133_vm4, %v1161_v1, %v1191_v55  ;;  %5136 = vmatmul.mubr.bf16.gmra.mxu0 %v1201_v6  ;;  %v1207_v22 = vshrl.u32 %v1058_v56, 16  ;;  %v1210_v28 = vshll.u32 %v1058_v56, 16  ;;  %v1218_v7 = vrot.slane %v1216_v57, 1 }
 0x141   : > { %1467 = vmatprep.mubr.bf16.mxu1 %v1192_v19  ;;  %4939 = vmatpush3.bf16.msra.mxu1 %v5326_v63  ;;  %v1221_v0 = vrot.slane %v1219_v10, 2  ;;  %v1061_v13 = vor.u32 %v1059_v2, %v1057_v4  ;;  %v1065_v31 = vrot.slane %v1063_v26, 1  ;;  %v6176_v24 = vor.u32 %v1203_v46, %v1202_v52  ;;  %v6185_v52 = vld [vmem:[#allocation2 + $0xc] sm:$0xf]  ;;  %v1584_v19 = vld [vmem:[#allocation2 + $0x8] sm:$0x8] }
 0x142   : > { %v1209_v1 = vrot.slane %v1207_v22, 1  ;;  %v1212_v16 = vrot.slane %v1210_v28, 2  ;;  %4940 = vmatprep.subr.bf16.mxu1 %v5329_v60  ;;  %5139 = vmatprep.mubr.msk.bf16.mxu0 %vm5703_vm1, %v5701_v17  ;;  %v1083_v41 = vsel %vm943_vm2, %v1080_v44, %v6154_v5  ;;  %v1224_v46 = vrot.slane %v1059_v2, 1  ;;  %v5334_v44 = vld [vmem:[%s7353_s3 + $0x1a0] sm:$0xff]   ;;  %v5337_v2 = vld [vmem:[%s7353_s3 + $0x1d8] sm:$0xff]  }
 0x143   : > { %v1222_v59 = vor.u32 %v1221_v0, %v1218_v7  ;;  %5156 = vmatpush3.bf16.msra.mxu0 %v5333_v18  ;;  %v1066_v32 = vsel %vm893_vm3, %v1061_v13, %v1065_v31  ;;  %v1238_v35 = vshrl.u32 %v1083_v41, 16  ;;  %v1241_v39 = vshll.u32 %v1083_v41, 16  ;;  %v6201_v28 = vld [vmem:[#allocation2 + $0x18] sm:$0xff]  }
 0x144   : > { %1468 = vmatmul.mubr.bf16.gmra.mxu1 %v1183_v54  ;;  %v1213_v43 = vor.u32 %v1212_v16, %v1209_v1  ;;  %v1229_v63 = vshrl.u32 %v1066_v32, 16  ;;  %v1232_v4 = vshll.u32 %v1066_v32, 16  ;;  %5157 = vmatprep.subr.bf16.mxu0 %v5701_v17  ;;  %v1225_v6 = vrot.slane %v1055_v36, 2  ;;  %v5340_v36 = vld [vmem:[%s7353_s3 + $0x218] sm:$0xff]  }
 0x145   : > { %4941 = vmatpush3.bf16.msra.mxu1 %v5330_v45  ;;  %v1240_v60 = vrot.slane %v1238_v35, 1  ;;  %v1243_v14 = vrot.slane %v1241_v39, 2  ;;  %v1067_v56 = vshrl.u32 %v6130_v23, 16  ;;  %v1629_v54 = vshrl.u32 %v6075_v3, 16  ;;  %v5338_v1 = vld [vmem:[%s7353_s3 + $0x198] sm:$0xff]   ;;  %v5341_v35 = vld [vmem:[%s7353_s3 + $0x1d0] sm:$0xff]  }
 0x146   : > { %v1214_v57 = vsel %vm1133_vm4, %v1191_v55, %v1213_v43  ;;  %4942 = vmatprep.subr.bf16.mxu1 %v5332_v50  ;;  %v1231_v10 = vrot.slane %v1229_v63, 1  ;;  %v1234_v18 = vrot.slane %v1232_v4, 2  ;;  %v1223_v22 = vsel %vm1133_vm4, %v6142_v21, %v1222_v59  ;;  %v5342_v23 = vld [vmem:[%s7353_s3 + $0x190] sm:$0xff]  }
 0x147   : > { %1475 = vmatprep.mubr.bf16.mxu1 %v1214_v57  ;;  %5158 = vmatpush3.bf16.msra.mxu0 %v5336_v33  ;;  %v1069_v55 = vor.u32 %v1067_v56, %v1065_v31  ;;  %v4566_v45 = vcombine.low %v1584_v19, %v6185_v52  ;;  %v1668_v7 = vrot.slane %v6075_v3, 1  ;;  %v1205_v0 = vsel %vm1133_vm4, %v6138_v34, %v6176_v24 }
 0x148   : > { %5140 = vmatmul.mubr.bf16.gmra.mxu0 %v1223_v22  ;;  %v6208_v13 = vor.u32 %v1243_v14, %v1240_v60  ;;  %5159 = vmatprep.subr.bf16.mxu0 %v5701_v17  ;;  %v1260_v21 = vshrl.u32 %v6154_v5, 16  ;;  %v1631_v31 = vor.u32 %v1629_v54, %v6134_v11  ;;  %v6220_v16 = vor.u32 %v1225_v6, %v1224_v46  ;;  %v5343_v46 = vld [vmem:[%s7353_s3 + $0x210] sm:$0xff]  }
 0x149   : > { %4943 = vmatpush3.bf16.msra.mxu1 %v5334_v44  ;;  %5143 = vmatprep.mubr.msk.bf16.mxu0 %vm5703_vm1, %v5701_v17  ;;  %v1251_v34 = vshrl.u32 %v1069_v55, 16  ;;  %v1254_v50 = vshll.u32 %v1069_v55, 16  ;;  %v1263_v41 = vshll.u32 %v6154_v5, 16  ;;  %v6223_v32 = vor.u32 %v1234_v18, %v1231_v10 }
 0x14a   : > { %4944 = vmatprep.subr.bf16.mxu1 %v5337_v2  ;;  %v1245_v33 = vsel %vm1133_vm4, %v1222_v59, %v6208_v13  ;;  %v6230_v39 = vrot.slane %v1067_v56, 1  ;;  %v6234_v63 = vrot.slane %v1063_v26, 2  ;;  %v1620_v44 = vshll.u32 %v4566_v45, 16  ;;  %v5344_v2 = vld [vmem:[%s7353_s3 + $0x1c8] sm:$0xff]  }
 0x14b   : > { %5160 = vmatpush3.bf16.msra.mxu0 %v5340_v36  ;;  %v6236_v4 = vrot.slane %v1251_v34, 1  ;;  %v1256_v5 = vrot.slane %v1254_v50, 2  ;;  %v1633_v59 = vshll.u32 %v6201_v28, 16  ;;  %v1236_v60 = vsel %vm1133_vm4, %v1213_v43, %v6223_v32  ;;  %v1573_v43 = vld [vmem:[#allocation2 + $0x8] sm:$0xc] }
 0x14c   : > { %1476 = vmatmul.mubr.bf16.gmra.mxu1 %v1205_v0  ;;  %5161 = vmatprep.subr.bf16.mxu0 %v5701_v17  ;;  %v6248_v26 = vrot.slane %v1260_v21, 1  ;;  %v1667_v14 = vrot.slane %v4566_v45, 1  ;;  %v1670_v6 = vrot.slane %v6201_v28, 1  ;;  %v1265_v56 = vrot.slane %v1263_v41, 2  ;;  %v860_v0 = vld [vmem:[#allocation2] sm:$0xe] }
 0x14d   : > { %1483 = vmatprep.mubr.bf16.mxu1 %v1236_v60  ;;  %4945 = vmatpush3.bf16.msra.mxu1 %v5338_v1  ;;  %v1618_v57 = vshrl.u32 %v4566_v45, 16  ;;  %v1622_v10 = vrot.slane %v1620_v44, 1  ;;  %v6253_v18 = vrot.slane %v1633_v59, 1  ;;  %v1248_v19 = vor.u32 %v6234_v63, %v6230_v39  ;;  %v6267_v45 = vld [vmem:[#allocation2 + $0x4] sm:$0xf]  ;;  %v5346_v1 = vld [vmem:[%s7353_s3 + $0x208] sm:$0xff]  }
 0x14e   : > { %4946 = vmatprep.subr.bf16.mxu1 %v5341_v35  ;;  %v1669_v22 = vsel %vm943_vm2, %v1667_v14, %v1668_v7  ;;  %v1671_v36 = vsel %vm943_vm2, %v1668_v7, %v1670_v6  ;;  %v6265_v55 = vcombine.low %v1573_v43, %v6185_v52  ;;  %v1257_v21 = vor.u32 %v1256_v5, %v6236_v4  ;;  %v5350_v60 = vld [vmem:[%s7353_s3 + $0x1c0] sm:$0xff]  }
 0x14f   : > { %5162 = vmatpush3.bf16.msra.mxu0 %v5343_v46  ;;  %v1623_v34 = vor.u32 %v1622_v10, %v1618_v57  ;;  %v1636_v50 = vsel %vm893_vm3, %v1631_v31, %v6253_v18  ;;  %v1758_v41 = vshrl.u32 %v1669_v22, 16  ;;  %v1761_v35 = vshll.u32 %v1669_v22, 16  ;;  %v5345_v31 = vld [vmem:[%s7353_s3 + $0x188] sm:$0xff]   ;;  %v6294_v14 = vld [vmem:[#allocation2 + $0x20] sm:$0xff]  }
 0x150   : > { %5144 = vmatmul.mubr.bf16.gmra.mxu0 %v1245_v33  ;;  %5163 = vmatprep.subr.bf16.mxu0 %v5701_v17  ;;  %v1749_v52 = vshrl.u32 %v1636_v50, 16  ;;  %v1752_v7 = vshll.u32 %v1636_v50, 16  ;;  %v1766_v39 = vshrl.u32 %v1671_v36, 16  ;;  %v1227_v63 = vsel %vm1133_vm4, %v6176_v24, %v6220_v16  ;;  %v5351_v10 = vld [vmem:[%s7353_s3 + $0x200] sm:$0xff]  }
 0x151   : > { %4947 = vmatpush3.bf16.msra.mxu1 %v5342_v23  ;;  %5147 = vmatprep.mubr.msk.bf16.mxu0 %vm5703_vm1, %v5701_v17  ;;  %v1628_v33 = vsel %vm893_vm3, %v1623_v34, %v6134_v11  ;;  %v1769_v4 = vshll.u32 %v1671_v36, 16  ;;  %v6287_v5 = vcombine.low %v860_v0, %v6267_v45  ;;  %v1266_v46 = vor.u32 %v1265_v56, %v6248_v26  ;;  %v5352_v34 = vld [vmem:[%s7353_s3 + $0x180] sm:$0xff]  }
 0x152   : > { %4948 = vmatprep.subr.bf16.mxu1 %v5344_v2  ;;  %v1741_v24 = vshrl.u32 %v1628_v33, 16  ;;  %v1744_v44 = vshll.u32 %v1628_v33, 16  ;;  %v1729_v23 = vshrl.u32 %v6265_v55, 16  ;;  %v1751_v11 = vrot.slane %v1749_v52, 2 }
 0x153   : > { %5164 = vmatpush3.bf16.msra.mxu0 %v5346_v1  ;;  %v1754_v57 = vrot.slane %v1752_v7, 3  ;;  %v1768_v26 = vrot.slane %v1766_v39, 2  ;;  %v1771_v56 = vrot.slane %v1769_v4, 3  ;;  %v1258_v43 = vsel %vm1133_vm4, %v6223_v32, %v1257_v21  ;;  %v6318_v7 = vld [vmem:[#allocation2 + $0x28] sm:$0xff]  }
 0x154   : > { %1484 = vmatmul.mubr.bf16.gmra.mxu1 %v1227_v63  ;;  %v1249_v2 = vsel %vm1133_vm4, %v6220_v16, %v1248_v19  ;;  %5165 = vmatprep.subr.bf16.mxu0 %v5701_v17  ;;  %v1760_v22 = vrot.slane %v1758_v41, 2  ;;  %v1763_v36 = vrot.slane %v1761_v35, 3  ;;  %v1743_v0 = vrot.slane %v1741_v24, 2  ;;  %v5353_v16 = vld [vmem:[%s7353_s3 + $0x78] sm:$0xff]  }
 0x155   : > { %1491 = vmatprep.mubr.bf16.mxu1 %v1258_v43  ;;  %4949 = vmatpush3.bf16.msra.mxu1 %v5345_v31  ;;  %v1746_v1 = vrot.slane %v1744_v44, 3  ;;  %v1732_v50 = vshll.u32 %v6265_v55, 16  ;;  %v1637_v52 = vshrl.u32 %v6201_v28, 16  ;;  %v1267_v32 = vsel %vm1133_vm4, %v6208_v13, %v1266_v46  ;;  %v5355_v28 = vld [vmem:[%s7353_s3 + $0x38] sm:$0xff]  }
 0x156   : > { %4950 = vmatprep.subr.bf16.mxu1 %v5350_v60  ;;  %v1736_v19 = vrot.slane %v1629_v54, 2  ;;  %v1641_v21 = vshll.u32 %v6294_v14, 16  ;;  %v1672_v41 = vrot.slane %v6294_v14, 1  ;;  %v6320_v55 = vor.u32 %v1754_v57, %v1751_v11 }
 0x157   : > { %5166 = vmatpush3.bf16.msra.mxu0 %v5351_v10  ;;  %v6322_v35 = vor.u32 %v1771_v56, %v1768_v26  ;;  %v6324_v13 = vrot.slane %v1729_v23, 2  ;;  %v1639_v39 = vor.u32 %v1637_v52, %v6253_v18  ;;  %v1764_v63 = vor.u32 %v1763_v36, %v1760_v22  ;;  %v5359_v36 = vld [vmem:[%s7353_s3 + $0xb8] sm:$0xff]  }
 0x158   : > { %5148 = vmatmul.mubr.bf16.gmra.mxu0 %v1267_v32  ;;  %v1737_v54 = vrot.slane %v1625_v61, 3  ;;  %v1643_v31 = vrot.slane %v1641_v21, 1  ;;  %v1673_v33 = vsel %vm943_vm2, %v1670_v6, %v1672_v41  ;;  %5187 = vmatprep.subr.bf16.mxu0 %v5701_v17  ;;  %v1747_v4 = vor.u32 %v1746_v1, %v1743_v0 }
 0x159   : > { %4951 = vmatpush3.bf16.msra.mxu1 %v5352_v34  ;;  %5167 = vmatprep.mubr.msk.bf16.mxu0 %vm5703_vm1, %v5701_v17  ;;  %v1734_v46 = vrot.slane %v1732_v50, 3  ;;  %v1788_v24 = vshrl.u32 %v1673_v33, 16  ;;  %v1791_v18 = vshll.u32 %v1673_v33, 16  ;;  %v1645_v3 = vshrl.u32 %v6294_v14, 16 }
 0x15a   : > { %4995 = vmatprep.subr.bf16.mxu1 %v5353_v16  ;;  %v1644_v44 = vsel %vm893_vm3, %v1639_v39, %v1643_v31  ;;  %v1649_v61 = vshll.u32 %v6318_v7, 16  ;;  %v1674_v60 = vrot.slane %v6318_v7, 1  ;;  %v1773_v6 = vsel %vm1727_vm5, %v1764_v63, %v6322_v35 }
 0x15b   : > { %v1779_v23 = vshrl.u32 %v1644_v44, 16  ;;  %v1782_v11 = vshll.u32 %v1644_v44, 16  ;;  %v1774_v57 = vrot.slane %v1637_v52, 2  ;;  %v1756_v10 = vsel %vm1727_vm5, %v1747_v4, %v6320_v55 }
 0x15c   : > { %1492 = vmatmul.mubr.bf16.gmra.mxu1 %v1249_v2  ;;  %v1647_v26 = vor.u32 %v1645_v3, %v1643_v31  ;;  %v1651_v56 = vrot.slane %v1649_v61, 1  ;;  %v1675_v14 = vsel %vm943_vm2, %v1672_v41, %v1674_v60  ;;  %v1775_v0 = vrot.slane %v1633_v59, 3 }
 0x15d   : > { %2053 = vmatprep.mubr.bf16.mxu1 %v1756_v10  ;;  %v1781_v43 = vrot.slane %v1779_v23, 2  ;;  %v1784_v22 = vrot.slane %v1782_v11, 3  ;;  %v1810_v2 = vshrl.u32 %v1675_v14, 16  ;;  %v1790_v1 = vrot.slane %v1788_v24, 2 }
 0x15e   : > { %v1793_v34 = vrot.slane %v1791_v18, 3  ;;  %v1652_v50 = vsel %vm893_vm3, %v1647_v26, %v1651_v56  ;;  %v1813_v52 = vshll.u32 %v1675_v14, 16  ;;  %v1735_v32 = vor.u32 %v1734_v46, %v6324_v13  ;;  %v5357_v46 = vld [vmem:[%s7353_s3 + $0x70] sm:$0xff]  }
 0x15f   : > { %v1738_v16 = vor.u32 %v1737_v54, %v1736_v19  ;;  %v1801_v41 = vshrl.u32 %v1652_v50, 16  ;;  %v1804_v39 = vshll.u32 %v1652_v50, 16  ;;  %v6353_v63 = vor.u32 %v1784_v22, %v1781_v43 }
 0x160   : > { %5168 = vmatmul.mubr.bf16.vlgmr.msra.gmra.mxu0 %v1773_v6  ;;  %v1812_v31 = vrot.slane %v1810_v2, 2  ;;  %v1815_v33 = vrot.slane %v1813_v52, 3  ;;  %v1653_v4 = vshrl.u32 %v6318_v7, 16  ;;  %v1776_v59 = vor.u32 %v1775_v0, %v1774_v57  ;;  %v5363_v6 = vld [vmem:[%s7353_s3 + $0xb0] sm:$0xff]  }
 0x161   : > { %5171 = vmatprep.mubr.msk.bf16.mxu0 %vm5703_vm1, %v5701_v17  ;;  %5188 = vmatpush3.bf16.msra.mxu0 %v5359_v36  ;;  %v1796_v13 = vrot.slane %v1645_v3, 2  ;;  %v1797_v19 = vrot.slane %v1641_v21, 3  ;;  %v1677_v54 = vsel %vm943_vm2, %v1674_v60, %v5982_v12  ;;  %v1794_v24 = vor.u32 %v1793_v34, %v1790_v1  ;;  %v5365_v36 = vld [vmem:[%s7353_s3 + $0xa8] sm:$0xff]  }
 0x162   : > { %v1803_v18 = vrot.slane %v1801_v41, 2  ;;  %v1806_v44 = vrot.slane %v1804_v39, 3  ;;  %5189 = vmatprep.subr.bf16.mxu0 %v5701_v17  ;;  %v1655_v23 = vor.u32 %v1653_v4, %v1651_v56  ;;  %v1739_v3 = vsel %vm1727_vm5, %v1735_v32, %v1738_v16 }
 0x163   : > { %v1832_v21 = vshrl.u32 %v1677_v54, 16  ;;  %v1835_v11 = vshll.u32 %v1677_v54, 16  ;;  %v6373_v12 = vrot.slane %v934_v62, 1  ;;  %v1786_v60 = vsel %vm1727_vm5, %v6320_v55, %v6353_v63 }
 0x164   : > { %2054 = vmatmul.mubr.bf16.vlgmr.msra.gmra.mxu1 %v1739_v3  ;;  %v6378_v57 = vor.u32 %v1815_v33, %v1812_v31  ;;  %v1660_v10 = vsel %vm893_vm3, %v1655_v23, %v5991_v15  ;;  %v895_v26 = vshrl.u32 %v6287_v5, 16  ;;  %v1777_v62 = vsel %vm1727_vm5, %v1738_v16, %v1776_v59  ;;  %v5361_v15 = vld [vmem:[%s7353_s3 + $0x68] sm:$0xff]   ;;  %v5364_v31 = vld [vmem:[%s7353_s3 + $0x60] sm:$0xff]  }
 0x165   : > { %4996 = vmatpush3.bf16.msra.mxu1 %v5355_v28  ;;  %2061 = vmatprep.mubr.bf16.mxu1 %v1786_v60  ;;  %v1798_v56 = vor.u32 %v1797_v19, %v1796_v13  ;;  %v1823_v14 = vshrl.u32 %v1660_v10, 16  ;;  %v1826_v43 = vshll.u32 %v1660_v10, 16  ;;  %v1795_v55 = vsel %vm1727_vm5, %v6322_v35, %v1794_v24  ;;  %v5368_v33 = vld [vmem:[%s7353_s3 + $0xa0] sm:$0xff]   ;;  %v5369_v60 = vld [vmem:[%s7353_s3 + $0x58] sm:$0xff]  }
 0x166   : > { %4997 = vmatprep.subr.bf16.mxu1 %v5357_v46  ;;  %v6389_v22 = vor.u32 %v1806_v44, %v1803_v18  ;;  %5190 = vmatpush3.bf16.msra.mxu0 %v5363_v6  ;;  %v4473_v0 = vcombine.low %v6061_v30, %v6073_v48  ;;  %v897_v2 = vshll.u32 %v6287_v5, 16  ;;  %v1834_v1 = vrot.slane %v1832_v21, 2  ;;  %v5362_v30 = vld [vmem:[%s7353_s3 + $0x28] sm:$0xff]  }
 0x167   : > { %5191 = vmatprep.subr.bf16.mxu0 %v5701_v17  ;;  %v1837_v35 = vrot.slane %v1835_v11, 3  ;;  %v1818_v34 = vrot.slane %v1653_v4, 2  ;;  %v1819_v50 = vrot.slane %v1649_v61, 3  ;;  %v1817_v52 = vsel %vm1727_vm5, %v1794_v24, %v6378_v57 }
 0x168   : > { %5172 = vmatmul.mubr.bf16.gmra.mxu0 %v1795_v55  ;;  %v899_v32 = vrot.slane %v897_v2, 1  ;;  %v902_v16 = vshll.u32 %v4473_v0, 16  ;;  %v910_v41 = vshll.u32 %v6059_v38, 16  ;;  %v6412_v48 = vsel %vm1727_vm5, %v1776_v59, %v1798_v56 }
 0x169   : > { %4998 = vmatpush3.bf16.msra.mxu1 %v5358_v49  ;;  %5175 = vmatprep.mubr.msk.bf16.mxu0 %vm5703_vm1, %v5701_v17  ;;  %v1825_v7 = vrot.slane %v1823_v14, 2  ;;  %v1828_v61 = vrot.slane %v1826_v43, 3  ;;  %v944_v39 = vrot.slane %v6287_v5, 1  ;;  %v906_v13 = vshrl.u32 %v4473_v0, 16 }
 0x16a   : > { %4999 = vmatprep.subr.bf16.mxu1 %v5361_v15  ;;  %5192 = vmatpush3.bf16.msra.mxu0 %v5365_v36  ;;  %v900_v4 = vor.u32 %v899_v32, %v895_v26  ;;  %v6421_v28 = vrot.slane %v902_v16, 1  ;;  %v945_v59 = vrot.slane %v4473_v0, 1  ;;  %v1808_v19 = vsel %vm1727_vm5, %v6353_v63, %v6389_v22  ;;  %v5366_v63 = vld [vmem:[%s7353_s3 + $0x20] sm:$0xff]   ;;  %v5372_v26 = vld [vmem:[%s7353_s3 + $0x98] sm:$0xff]  }
 0x16b   : > { %5193 = vmatprep.subr.bf16.mxu0 %v5701_v17  ;;  %v6427_v5 = vor.u32 %v1837_v35, %v1834_v1  ;;  %v6429_v54 = vor.u32 %v1819_v50, %v1818_v34  ;;  %v947_v46 = vrot.slane %v6059_v38, 1  ;;  %v912_v44 = vrot.slane %v910_v41, 1  ;;  %v5370_v1 = vld [vmem:[%s7353_s3 + $0x18] sm:$0xff]  }
 0x16c   : > { %2062 = vmatmul.mubr.bf16.gmra.mxu1 %v1777_v62  ;;  %v905_v24 = vsel %vm893_vm3, %v900_v4, %v6421_v28  ;;  %v908_v18 = vor.u32 %v906_v13, %v6421_v28  ;;  %v946_v6 = vsel %vm943_vm2, %v944_v39, %v945_v59  ;;  %v6439_v23 = vor.u32 %v1828_v61, %v1825_v7  ;;  %v6489_v13 = vld [vmem:[#allocation2 + $0x28] ss:$0 sps:$4 sm:$0x33]  }
 0x16d   : > { %2069 = vmatprep.mubr.bf16.mxu1 %v1808_v19  ;;  %5000 = vmatpush3.bf16.msra.mxu1 %v5362_v30  ;;  %v6443_v3 = vsel %vm1727_vm5, %v1798_v56, %v6429_v54  ;;  %v2178_v21 = vshll.u32 %v905_v24, 16  ;;  %v948_v11 = vsel %vm943_vm2, %v945_v59, %v947_v46  ;;  %v1839_v10 = vsel %vm1727_vm5, %v6378_v57, %v6427_v5  ;;  %v5374_v59 = vld [vmem:[%s7353_s3 + $0x10] sm:$0xff]  }
 0x16e   : > { %5001 = vmatprep.subr.bf16.mxu1 %v5364_v31  ;;  %5194 = vmatpush3.bf16.msra.mxu0 %v5368_v33  ;;  %v6456_v49 = vsel %vm893_vm3, %v908_v18, %v912_v44  ;;  %v2190_v62 = vshll.u32 %v946_v6, 16  ;;  %v2195_v56 = vshll.u32 %v948_v11, 16  ;;  %v2176_v14 = vshrl.u32 %v905_v24, 16  ;;  %v5378_v24 = vld [vmem:[%s7353_s3 + $0x88] sm:$0xff]  }
 0x16f   : > { %5195 = vmatprep.subr.bf16.mxu0 %v5701_v17  ;;  %v2180_v43 = vrot.slane %v2178_v21, 1  ;;  %v2183_v55 = vshll.u32 %v6456_v49, 16  ;;  %v4475_v15 = vcombine.low %v6084_v53, %v6091_v25  ;;  %v1830_v57 = vsel %vm1727_vm5, %v6389_v22, %v6439_v23  ;;  %v5373_v22 = vld [vmem:[%s7353_s3 + $0x50] sm:$0xff]  }
 0x170   : > { %5176 = vmatmul.mubr.bf16.gmra.mxu0 %v1817_v52  ;;  %v2188_v36 = vshrl.u32 %v946_v6, 16  ;;  %v2192_v0 = vrot.slane %v2190_v62, 1  ;;  %v914_v2 = vshrl.u32 %v6059_v38, 16  ;;  %v2197_v53 = vrot.slane %v2195_v56, 1  ;;  %v5375_v38 = vld [vmem:[%s7353_s3 + $0x90] sm:$0xff]  }
 0x171   : > { %5002 = vmatpush3.bf16.msra.mxu1 %v5366_v63  ;;  %5179 = vmatprep.mubr.msk.bf16.mxu0 %vm5703_vm1, %v5701_v17  ;;  %v2181_v35 = vor.u32 %v2180_v43, %v2176_v14  ;;  %v2185_v34 = vrot.slane %v2183_v55, 1  ;;  %v918_v25 = vshll.u32 %v4475_v15, 16  ;;  %v2199_v32 = vshrl.u32 %v6456_v49, 16  ;;  %v5377_v55 = vld [vmem:[%s7353_s3 + $0x8] sm:$0xff]  }
 0x172   : > { %5003 = vmatprep.subr.bf16.mxu1 %v5369_v60  ;;  %5196 = vmatpush3.bf16.msra.mxu0 %v5372_v26  ;;  %v2193_v50 = vor.u32 %v2192_v0, %v2188_v36  ;;  %v916_v52 = vor.u32 %v914_v2, %v912_v44  ;;  %v949_v16 = vrot.slane %v4475_v15, 1  ;;  %v2207_v7 = vshrl.u32 %v948_v11, 16  ;;  %v5382_v0 = vld [vmem:[%s7353_s3 + $0x40] sm:$0xff]  }
 0x173   : > { %5197 = vmatprep.subr.bf16.mxu0 %v5701_v17  ;;  %v6480_v41 = vsel %vm893_vm3, %v2181_v35, %v2185_v34  ;;  %v920_v30 = vrot.slane %v918_v25, 1  ;;  %v4476_v61 = vcombine.low %v6094_v40, %v6110_v9  ;;  %v2201_v31 = vor.u32 %v2199_v32, %v2185_v34  ;;  %v5383_v2 = vld [vmem:[%s7353_s3 + $0x80] sm:$0xff]  }
 0x174   : > { %2070 = vmatmul.mubr.bf16.gmra.mxu1 %v6412_v48  ;;  %v6486_v39 = vsel %vm893_vm3, %v2193_v50, %v2197_v53  ;;  %v950_v33 = vsel %vm943_vm2, %v947_v46, %v949_v16  ;;  %v922_v4 = vshrl.u32 %v4475_v15, 16  ;;  %v5376_v46 = vld [vmem:[%s7353_s3 + $0x48] sm:$0xff]   ;;  %v2209_v44 = vor.u32 %v2207_v7, %v2197_v53 }
 0x175   : > { %2077 = vmatprep.mubr.bf16.mxu1 %v1830_v57  ;;  %5004 = vmatpush3.bf16.msra.mxu1 %v5370_v1  ;;  %v6495_v19 = vsel %vm893_vm3, %v916_v52, %v920_v30  ;;  %v2211_v40 = vshll.u32 %v950_v33, 16  ;;  %v926_v9 = vshll.u32 %v4476_v61, 16  ;;  %v951_v48 = vrot.slane %v4476_v61, 1  ;;  %v849_v1 = vld [vmem:[#allocation2] sm:$0xf] }
 0x176   : > { %5005 = vmatprep.subr.bf16.mxu1 %v5373_v22  ;;  %5198 = vmatpush3.bf16.msra.mxu0 %v5375_v38  ;;  %v2203_v18 = vshll.u32 %v6495_v19, 16  ;;  %v924_v6 = vor.u32 %v922_v4, %v920_v30  ;;  %v2215_v63 = vshrl.u32 %v6495_v19, 16  ;;  %v2223_v26 = vshrl.u32 %v950_v33, 16 }
 0x177   : > { %5199 = vmatprep.subr.bf16.mxu0 %v5701_v17  ;;  %v2213_v21 = vrot.slane %v2211_v40, 1  ;;  %v928_v11 = vrot.slane %v926_v9, 1  ;;  %v952_v60 = vsel %vm943_vm2, %v949_v16, %v951_v48  ;;  %v930_v14 = vshrl.u32 %v4476_v61, 16 }
 0x178   : > { %5180 = vmatmul.mubr.bf16.gmra.mxu0 %v1839_v10  ;;  %v2205_v62 = vrot.slane %v2203_v18, 1  ;;  %v2227_v56 = vshll.u32 %v952_v60, 16  ;;  %v953_v43 = vrot.slane %v6489_v13, 1  ;;  %v2239_v10 = vshrl.u32 %v952_v60, 16  ;;  %v5392_v13 = vld [vmem:[%s7355_s5 + $0x74] ss:$8 sps:$4 sm:$0xff]  }
 0x179   : > { %5006 = vmatpush3.bf16.msra.mxu1 %v5374_v59  ;;  %5183 = vmatprep.mubr.msk.bf16.mxu0 %vm5703_vm1, %v5701_v17  ;;  %v2214_v15 = vsel %vm893_vm3, %v2209_v44, %v2213_v21  ;;  %v6515_v57 = vsel %vm893_vm3, %v924_v6, %v928_v11  ;;  %v2225_v36 = vor.u32 %v2223_v26, %v2213_v21  ;;  %v5390_v44 = vld [vmem:[%s7355_s5 + $0x70] ss:$8 sps:$4 sm:$0xff]   ;;  %v5396_v60 = vld [vmem:[%s7355_s5 + $0x60] ss:$8 sps:$4 sm:$0xff]  }
 0x17a   : > { %5007 = vmatprep.subr.bf16.mxu1 %v5376_v46  ;;  %5200 = vmatpush3.bf16.msra.mxu0 %v5378_v24  ;;  %v2206_v35 = vsel %vm893_vm3, %v2201_v31, %v2205_v62  ;;  %v2217_v34 = vor.u32 %v2215_v63, %v2205_v62  ;;  %v2219_v53 = vshll.u32 %v6515_v57, 16  ;;  %v2229_v25 = vrot.slane %v2227_v56, 1  ;;  %v5393_v21 = vld [vmem:[%s7355_s5 + $0x170] ss:$8 sps:$4 sm:$0xff]   ;;  %v5398_v56 = vld [vmem:[%s7355_s5 + $0x64] ss:$8 sps:$4 sm:$0xff]  }
 0x17b   : > { %v1852_v22 = vsel %vm1727_vm5, %v6439_v23, %v1851_v8  ;;  %5201 = vmatprep.subr.bf16.mxu0 %v5701_v17  ;;  %v932_v38 = vor.u32 %v930_v14, %v928_v11  ;;  %v2231_v50 = vshrl.u32 %v6515_v57, 16  ;;  %v954_v52 = vsel %vm943_vm2, %v951_v48, %v953_v43  ;;  %v5395_v11 = vld [vmem:[%s7355_s5 + $0x174] ss:$8 sps:$4 sm:$0xff]   ;;  %v5401_v14 = vld [vmem:[%s7355_s5 + $0x164] ss:$8 sps:$4 sm:$0xff]  }
 0x17c   : > { %2078 = vmatmul.mubr.bf16.gmra.mxu1 %v6443_v3  ;;  %v2221_v32 = vrot.slane %v2219_v53, 1  ;;  %v2230_v16 = vsel %vm893_vm3, %v2225_v36, %v2229_v25  ;;  %v2241_v30 = vor.u32 %v2239_v10, %v2229_v25  ;;  %v2243_v7 = vshll.u32 %v954_v52, 16  ;;  %v5402_v10 = vld [vmem:[%s7355_s5 + $0x50] ss:$8 sps:$4 sm:$0xff]  }
 0x17d   : > { %2085 = vmatprep.mubr.bf16.mxu1 %v1852_v22  ;;  %5008 = vmatpush3.bf16.msra.mxu1 %v5377_v55  ;;  %v4472_v37 = vcombine.low %v849_v1, %v6267_v45  ;;  %v937_v8 = vsel %vm893_vm3, %v932_v38, %v6373_v12  ;;  %v1861_v33 = vsel %vm1727_vm5, %v6427_v5, %v1860_v51  ;;  %v5638_v5 = vld [vmem:[#allocation2 + $0x28] ss:$0 sps:$4 sm:$0x11]   ;;  %v2255_v48 = vshrl.u32 %v954_v52, 16  ;;  %v5405_v22 = vld [vmem:[%s7355_s5 + $0x150] ss:$8 sps:$4 sm:$0xff]  }
 0x17e   : > { %5009 = vmatprep.subr.bf16.mxu1 %v5382_v0  ;;  %5202 = vmatpush3.bf16.msra.mxu0 %v5383_v2  ;;  %v2222_v23 = vsel %vm893_vm3, %v2217_v34, %v2221_v32  ;;  %v2233_v3 = vor.u32 %v2231_v50, %v2221_v32  ;;  %v2235_v61 = vshll.u32 %v937_v8, 16  ;;  %v2245_v31 = vrot.slane %v2243_v7, 1  ;;  %v5407_v0 = vld [vmem:[%s7355_s5 + $0x154] ss:$8 sps:$4 sm:$0xff]   ;;  %v5408_v50 = vld [vmem:[%s7355_s5 + $0x40] ss:$8 sps:$4 sm:$0xff]  }
 0x17f   : > { %v1842_v4 = vor.u32 %v6071_v47, %v6065_v42  ;;  %v2170_v59 = vshll.u32 %v4472_v37, 16  ;;  %v2168_v51 = vshrl.u32 %v4472_v37, 16  ;;  %3864 = vmatprep.subr.bf16.mxu0 %v5395_v11  ;;  %v5411_v37 = vld [vmem:[%s7355_s5 + $0x140] ss:$8 sps:$4 sm:$0xff]   ;;  %v5437_v11 = vld [vmem:[%s7355_s5 + $0x104] ss:$8 sps:$4 sm:$0xff]  }
 0x180   : > { %5184 = vmatmul.mubr.bf16.gmra.mxu0 %v1861_v33  ;;  %v2237_v45 = vrot.slane %v2235_v61, 1  ;;  %v2246_v12 = vsel %vm893_vm3, %v2241_v30, %v2245_v31  ;;  %v2257_v46 = vor.u32 %v2255_v48, %v2245_v31  ;;  %v5416_v31 = vld [vmem:[%s7355_s5 + $0x34] ss:$8 sps:$4 sm:$0xff]   ;;  %v5426_v48 = vld [vmem:[%s7355_s5 + $0x10] ss:$8 sps:$4 sm:$0xff]  }
 0x181   : > { %5010 = vmatpush3.bf16.msra.mxu1 %v5384_v27  ;;  %5203 = vmatprep.mubr.msk.bf16.mxu0 %vm5703_vm1, %v5701_v17  ;;  %v1843_v58 = vsel %vm1727_vm5, %v6429_v54, %v1842_v4  ;;  %v2172_v29 = vrot.slane %v2170_v59, 1  ;;  %v938_v54 = vshrl.u32 %v5638_v5, 16  ;;  %v5419_v33 = vld [vmem:[%s7355_s5 + $0x134] ss:$8 sps:$4 sm:$0xff]  }
 0x182   : > { %v2238_v40 = vsel %vm893_vm3, %v2233_v3, %v2237_v45  ;;  %3811 = vmatprep.subr.bf16.mxu1 %v5392_v13  ;;  %v5428_v5 = vld [vmem:[%s7355_s5 + $0x14] ss:$8 sps:$4 sm:$0xff]  }
 0x183   : > { %v2173_v42 = vor.u32 %v2172_v29, %v2168_v51  ;;  %v5420_v29 = vld [vmem:[%s7355_s5 + $0x20] ss:$8 sps:$4 sm:$0xff]   ;;  %v5425_v51 = vld [vmem:[%s7355_s5 + $0x124] ss:$8 sps:$4 sm:$0xff]  }
 0x184   : > { %2086 = vmatmul.mubr.bf16.gmra.mxu1 %v1843_v58 }
 0x185   : > { %2454 = vmatprep.mubr.bf16.mxu1 %v6480_v41  ;;  %v2174_v47 = vsel %vm893_vm3, %v2173_v42, %v6421_v28  ;;  %v2251_v41 = vshll.u32 %v938_v54, 16  ;;  %v2247_v28 = vshrl.u32 %v937_v8, 16 }
 0x187   : > { %v2253_v9 = vrot.slane %v2251_v41, 1 }
 0x188   : > { %5204 = vmatmul.mubr.bf16.vlgmr.msra.gmra.mxu0 %v6486_v39  ;;  %v2249_v39 = vor.u32 %v2247_v28, %v2237_v45  ;;  %v5422_v45 = vld [vmem:[%s7355_s5 + $0x24] ss:$8 sps:$4 sm:$0xff]  }
 0x189   : > { %5207 = vmatprep.mubr.msk.bf16.mxu0 %vm5703_vm1, %v5701_v17  ;;  %3865 = vmatpush1.bf16.msra.mxu0 %v5393_v21  ;;  %v5432_v21 = vld [vmem:[%s7355_s5] ss:$8 sps:$4 sm:$0xff]  }
 0x18a   : > { %v2254_v24 = vsel %vm893_vm3, %v2249_v39, %v2253_v9  ;;  %3866 = vmatprep.subr.bf16.mxu0 %v5401_v14  ;;  %v5423_v39 = vld [vmem:[%s7355_s5 + $0x120] ss:$8 sps:$4 sm:$0xff]  }
 0x18c   : > { %2455 = vmatmul.mubr.bf16.vlgmr.msra.gmra.mxu1 %v2174_v47 }
 0x18d   : > { %2462 = vmatprep.mubr.bf16.mxu1 %v2206_v35  ;;  %3812 = vmatpush1.bf16.msra.mxu1 %v5390_v44  ;;  %v5410_v35 = vld [vmem:[%s7355_s5 + $0x44] ss:$8 sps:$4 sm:$0xff]  }
 0x18e   : > { %3813 = vmatprep.subr.bf16.mxu1 %v5398_v56 }
 0x190   : > { %5208 = vmatmul.mubr.bf16.gmra.mxu0 %v2214_v15 }
 0x191   : > { %5211 = vmatprep.mubr.msk.bf16.mxu0 %vm5703_vm1, %v5701_v17  ;;  %3814 = vmatpush1.bf16.msra.mxu1 %v5396_v60 }
 0x194   : > { %2463 = vmatmul.mubr.bf16.gmra.mxu1 %v6456_v49  ;;  %v2259_v49 = vshll.u32 %v953_v43, 16  ;;  %v5404_v43 = vld [vmem:[%s7355_s5 + $0x54] ss:$8 sps:$4 sm:$0xff]  }
 0x195   : > { %2470 = vmatprep.mubr.bf16.mxu1 %v2222_v23  ;;  %3815 = vmatprep.subr.bf16.mxu1 %v5404_v43  ;;  %v5414_v23 = vld [vmem:[%s7355_s5 + $0x30] ss:$8 sps:$4 sm:$0xff]  }
 0x196   : > { %3816 = vmatpush1.bf16.msra.mxu1 %v5402_v10 }
 0x197   : > { %3817 = vmatprep.subr.bf16.mxu1 %v5410_v35 }
 0x198   : > { %5212 = vmatmul.mubr.bf16.gmra.mxu0 %v2230_v16 }
 0x199   : > { %5215 = vmatprep.mubr.msk.bf16.mxu0 %vm5703_vm1, %v5701_v17 }
 0x19a   : > { %3818 = vmatpush1.bf16.msra.mxu1 %v5408_v50  ;;  %v5449_v50 = vld [vmem:[%s7355_s5 + $0x1e4] ss:$8 sps:$4 sm:$0xff]  }
 0x19b   : > { %3819 = vmatprep.subr.bf16.mxu1 %v5416_v31 }
 0x19c   : > { %2471 = vmatmul.mubr.bf16.gmra.mxu1 %v6495_v19  ;;  %v2261_v19 = vrot.slane %v2259_v49, 1  ;;  %v5431_v49 = vld [vmem:[%s7355_s5 + $0x114] ss:$8 sps:$4 sm:$0xff]  }
 0x19d   : > { %2478 = vmatprep.mubr.bf16.mxu1 %v2238_v40  ;;  %v5417_v40 = vld [vmem:[%s7355_s5 + $0x130] ss:$8 sps:$4 sm:$0xff]  }
 0x19e   : > { %v2262_v18 = vsel %vm893_vm3, %v2257_v46, %v2261_v19  ;;  %3820 = vmatpush1.bf16.msra.mxu1 %v5414_v23  ;;  %v5434_v19 = vld [vmem:[%s7355_s5 + $0x4] ss:$8 sps:$4 sm:$0xff]  }
 0x19f   : > { %3821 = vmatprep.subr.bf16.mxu1 %v5422_v45  ;;  %v5458_v45 = vld [vmem:[%s7355_s5 + $0xc4] ss:$8 sps:$4 sm:$0xff]  }
 0x1a0   : > { %5216 = vmatmul.mubr.bf16.gmra.mxu0 %v2246_v12 }
 0x1a1   : > { %5219 = vmatprep.mubr.msk.bf16.mxu0 %vm5703_vm1, %v5701_v17 }
 0x1a2   : > { %3822 = vmatpush1.bf16.msra.mxu1 %v5420_v29 }
 0x1a3   : > { %3823 = vmatprep.subr.bf16.mxu1 %v5428_v5 }
 0x1a4   : > { %2479 = vmatmul.mubr.bf16.gmra.mxu1 %v6515_v57  ;;  %v5399_v57 = vld [vmem:[%s7355_s5 + $0x160] ss:$8 sps:$4 sm:$0xff]  }
 0x1a5   : > { %2486 = vmatprep.mubr.bf16.mxu1 %v2254_v24  ;;  %3867 = vmatpush1.bf16.msra.mxu0 %v5399_v57  ;;  %v5438_v57 = vld [vmem:[%s7355_s5 + $0xf0] ss:$8 sps:$4 sm:$0xff]  }
 0x1a6   : > { %3868 = vmatprep.subr.bf16.mxu0 %v5407_v0  ;;  %3824 = vmatpush1.bf16.msra.mxu1 %v5426_v48  ;;  %v5459_v48 = vld [vmem:[%s7355_s5 + $0x1c0] ss:$8 sps:$4 sm:$0xff]  }
 0x1a7   : > { %3825 = vmatprep.subr.bf16.mxu1 %v5434_v19 }
 0x1a8   : > { %5220 = vmatmul.mubr.bf16.gmra.mxu0 %v2262_v18 }
 0x1a9   : > { %3869 = vmatpush1.bf16.msra.mxu0 %v5405_v22 }
 0x1aa   : > { %3826 = vmatpush1.bf16.msra.mxu1 %v5432_v21  ;;  %v5468_v21 = vld [vmem:[%s7355_s5 + $0xa0] ss:$8 sps:$4 sm:$0xff]  }
 0x1ac   : > { %2487 = vmatmul.mubr.bf16.gmra.mxu1 %v937_v8  ;;  %v5413_v8 = vld [vmem:[%s7355_s5 + $0x144] ss:$8 sps:$4 sm:$0xff]  }
 0x1ad   : > { %3870 = vmatprep.subr.bf16.mxu0 %v5413_v8  ;;  %v5447_v8 = vld [vmem:[%s7355_s5 + $0x1e0] ss:$8 sps:$4 sm:$0xff]  }
 0x1ae   : > { %3871 = vmatpush1.bf16.msra.mxu0 %v5411_v37 }
 0x1af   : > { %3872 = vmatprep.subr.bf16.mxu0 %v5419_v33 }
 0x1b2   : > { %3873 = vmatpush1.bf16.msra.mxu0 %v5417_v40 }
 0x1b3   : > { %3874 = vmatprep.subr.bf16.mxu0 %v5425_v51  ;;  %v5456_v51 = vld [vmem:[%s7355_s5 + $0xc0] ss:$8 sps:$4 sm:$0xff]  }
 0x1b6   : > { %3875 = vmatpush1.bf16.msra.mxu0 %v5423_v39 }
 0x1b7   : > { %3876 = vmatprep.subr.bf16.mxu0 %v5431_v49  ;;  %v5462_v49 = vld [vmem:[%s7355_s5 + $0xb0] ss:$8 sps:$4 sm:$0xff]  }
 0x1f8   : > { %v1534_v6 = vpop.f32.mrf.mxu0 }
 0x1fa   : > { %v5133_v63 = vpop.f32.mrf.mxu0 }
 0x1fc   : > { %v4893_v26 = vpop.f32.mrf.mxu1  ;;  %v1537_v62 = vpop.f32.mrf.mxu0 }
 0x1fe   : > { %v4894_v55 = vpop.f32.mrf.mxu1  ;;  %v5134_v15 = vpop.f32.mrf.mxu0 }
 0x1ff   : > { %v4895_v36 = vadd.f32 %v4894_v55, %v4893_v26  ;;  %v5435_v55 = vld [vmem:[%s7355_s5 + $0x100] ss:$8 sps:$4 sm:$0xff]  }
 0x200   : > { %v4896_v2 = vpop.f32.mrf.mxu1  ;;  %v1542_v1 = vpop.f32.mrf.mxu0 }
 0x201   : > { %v6612_v34 = vadd.f32 %v4895_v36, %v1534_v6  ;;  %v5429_v6 = vld [vmem:[%s7355_s5 + $0x110] ss:$8 sps:$4 sm:$0xff]   ;;  %v5443_v36 = vld [vmem:[%s7355_s5 + $0x1f4] ss:$8 sps:$4 sm:$0xff]  }
 0x202   : > { %v4897_v53 = vpop.f32.mrf.mxu1  ;;  %v5137_v25 = vpop.f32.mrf.mxu0  ;;  %3877 = vmatpush1.bf16.msra.mxu0 %v5429_v6 }
 0x203   : > { %v4898_v38 = vadd.f32 %v4897_v53, %v4896_v2  ;;  %3878 = vmatprep.subr.bf16.mxu0 %v5437_v11  ;;  %v5446_v2 = vld [vmem:[%s7355_s5 + $0xe4] ss:$8 sps:$4 sm:$0xff]   ;;  %v5441_v25 = vld [vmem:[%s7355_s5 + $0x1f0] ss:$8 sps:$4 sm:$0xff]  }
 0x204   : > { %v4899_v52 = vpop.f32.mrf.mxu1  ;;  %v1545_v32 = vpop.f32.mrf.mxu0  ;;  %v5473_v11 = vld [vmem:[%s7355_s5 + $0x1a4] ss:$8 sps:$4 sm:$0xff]  }
 0x205   : > { %v6620_v16 = vadd.f32 %v4898_v38, %v1537_v62  ;;  %v5440_v62 = vld [vmem:[%s7355_s5 + $0xf4] ss:$8 sps:$4 sm:$0xff]   ;;  %v5444_v38 = vld [vmem:[%s7355_s5 + $0xe0] ss:$8 sps:$4 sm:$0xff]  }
 0x206   : > { %v4900_v30 = vpop.f32.mrf.mxu1  ;;  %v5138_v7 = vpop.f32.mrf.mxu0  ;;  %3827 = vmatprep.subr.bf16.mxu1 %v5440_v62  ;;  %3879 = vmatpush1.bf16.msra.mxu0 %v5435_v55  ;;  %v5476_v62 = vld [vmem:[%s7355_s5 + $0x94] ss:$8 sps:$4 sm:$0xff]   ;;  %v5471_v55 = vld [vmem:[%s7355_s5 + $0x1a0] ss:$8 sps:$4 sm:$0xff]  }
 0x207   : > { %v4901_v27 = vadd.f32 %v4900_v30, %v4899_v52  ;;  %3828 = vmatpush2.bf16.msra.mxu1 %v5438_v57  ;;  %3880 = vmatprep.subr.bf16.mxu0 %v5443_v36  ;;  %v5452_v30 = vld [vmem:[%s7355_s5 + $0xd4] ss:$8 sps:$4 sm:$0xff]  }
 0x208   : > { %v4902_v3 = vpop.f32.mrf.mxu1  ;;  %v1550_v61 = vpop.f32.mrf.mxu0  ;;  %3829 = vmatprep.subr.bf16.mxu1 %v5446_v2  ;;  %v5479_v57 = vld [vmem:[%s7355_s5 + $0x194] ss:$8 sps:$4 sm:$0xff]  }
 0x209   : > { %v6637_v4 = vadd.f32 %v4901_v27, %v1542_v1 }
 0x20a   : > { %v4903_v12 = vpop.f32.mrf.mxu1  ;;  %v5141_v59 = vpop.f32.mrf.mxu0  ;;  %3881 = vmatpush2.bf16.msra.mxu0 %v5441_v25  ;;  %v5480_v25 = vld [vmem:[%s7355_s5 + $0x80] ss:$8 sps:$4 sm:$0xff]  }
 0x20b   : > { %v4904_v58 = vadd.f32 %v4903_v12, %v4902_v3  ;;  %3830 = vmatpush2.bf16.msra.mxu1 %v5444_v38  ;;  %3882 = vmatprep.subr.bf16.mxu0 %v5449_v50  ;;  %v5450_v3 = vld [vmem:[%s7355_s5 + $0xd0] ss:$8 sps:$4 sm:$0xff]  }
 0x20c   : > { %v4905_v42 = vpop.f32.mrf.mxu1  ;;  %v1553_v47 = vpop.f32.mrf.mxu0  ;;  %3831 = vmatprep.subr.bf16.mxu1 %v5452_v30 }
 0x20d   : > { %v6654_v54 = vadd.f32 %v4904_v58, %v1545_v32  ;;  %v5453_v58 = vld [vmem:[%s7355_s5 + $0x1d0] ss:$8 sps:$4 sm:$0xff]  }
 0x20e   : > { %v4906_v41 = vpop.f32.mrf.mxu1  ;;  %v5142_v28 = vpop.f32.mrf.mxu0  ;;  %3883 = vmatpush2.bf16.msra.mxu0 %v5447_v8 }
 0x20f   : > { %v4907_v9 = vadd.f32 %v4906_v41, %v4905_v42  ;;  %3832 = vmatpush2.bf16.msra.mxu1 %v5450_v3  ;;  %v5461_v42 = vld [vmem:[%s7355_s5 + $0x1c4] ss:$8 sps:$4 sm:$0xff]   ;;  %v5464_v41 = vld [vmem:[%s7355_s5 + $0xb4] ss:$8 sps:$4 sm:$0xff]  }
 0x210   : > { %v4908_v46 = vpop.f32.mrf.mxu1  ;;  %v1558_v24 = vpop.f32.mrf.mxu0  ;;  %3833 = vmatprep.subr.bf16.mxu1 %v5458_v45 }
 0x211   : > { %v6668_v18 = vadd.f32 %v4907_v9, %v1550_v61  ;;  %v5455_v61 = vld [vmem:[%s7355_s5 + $0x1d4] ss:$8 sps:$4 sm:$0xff]  }
 0x212   : > { %v4909_v44 = vpop.f32.mrf.mxu1  ;;  %v5145_v13 = vpop.f32.mrf.mxu0  ;;  %3884 = vmatprep.subr.bf16.mxu0 %v5455_v61 }
 0x213   : > { %v4910_v63 = vadd.f32 %v4909_v44, %v4908_v46  ;;  %3885 = vmatpush2.bf16.msra.mxu0 %v5453_v58  ;;  %3834 = vmatpush2.bf16.msra.mxu1 %v5456_v51  ;;  %v5467_v46 = vld [vmem:[%s7355_s5 + $0x1b4] ss:$8 sps:$4 sm:$0xff]   ;;  %v5470_v44 = vld [vmem:[%s7355_s5 + $0xa4] ss:$8 sps:$4 sm:$0xff]  }
 0x214   : > { %v4911_v60 = vpop.f32.mrf.mxu1  ;;  %v1561_v26 = vpop.f32.mrf.mxu0  ;;  %3886 = vmatprep.subr.bf16.mxu0 %v5461_v42  ;;  %3835 = vmatprep.subr.bf16.mxu1 %v5464_v41 }
 0x215   : > { %v6682_v56 = vadd.f32 %v4910_v63, %v1553_v47  ;;  %v5465_v63 = vld [vmem:[%s7355_s5 + $0x1b0] ss:$8 sps:$4 sm:$0xff]  }
 0x216   : > { %v4912_v14 = vpop.f32.mrf.mxu1  ;;  %v5146_v43 = vpop.f32.mrf.mxu0 }
 0x217   : > { %v4913_v15 = vadd.f32 %v4912_v14, %v4911_v60  ;;  %3887 = vmatpush2.bf16.msra.mxu0 %v5459_v48  ;;  %3836 = vmatpush2.bf16.msra.mxu1 %v5462_v49 }
 0x218   : > { %v4914_v10 = vpop.f32.mrf.mxu1  ;;  %v1566_v0 = vpop.f32.mrf.mxu0  ;;  %3888 = vmatprep.subr.bf16.mxu0 %v5467_v46  ;;  %3837 = vmatprep.subr.bf16.mxu1 %v5470_v44 }
 0x219   : > { %v6696_v1 = vadd.f32 %v4913_v15, %v1558_v24  ;;  %v5474_v15 = vld [vmem:[%s7355_s5 + $0x90] ss:$8 sps:$4 sm:$0xff]  }
 0x21a   : > { %v4915_v35 = vpop.f32.mrf.mxu1  ;;  %v5149_v53 = vpop.f32.mrf.mxu0 }
 0x21b   : > { %v4916_v22 = vadd.f32 %v4915_v35, %v4914_v10  ;;  %3889 = vmatpush2.bf16.msra.mxu0 %v5465_v63  ;;  %3838 = vmatpush2.bf16.msra.mxu1 %v5468_v21  ;;  %v5477_v53 = vld [vmem:[%s7355_s5 + $0x190] ss:$8 sps:$4 sm:$0xff]  }
 0x21c   : > { %v4917_v52 = vpop.f32.mrf.mxu1  ;;  %v1569_v32 = vpop.f32.mrf.mxu0  ;;  %3890 = vmatprep.subr.bf16.mxu0 %v5473_v11  ;;  %3839 = vmatprep.subr.bf16.mxu1 %v5476_v62 }
 0x21d   : > { %v6710_v7 = vadd.f32 %v4916_v22, %v1561_v26  ;;  %v5485_v22 = vld [vmem:[%s7355_s5 + $0x184] ss:$8 sps:$4 sm:$0xff]  }
 0x21e   : > { %v4918_v27 = vpop.f32.mrf.mxu1  ;;  %v5150_v37 = vpop.f32.mrf.mxu0 }
 0x21f   : > { %v4919_v23 = vadd.f32 %v4918_v27, %v4917_v52  ;;  %3891 = vmatpush2.bf16.msra.mxu0 %v5471_v55  ;;  %3840 = vmatpush2.bf16.msra.mxu1 %v5474_v15  ;;  %v5490_v52 = vld [vmem:[%s7355_s5 + $0x274] ss:$8 sps:$4 sm:$0xff]   ;;  %v5483_v27 = vld [vmem:[%s7355_s5 + $0x180] ss:$8 sps:$4 sm:$0xff]  }
 0x220   : > { %v4920_v31 = vpop.f32.mrf.mxu1  ;;  %v6721_v33 = vpop.f32.mrf.mxu0  ;;  %3892 = vmatprep.subr.bf16.mxu0 %v5479_v57  ;;  %v5498_v37 = vld [vmem:[%s7355_s5 + $0x374] ss:$8 sps:$4 sm:$0xff]  }
 0x221   : > { %v6726_v12 = vadd.f32 %v4919_v23, %v1566_v0  ;;  %v5482_v0 = vld [vmem:[%s7355_s5 + $0x84] ss:$8 sps:$4 sm:$0xff]  }
 0x222   : > { %v4921_v59 = vpop.f32.mrf.mxu1  ;;  %v5169_v40 = vpop.f32.mrf.mxu0  ;;  %3841 = vmatprep.subr.bf16.mxu1 %v5482_v0 }
 0x223   : > { %v4922_v29 = vadd.f32 %v4921_v59, %v4920_v31  ;;  %3893 = vmatpush2.bf16.msra.mxu0 %v5477_v53  ;;  %3842 = vmatpush2.bf16.msra.mxu1 %v5480_v25 }
 0x224   : > { %v6737_v47 = vpop.f32.mrf.mxu1  ;;  %v6739_v5 = vpop.f32.mrf.mxu0  ;;  %3894 = vmatprep.subr.bf16.mxu0 %v5485_v22  ;;  %3917 = vmatprep.subr.bf16.mxu1 %v5490_v52 }
 0x225   : > { %v6744_v28 = vadd.f32 %v4922_v29, %v1569_v32 }
 0x226   : > { %v6746_v39 = vpop.f32.mrf.mxu1  ;;  %v5170_v9 = vpop.f32.mrf.mxu0 }
 0x227   : > { %3895 = vmatpush2.bf16.msra.mxu0 %v5483_v27  ;;  %v4954_v55 = vadd.f32 %v6746_v39, %v6737_v47 }
 0x228   : > { %v6757_v24 = vpop.f32.mrf.mxu1  ;;  %v6759_v19 = vpop.f32.mrf.mxu0  ;;  %3970 = vmatprep.subr.bf16.mxu0 %v5498_v37  ;;  %v6863_v37 = vld [vmem:[%s7354_s4] ss:$0 sm:$0xff] }
 0x229   : > { %v2129_v22 = vadd.f32 %v4954_v55, %v6721_v33 }
 0x22a   : > { %v6764_v13 = vpop.f32.mrf.mxu1  ;;  %v5173_v6 = vpop.f32.mrf.mxu0 }
 0x22b   : > { %v4957_v52 = vadd.f32 %v6764_v13, %v6757_v24 }
 0x22c   : > { %v6775_v60 = vpop.f32.mrf.mxu1  ;;  %v6777_v26 = vpop.f32.mrf.mxu0 }
 0x22e   : > { %v6782_v14 = vpop.f32.mrf.mxu1  ;;  %v5174_v43 = vpop.f32.mrf.mxu0 }
 0x230   : > { %v6793_v36 = vpop.f32.mrf.mxu1  ;;  %v6795_v10 = vpop.f32.mrf.mxu0 }
 0x232   : > { %v6800_v2 = vpop.f32.mrf.mxu1  ;;  %v5177_v35 = vpop.f32.mrf.mxu0 }
 0x234   : > { %v6811_v38 = vpop.f32.mrf.mxu1  ;;  %v6813_v50 = vpop.f32.mrf.mxu0 }
 0x236   : > { %v6818_v32 = vpop.f32.mrf.mxu1  ;;  %v5178_v30 = vpop.f32.mrf.mxu0 }
 0x238   : > { %v6826_v8 = vpop.f32.mrf.mxu1  ;;  %v6828_v23 = vpop.f32.mrf.mxu0 }
 0x23a   : > { %v6830_v3 = vpop.f32.mrf.mxu1  ;;  %v5181_v61 = vpop.f32.mrf.mxu0 }
 0x23c   : > { %v6832_v31 = vpop.f32.mrf.mxu1  ;;  %v6834_v45 = vpop.f32.mrf.mxu0 }
 0x23e   : > { %v6836_v59 = vpop.f32.mrf.mxu1  ;;  %v5182_v40 = vpop.f32.mrf.mxu0 }
 0x240   : > { %v6838_v58 = vpop.f32.mrf.mxu1  ;;  %v6840_v29 = vpop.f32.mrf.mxu0 }
 0x242   : > { %v6842_v51 = vpop.f32.mrf.mxu1  ;;  %v5185_v42 = vpop.f32.mrf.mxu0 }
 0x244   : > { %v6844_v41 = vpop.f32.mrf.mxu1  ;;  %v6846_v9 = vpop.f32.mrf.mxu0 }
 0x246   : > { %v6848_v48 = vpop.f32.mrf.mxu1  ;;  %v5186_v49 = vpop.f32.mrf.mxu0 }
 0x247   : > { %v2132_v49 = vadd.f32 %v4957_v52, %v6739_v5 }
 0x248   : > { %v6850_v46 = vpop.f32.mrf.mxu1  ;;  %v2529_v44 = vpop.f32.mrf.mxu0 }
 0x24a   : > { %v6852_v6 = vpop.f32.mrf.mxu1  ;;  %v5205_v63 = vpop.f32.mrf.mxu0 }
 0x24c   : > { %v5011_v21 = vpop.f32.mrf.mxu1  ;;  %v2532_v11 = vpop.f32.mrf.mxu0 }
 0x24e   : > { %v5012_v62 = vpop.f32.mrf.mxu1  ;;  %v5206_v43 = vpop.f32.mrf.mxu0 }
 0x24f   : > { %v5013_v15 = vadd.f32 %v5012_v62, %v5011_v21 }
 0x250   : > { %v5014_v57 = vpop.f32.mrf.mxu1  ;;  %v2537_v0 = vpop.f32.mrf.mxu0 }
 0x251   : > { %v2457_v35 = vadd.f32 %v5013_v15, %v6612_v34  ;;  %v4960_v34 = vadd.f32 %v6782_v14, %v6775_v60  ;;  %v4963_v60 = vadd.f32 %v6800_v2, %v6793_v36 }
 0x252   : > { %v5015_v53 = vpop.f32.mrf.mxu1  ;;  %v5209_v25 = vpop.f32.mrf.mxu0 }
 0x253   : > { %v2530_v30 = vadd.f32 %v2529_v44, %v2457_v35  ;;  %v5016_v27 = vadd.f32 %v5015_v53, %v5014_v57  ;;  %v2137_v15 = vadd.f32 %v4960_v34, %v6759_v19 }
 0x254   : > { %v5017_v47 = vpop.f32.mrf.mxu1  ;;  %v2540_v39 = vpop.f32.mrf.mxu0 }
 0x255   : > { %v2568_v61 = vadd.f32 %v2530_v30, %v2129_v22  ;;  %v2460_v40 = vadd.f32 %v5016_v27, %v6620_v16  ;;  %v2140_v27 = vadd.f32 %v4963_v60, %v6777_v26 }
 0x256   : > { %v5018_v42 = vpop.f32.mrf.mxu1  ;;  %v5210_v33 = vpop.f32.mrf.mxu0 }
 0x257   : > { %v2585_v24 = vadd.f32 %v6863_v37, %v2568_v61  ;;  %v2533_v13 = vadd.f32 %v2532_v11, %v2460_v40  ;;  %v5019_v44 = vadd.f32 %v5018_v42, %v5017_v47 }
 0x258   : > { %v5020_v63 = vpop.f32.mrf.mxu1  ;;  %v2545_v21 = vpop.f32.mrf.mxu0 }
 0x259   : > { %v2595_v62 = vmax.f32 %v2585_v24, 0.0  ;;  %v2569_v43 = vadd.f32 %v2533_v13, %v2132_v49  ;;  %v2465_v55 = vadd.f32 %v5019_v44, %v6637_v4  ;;  %v4966_v4 = vadd.f32 %v6818_v32, %v6811_v38 }
 0x25a   : > { %v5021_v16 = vpop.f32.mrf.mxu1  ;;  %v5213_v57 = vpop.f32.mrf.mxu0  ;;  %v4969_v38 = vadd.f32 %v6830_v3, %v6826_v8 }
 0x25b   : > { %2605 = vst [vmem:[#allocation3] sm:$0xff] %v2595_v62  ;;  %v2586_v5 = vadd.f32 %v6863_v37, %v2569_v43  ;;  %v2538_v14 = vadd.f32 %v2537_v0, %v2465_v55  ;;  %v5022_v35 = vadd.f32 %v5021_v16, %v5020_v63 }
 0x25c   : > { %v5023_v11 = vpop.f32.mrf.mxu1  ;;  %v2548_v53 = vpop.f32.mrf.mxu0  ;;  %v2148_v55 = vadd.f32 %v4969_v38, %v6813_v50 }
 0x25d   : > { %v2596_v25 = vmax.f32 %v2586_v5, 0.0  ;;  %v2570_v22 = vadd.f32 %v2538_v14, %v2137_v15  ;;  %v2468_v52 = vadd.f32 %v5022_v35, %v6654_v54  ;;  %v2145_v54 = vadd.f32 %v4966_v4, %v6795_v10 }
 0x25e   : > { %v5024_v19 = vpop.f32.mrf.mxu1  ;;  %v5214_v30 = vpop.f32.mrf.mxu0 }
 0x25f   : > { %2606 = vst [vmem:[#allocation3 + $0x8] sm:$0xff] %v2596_v25  ;;  %v2587_v36 = vadd.f32 %v6863_v37, %v2570_v22  ;;  %v2541_v2 = vadd.f32 %v2540_v39, %v2468_v52  ;;  %v5025_v47 = vadd.f32 %v5024_v19, %v5023_v11 }
 0x260   : > { %v5026_v0 = vpop.f32.mrf.mxu1  ;;  %v2553_v61 = vpop.f32.mrf.mxu0 }
 0x261   : > { %v2597_v40 = vmax.f32 %v2587_v36, 0.0  ;;  %v2571_v34 = vadd.f32 %v2541_v2, %v2140_v27  ;;  %v2473_v42 = vadd.f32 %v5025_v47, %v6668_v18  ;;  %v4972_v18 = vadd.f32 %v6836_v59, %v6832_v31 }
 0x262   : > { %v5027_v33 = vpop.f32.mrf.mxu1  ;;  %v5217_v49 = vpop.f32.mrf.mxu0  ;;  %v2621_v15 = vld [vmem:[#allocation3] ss:$2 sm:$0xf]  ;;  %v2623_v8 = vld [vmem:[#allocation3 + $0x1] ss:$2 sm:$0xf]  ;;  %v4975_v31 = vadd.f32 %v6842_v51, %v6838_v58 }
 0x263   : > { %2607 = vst [vmem:[#allocation3 + $0x10] sm:$0xff] %v2597_v40  ;;  %v2588_v26 = vadd.f32 %v6863_v37, %v2571_v34  ;;  %v2546_v32 = vadd.f32 %v2545_v21, %v2473_v42  ;;  %v5028_v24 = vadd.f32 %v5027_v33, %v5026_v0  ;;  %v2153_v35 = vadd.f32 %v4972_v18, %v6828_v23 }
 0x264   : > { %v5029_v39 = vpop.f32.mrf.mxu1  ;;  %v2556_v13 = vpop.f32.mrf.mxu0  ;;  %v2624_v59 = vmax.f32 %v2621_v15, %v2623_v8  ;;  %v2156_v51 = vadd.f32 %v4975_v31, %v6834_v45 }
 0x265   : > { %v2598_v44 = vmax.f32 %v2588_v26, 0.0  ;;  %v2572_v63 = vadd.f32 %v2546_v32, %v2145_v54  ;;  %v2476_v62 = vadd.f32 %v5028_v24, %v6682_v56 }
 0x266   : > { %v5030_v10 = vpop.f32.mrf.mxu1  ;;  %v5218_v43 = vpop.f32.mrf.mxu0 }
 0x267   : > { %2608 = vst [vmem:[#allocation3 + $0x18] sm:$0xff] %v2598_v44  ;;  %v2589_v3 = vadd.f32 %v6863_v37, %v2572_v63  ;;  %v2549_v21 = vadd.f32 %v2548_v53, %v2476_v62  ;;  %v5031_v16 = vadd.f32 %v5030_v10, %v5029_v39 }
 0x268   : > { %v5032_v57 = vpop.f32.mrf.mxu1  ;;  %v2561_v60 = vpop.f32.mrf.mxu0 }
 0x269   : > { %v2599_v5 = vmax.f32 %v2589_v3, 0.0  ;;  %v2573_v14 = vadd.f32 %v2549_v21, %v2148_v55  ;;  %v2481_v56 = vadd.f32 %v5031_v16, %v6696_v1 }
 0x26a   : > { %v2626_v50 = vld [vmem:[#allocation3 + $0xa] ss:$2 sm:$0xf]  ;;  %v2628_v11 = vld [vmem:[#allocation3 + $0xb] ss:$2 sm:$0xf]  ;;  %v5033_v25 = vpop.f32.mrf.mxu1  ;;  %v5221_v22 = vpop.f32.mrf.mxu0 }
 0x26b   : > { %v2629_v52 = vmax.f32 %v2626_v50, %v2628_v11  ;;  %2609 = vst [vmem:[#allocation3 + $0x20] sm:$0xff] %v2599_v5  ;;  %v2590_v53 = vadd.f32 %v6863_v37, %v2573_v14  ;;  %v2554_v4 = vadd.f32 %v2553_v61, %v2481_v56  ;;  %v5034_v19 = vadd.f32 %v5033_v25, %v5032_v57 }
 0x26c   : > { %v5035_v30 = vpop.f32.mrf.mxu1  ;;  %v2564_v27 = vpop.f32.mrf.mxu0  ;;  %v4978_v61 = vadd.f32 %v6848_v48, %v6844_v41 }
 0x26d   : > { %v2630_v36 = vmax.f32 %v2624_v59, %v2629_v52  ;;  %v2600_v1 = vmax.f32 %v2590_v53, 0.0  ;;  %v2574_v2 = vadd.f32 %v2554_v4, %v2153_v35  ;;  %v2484_v23 = vadd.f32 %v5034_v19, %v6710_v7  ;;  %v2696_v59 = vld [vmem:[#allocation4] sm:$0xe] }
 0x26e   : > { %v5036_v47 = vpop.f32.mrf.mxu1  ;;  %v5222_v58 = vpop.f32.mrf.mxu0  ;;  %v2639_v42 = vld [vmem:[#allocation3 + $0x14] ss:$2 sm:$0xf]  ;;  %v2641_v54 = vld [vmem:[#allocation3 + $0x15] ss:$2 sm:$0xf]  ;;  %v4981_v7 = vadd.f32 %v6852_v6, %v6850_v46  ;;  %v2161_v62 = vadd.f32 %v4978_v61, %v6840_v29 }
 0x26f   : > { %v4856_v0 = vpack.c.bf16 %v2630_v36, %v2630_v36  ;;  %2610 = vst [vmem:[#allocation3 + $0x28] sm:$0xff] %v2600_v1  ;;  %v2591_v40 = vadd.f32 %v6863_v37, %v2574_v2  ;;  %v2557_v34 = vadd.f32 %v2556_v13, %v2484_v23  ;;  %v5037_v33 = vadd.f32 %v5036_v47, %v5035_v30  ;;  %v2692_v4 = vld [vmem:[#allocation4] sm:$0xf] }
 0x270   : > { %v5038_v49 = vpop.f32.mrf.mxu1  ;;  %v2642_v13 = vmax.f32 %v2639_v42, %v2641_v54  ;;  %v2164_v6 = vadd.f32 %v4981_v7, %v6846_v9 }
 0x271   : > { %v2635_v38 = vrot.slane %v4856_v0, 7  ;;  %v2601_v26 = vmax.f32 %v2591_v40, 0.0  ;;  %v2575_v32 = vadd.f32 %v2557_v34, %v2156_v51  ;;  %v2489_v39 = vadd.f32 %v5037_v33, %v6726_v12 }
 0x272   : > { %v2644_v24 = vld [vmem:[#allocation3 + $0x1e] ss:$2 sm:$0xf]  ;;  %v2646_v45 = vld [vmem:[#allocation3 + $0x1f] ss:$2 sm:$0xf]  ;;  %v5039_v44 = vpop.f32.mrf.mxu1 }
 0x273   : > { %2637 = vst [vmem:[#allocation4 + $0x4] sm:$0x6] %v2635_v38  ;;  %v2647_v63 = vmax.f32 %v2644_v24, %v2646_v45  ;;  %2611 = vst [vmem:[#allocation3 + $0x30] sm:$0xff] %v2601_v26  ;;  %v2592_v41 = vadd.f32 %v6863_v37, %v2575_v32  ;;  %v5040_v48 = vadd.f32 %v5039_v44, %v5038_v49 }
 0x274   : > { %v2562_v18 = vadd.f32 %v2561_v60, %v2489_v39 }
 0x275   : > { %v2648_v10 = vmax.f32 %v2642_v13, %v2647_v63  ;;  %v2602_v43 = vmax.f32 %v2592_v41, 0.0  ;;  %v2492_v55 = vadd.f32 %v5040_v48, %v6744_v28 }
 0x276   : > { %v2576_v46 = vadd.f32 %v2562_v18, %v2161_v62  ;;  %v2657_v29 = vld [vmem:[#allocation3 + $0x28] ss:$2 sm:$0xf]  ;;  %v2659_v60 = vld [vmem:[#allocation3 + $0x29] ss:$2 sm:$0xf] }
 0x277   : > { %v4857_v15 = vpack.c.bf16 %v2648_v10, %v2648_v10  ;;  %2612 = vst [vmem:[#allocation3 + $0x38] sm:$0xff] %v2602_v43  ;;  %v2565_v12 = vadd.f32 %v2564_v27, %v2492_v55  ;;  %v2660_v56 = vmax.f32 %v2657_v29, %v2659_v60 }
 0x278   : > { %v2593_v8 = vadd.f32 %v6863_v37, %v2576_v46 }
 0x279   : > { %v2653_v3 = vrot.slane %v4857_v15, 7  ;;  %v2577_v21 = vadd.f32 %v2565_v12, %v2164_v6 }
 0x27a   : > { %v2603_v16 = vmax.f32 %v2593_v8, 0.0  ;;  %v2693_v31 = vld [vmem:[#allocation4 + $0x4] sm:$0xf]  ;;  %v2704_v8 = vld [vmem:[#allocation4 + $0x14] sm:$0x7] }
 0x27b   : > { %2655 = vst [vmem:[#allocation4 + $0x8] sm:$0x6] %v2653_v3  ;;  %v2594_v57 = vadd.f32 %v6863_v37, %v2577_v21  ;;  %v4671_v53 = vcombine.low %v2696_v59, %v2693_v31  ;;  %v4669_v36 = vcombine.low %v2692_v4, %v2693_v31  ;;  %v2699_v7 = vld [vmem:[#allocation4 + $0x4] sm:$0xe] }
 0x27c   : > { %2613 = vst [vmem:[#allocation3 + $0x40] sm:$0xff] %v2603_v16 }
 0x27d   : > { %v2604_v5 = vmax.f32 %v2594_v57, 0.0  ;;  %v2723_v2 = vshll.u32 %v4671_v53, 16  ;;  %v2962_v58 = vshll.u32 %v4669_v36, 16  ;;  %v2721_v26 = vshrl.u32 %v4671_v53, 16 }
 0x27e   : > { %v2662_v14 = vld [vmem:[#allocation3 + $0x32] ss:$2 sm:$0xf]  ;;  %v2664_v28 = vld [vmem:[#allocation3 + $0x33] ss:$2 sm:$0xf] }
 0x27f   : > { %v2665_v35 = vmax.f32 %v2662_v14, %v2664_v28  ;;  %2614 = vst [vmem:[#allocation3 + $0x48] sm:$0xff] %v2604_v5  ;;  %v2725_v51 = vrot.slane %v2723_v2, 1  ;;  %v2964_v32 = vrot.slane %v2962_v58, 1  ;;  %v2738_v44 = vrot.slane %v4671_v53, 1 }
 0x280   : > { %v2960_v63 = vshrl.u32 %v4669_v36, 16 }
 0x281   : > { %v2666_v9 = vmax.f32 %v2660_v56, %v2665_v35  ;;  %v2726_v13 = vor.u32 %v2725_v51, %v2721_v26 }
 0x282   : > { %v2694_v52 = vld [vmem:[#allocation4 + $0x8] sm:$0xf]  ;;  %v2965_v43 = vor.u32 %v2964_v32, %v2960_v63 }
 0x283   : > { %v4858_v50 = vpack.c.bf16 %v2666_v9, %v2666_v9  ;;  %v2675_v11 = vld [vmem:[#allocation3 + $0x3c] ss:$2 sm:$0xf]  ;;  %v2677_v25 = vld [vmem:[#allocation3 + $0x3d] ss:$2 sm:$0xf]  ;;  %v4673_v23 = vcombine.low %v2693_v31, %v2694_v52  ;;  %v6916_v39 = vcombine.low %v2699_v7, %v2694_v52 }
 0x284   : > { %v2678_v30 = vmax.f32 %v2675_v11, %v2677_v25  ;;  %v2705_v34 = vld [vmem:[#allocation4 + $0x8] sm:$0xe] }
 0x285   : > { %v2671_v22 = vrot.slane %v4858_v50, 7  ;;  %v2994_v40 = vshll.u32 %v4673_v23, 16  ;;  %v2992_v15 = vshrl.u32 %v4673_v23, 16  ;;  %v2766_v12 = vrot.slane %v6916_v39, 1  ;;  %v5504_v32 = vld [vmem:[%s7355_s5 + $0x364] ss:$8 sps:$4 sm:$0xff]  }
 0x286   : > { %v2680_v37 = vld [vmem:[#allocation3 + $0x46] ss:$2 sm:$0xf]  ;;  %v2682_v19 = vld [vmem:[#allocation3 + $0x47] ss:$2 sm:$0xf] }
 0x287   : > { %2673 = vst [vmem:[#allocation4 + $0xc] sm:$0x6] %v2671_v22  ;;  %v2683_v27 = vmax.f32 %v2680_v37, %v2682_v19  ;;  %v2996_v41 = vrot.slane %v2994_v40, 1  ;;  %v2706_v40 = vld [vmem:[#allocation4 + $0x14] sm:$0xf] }
 0x289   : > { %v2684_v1 = vmax.f32 %v2678_v30, %v2683_v27  ;;  %v2997_v14 = vor.u32 %v2996_v41, %v2992_v15  ;;  %v5488_v30 = vld [vmem:[%s7355_s5 + $0x270] ss:$8 sps:$4 sm:$0xff]   ;;  %v5507_v41 = vld [vmem:[%s7355_s5 + $0x254] ss:$8 sps:$4 sm:$0xff]  }
 0x28b   : > { %v4859_v47 = vpack.c.bf16 %v2684_v1, %v2684_v1 }
 0x28d   : > { %v2689_v0 = vrot.slane %v4859_v47, 7  ;;  %v5501_v47 = vld [vmem:[%s7355_s5 + $0x264] ss:$8 sps:$4 sm:$0xff]  }
 0x28e   : > { %v2695_v61 = vld [vmem:[#allocation4 + $0xc] sm:$0x7] }
 0x28f   : > { %v2697_v42 = vld [vmem:[#allocation4 + $0xc] sm:$0xf]  ;;  %v4670_v33 = vcombine.low %v2694_v52, %v2695_v61  ;;  %2691 = vst [vmem:[#allocation4 + $0x10] sm:$0x6] %v2689_v0 }
 0x290   : > { %v6909_v54 = vld [vmem:[#allocation4 + $0xc] sm:$0xf]  ;;  %v4672_v49 = vcombine.low %v2694_v52, %v2697_v42 }
 0x291   : > { %v6912_v38 = vcombine.low %v2705_v34, %v6909_v54  ;;  %v2728_v24 = vshll.u32 %v4670_v33, 16  ;;  %v2732_v62 = vshrl.u32 %v4670_v33, 16  ;;  %v5496_v61 = vld [vmem:[%s7355_s5 + $0x370] ss:$8 sps:$4 sm:$0xff]  }
 0x292   : > { %v6914_v45 = vrot.slane %v4672_v49, 1 }
 0x293   : > { %v2730_v48 = vrot.slane %v2728_v24, 1  ;;  %v2785_v10 = vshll.u32 %v6912_v38, 16  ;;  %v2783_v52 = vshrl.u32 %v6912_v38, 16  ;;  %v5499_v24 = vld [vmem:[%s7355_s5 + $0x260] ss:$8 sps:$4 sm:$0xff]  }
 0x294   : > { %v2740_v18 = vsel %vm943_vm2, %v2738_v44, %v6914_v45  ;;  %v2987_v29 = vshll.u32 %v6914_v45, 16 }
 0x295   : > { %v2982_v55 = vshll.u32 %v2740_v18, 16  ;;  %v2731_v46 = vsel %vm893_vm3, %v2726_v13, %v2730_v48  ;;  %v6922_v6 = vor.u32 %v2732_v62, %v2730_v48  ;;  %v2980_v16 = vshrl.u32 %v2740_v18, 16 }
 0x296   : > { %v2970_v3 = vshll.u32 %v2731_v46, 16  ;;  %v2698_v21 = vld [vmem:[#allocation4 + $0x10] sm:$0x7]  ;;  %v2787_v35 = vrot.slane %v2785_v10, 1  ;;  %v2968_v9 = vshrl.u32 %v2731_v46, 16  ;;  %v2966_v25 = vsel %vm893_vm3, %v2965_v43, %v2730_v48 }
 0x297   : > { %v2984_v57 = vrot.slane %v2982_v55, 1  ;;  %v2975_v60 = vshll.u32 %v6922_v6, 16  ;;  %v4674_v5 = vcombine.low %v2697_v42, %v2698_v21  ;;  %v2700_v28 = vld [vmem:[#allocation4 + $0x10] sm:$0xf]  ;;  %v3055_v36 = vshrl.u32 %v6922_v6, 16 }
 0x298   : > { %v2703_v56 = vld [vmem:[#allocation4 + $0x10] sm:$0xf]  ;;  %v2972_v31 = vrot.slane %v2970_v3, 1  ;;  %v4676_v59 = vcombine.low %v2697_v42, %v2700_v28  ;;  %v2989_v1 = vrot.slane %v2987_v29, 1  ;;  %v2788_v51 = vor.u32 %v2787_v35, %v2783_v52  ;;  %v5502_v43 = vld [vmem:[%s7355_s5 + $0x360] ss:$8 sps:$4 sm:$0xff]  }
 0x299   : > { %v4678_v50 = vcombine.low %v2703_v56, %v2704_v8  ;;  %v2977_v11 = vrot.slane %v2975_v60, 1  ;;  %v2756_v22 = vshll.u32 %v4674_v5, 16  ;;  %v2985_v4 = vor.u32 %v2984_v57, %v2980_v16  ;;  %v5510_v46 = vld [vmem:[%s7355_s5 + $0x354] ss:$8 sps:$4 sm:$0xff]   ;;  %v5505_v3 = vld [vmem:[%s7355_s5 + $0x250] ss:$8 sps:$4 sm:$0xff]  }
 0x29a   : > { %v2973_v53 = vor.u32 %v2972_v31, %v2968_v9  ;;  %v6929_v37 = vrot.slane %v4676_v59, 1  ;;  %v2760_v2 = vshrl.u32 %v4674_v5, 16  ;;  %v4680_v63 = vcombine.low %v2703_v56, %v2706_v40  ;;  %v5508_v28 = vld [vmem:[%s7355_s5 + $0x350] ss:$8 sps:$4 sm:$0xff]   ;;  %v5519_v35 = vld [vmem:[%s7355_s5 + $0x344] ss:$8 sps:$4 sm:$0xff]  }
 0x29b   : > { %v2790_v19 = vshll.u32 %v4678_v50, 16  ;;  %v6934_v27 = vrot.slane %v2756_v22, 1  ;;  %v3057_v42 = vor.u32 %v3055_v36, %v2977_v11  ;;  %v2794_v49 = vshrl.u32 %v4678_v50, 16  ;;  %v5514_v59 = vld [vmem:[%s7355_s5 + $0x240] ss:$8 sps:$4 sm:$0xff]  }
 0x29c   : > { %v2978_v23 = vsel %vm893_vm3, %v2973_v53, %v2977_v11  ;;  %v2768_v58 = vsel %vm943_vm2, %v2766_v12, %v6929_v37  ;;  %v2990_v26 = vsel %vm893_vm3, %v2985_v4, %v2989_v1  ;;  %v3019_v18 = vshll.u32 %v6929_v37, 16  ;;  %v5522_v50 = vld [vmem:[%s7355_s5 + $0x234] ss:$8 sps:$4 sm:$0xff]   ;;  %v5517_v22 = vld [vmem:[%s7355_s5 + $0x340] ss:$8 sps:$4 sm:$0xff]  }
 0x29d   : > { %v6943_v0 = vrot.slane %v2790_v19, 1  ;;  %3843 = vmatprep.mubr.bf16.mxu1 %v2978_v23  ;;  %v2998_v34 = vsel %vm893_vm3, %v2997_v14, %v6934_v27  ;;  %v6951_v33 = vor.u32 %v2760_v2, %v6934_v27  ;;  %v3014_v7 = vshll.u32 %v2768_v58, 16  ;;  %v5516_v14 = vld [vmem:[%s7355_s5 + $0x244] ss:$8 sps:$4 sm:$0xff]   ;;  %v5525_v52 = vld [vmem:[%s7355_s5 + $0x334] ss:$8 sps:$4 sm:$0xff]  }
 0x29e   : > { %3844 = vmatmul.mubr.bf16.vlgmr.msra.gmra.mxu1 %v2966_v25  ;;  %3896 = vmatprep.mubr.bf16.mxu0 %v2998_v34  ;;  %v3012_v48 = vshrl.u32 %v2768_v58, 16  ;;  %v2800_v21 = vrot.slane %v6912_v38, 1  ;;  %v6981_v16 = vrot.slane %v4680_v63, 1  ;;  %v3058_v57 = vshrl.u32 %v6914_v45, 16  ;;  %v5520_v19 = vld [vmem:[%s7355_s5 + $0x230] ss:$8 sps:$4 sm:$0xff]  }
 0x29f   : > { %3918 = vmatpush1.bf16.msra.mxu1 %v5488_v30  ;;  %3853 = vmatprep.mubr.bf16.mxu1 %v3057_v42  ;;  %v2793_v44 = vsel %vm893_vm3, %v2788_v51, %v6943_v0  ;;  %v6963_v13 = vor.u32 %v2794_v49, %v6943_v0  ;;  %v3016_v62 = vrot.slane %v3014_v7, 1  ;;  %v6984_v29 = vrot.slane %v3019_v18, 1  ;;  %v5528_v30 = vld [vmem:[%s7355_s5 + $0x224] ss:$8 sps:$4 sm:$0xff]   ;;  %v5526_v23 = vld [vmem:[%s7355_s5 + $0x220] ss:$8 sps:$4 sm:$0xff]  }
 0x2a0   : > { %3897 = vmatmul.mubr.bf16.vlgmr.msra.gmra.mxu0 %v2990_v26  ;;  %3919 = vmatprep.subr.bf16.mxu1 %v5501_v47  ;;  %v3034_v10 = vshll.u32 %v2793_v44, 16  ;;  %v3032_v12 = vshrl.u32 %v2793_v44, 16  ;;  %v2802_v38 = vsel %vm943_vm2, %v2800_v21, %v6981_v16  ;;  %v3060_v45 = vor.u32 %v3058_v57, %v2989_v1  ;;  %v5523_v1 = vld [vmem:[%s7355_s5 + $0x330] ss:$8 sps:$4 sm:$0xff]   ;;  %v5531_v2 = vld [vmem:[%s7355_s5 + $0x324] ss:$8 sps:$4 sm:$0xff]  }
 0x2a1   : > { %3971 = vmatpush1.bf16.msra.mxu0 %v5496_v61  ;;  %3906 = vmatprep.mubr.bf16.mxu0 %v6951_v33  ;;  %v3039_v55 = vshll.u32 %v6963_v13, 16  ;;  %v3017_v15 = vor.u32 %v3016_v62, %v3012_v48  ;;  %v3046_v9 = vshll.u32 %v2802_v38, 16  ;;  %v3051_v31 = vshll.u32 %v6981_v16, 16  ;;  %v5534_v47 = vld [vmem:[%s7355_s5 + $0x214] ss:$8 sps:$4 sm:$0xff]  }
 0x2a2   : > { %3972 = vmatprep.subr.bf16.mxu0 %v5504_v32  ;;  %v3036_v8 = vrot.slane %v3034_v10, 1  ;;  %v3044_v11 = vshrl.u32 %v2802_v38, 16  ;;  %v5529_v58 = vld [vmem:[%s7355_s5 + $0x320] ss:$8 sps:$4 sm:$0xff]   ;;  %v5537_v51 = vld [vmem:[%s7355_s5 + $0x314] ss:$8 sps:$4 sm:$0xff]  }
 0x2a3   : > { %3920 = vmatpush1.bf16.msra.mxu1 %v5499_v24  ;;  %v6986_v5 = vrot.slane %v3039_v55, 1  ;;  %v3022_v56 = vsel %vm893_vm3, %v3017_v15, %v6984_v29  ;;  %v3048_v25 = vrot.slane %v3046_v9, 1  ;;  %v7017_v4 = vrot.slane %v3051_v31, 1  ;;  %v5532_v40 = vld [vmem:[%s7355_s5 + $0x210] ss:$8 sps:$4 sm:$0xff]  }
 0x2a4   : > { %3921 = vmatprep.subr.bf16.mxu1 %v5507_v41  ;;  %v3037_v60 = vor.u32 %v3036_v8, %v3032_v12  ;;  %v5540_v34 = vld [vmem:[%s7355_s5 + $0x204] ss:$8 sps:$4 sm:$0xff]   ;;  %v5535_v61 = vld [vmem:[%s7355_s5 + $0x310] ss:$8 sps:$4 sm:$0xff]   ;;  %v5538_v49 = vld [vmem:[%s7355_s5 + $0x200] ss:$8 sps:$4 sm:$0xff]  }
 0x2a5   : > { %3973 = vmatpush1.bf16.msra.mxu0 %v5502_v43  ;;  %v3049_v53 = vor.u32 %v3048_v25, %v3044_v11  ;;  %v5543_v42 = vld [vmem:[%s7355_s5 + $0x304] ss:$8 sps:$4 sm:$0xff]   ;;  %v5546_v26 = vld [vmem:[%s7355_s5 + $0x2f4] ss:$8 sps:$4 sm:$0xff]   ;;  %v5541_v32 = vld [vmem:[%s7355_s5 + $0x300] ss:$8 sps:$4 sm:$0xff]  }
 0x2a6   : > { %3854 = vmatmul.mubr.bf16.gmra.mxu1 %v6922_v6  ;;  %3974 = vmatprep.subr.bf16.mxu0 %v5510_v46  ;;  %v3042_v6 = vsel %vm893_vm3, %v3037_v60, %v6986_v5  ;;  %v5549_v7 = vld [vmem:[%s7355_s5 + $0x3f4] ss:$8 sps:$4 sm:$0xff]   ;;  %v5544_v24 = vld [vmem:[%s7355_s5 + $0x2f0] ss:$8 sps:$4 sm:$0xff]   ;;  %v5552_v44 = vld [vmem:[%s7355_s5 + $0x2e4] ss:$8 sps:$4 sm:$0xff]  }
 0x2a7   : > { %3922 = vmatpush1.bf16.msra.mxu1 %v5505_v3  ;;  %3949 = vmatprep.mubr.bf16.mxu1 %v3022_v56  ;;  %v7027_v36 = vsel %vm893_vm3, %v3049_v53, %v7017_v4  ;;  %v5547_v63 = vld [vmem:[%s7355_s5 + $0x3f0] ss:$8 sps:$4 sm:$0xff]   ;;  %v5555_v41 = vld [vmem:[%s7355_s5 + $0x3e4] ss:$8 sps:$4 sm:$0xff]   ;;  %v5550_v48 = vld [vmem:[%s7355_s5 + $0x2e0] ss:$8 sps:$4 sm:$0xff]  }
 0x2a8   : > { %3907 = vmatmul.mubr.bf16.gmra.mxu0 %v3060_v45  ;;  %3923 = vmatprep.subr.bf16.mxu1 %v5516_v14  ;;  %v5558_v62 = vld [vmem:[%s7355_s5 + $0x2d4] ss:$8 sps:$4 sm:$0xff]   ;;  %v5553_v18 = vld [vmem:[%s7355_s5 + $0x3e0] ss:$8 sps:$4 sm:$0xff]   ;;  %v5556_v43 = vld [vmem:[%s7355_s5 + $0x2d0] ss:$8 sps:$4 sm:$0xff]  }
 0x2a9   : > { %3975 = vmatpush1.bf16.msra.mxu0 %v5508_v28  ;;  %4002 = vmatprep.mubr.bf16.mxu0 %v3042_v6  ;;  %v5561_v10 = vld [vmem:[%s7355_s5 + $0x3d4] ss:$8 sps:$4 sm:$0xff]   ;;  %v2751_v55 = vshll.u32 %v6916_v39, 16  ;;  %v5564_v46 = vld [vmem:[%s7355_s5 + $0x2c4] ss:$8 sps:$4 sm:$0xff]   ;;  %v2749_v60 = vshrl.u32 %v6916_v39, 16 }
 0x2aa   : > { %3976 = vmatprep.subr.bf16.mxu0 %v5519_v35  ;;  %v5559_v15 = vld [vmem:[%s7355_s5 + $0x3d0] ss:$8 sps:$4 sm:$0xff]   ;;  %v5567_v12 = vld [vmem:[%s7355_s5 + $0x3c4] ss:$8 sps:$4 sm:$0xff]   ;;  %v5562_v8 = vld [vmem:[%s7355_s5 + $0x2c0] ss:$8 sps:$4 sm:$0xff]  }
 0x2ab   : > { %3924 = vmatpush1.bf16.msra.mxu1 %v5514_v59  ;;  %v2753_v3 = vrot.slane %v2751_v55, 1  ;;  %v5570_v21 = vld [vmem:[%s7355_s5 + $0x2b4] ss:$8 sps:$4 sm:$0xff]   ;;  %v5565_v57 = vld [vmem:[%s7355_s5 + $0x3c0] ss:$8 sps:$4 sm:$0xff]  }
 0x2ac   : > { %3925 = vmatprep.subr.bf16.mxu1 %v5522_v50  ;;  %v5573_v14 = vld [vmem:[%s7355_s5 + $0x3b4] ss:$8 sps:$4 sm:$0xff]   ;;  %v5568_v28 = vld [vmem:[%s7355_s5 + $0x2b0] ss:$8 sps:$4 sm:$0xff]   ;;  %v5576_v45 = vld [vmem:[%s7355_s5 + $0x2a4] ss:$8 sps:$4 sm:$0xff]  }
 0x2ad   : > { %3977 = vmatpush1.bf16.msra.mxu0 %v5517_v22  ;;  %v2754_v38 = vor.u32 %v2753_v3, %v2749_v60  ;;  %v5571_v39 = vld [vmem:[%s7355_s5 + $0x3b0] ss:$8 sps:$4 sm:$0xff]   ;;  %v5579_v35 = vld [vmem:[%s7355_s5 + $0x3a4] ss:$8 sps:$4 sm:$0xff]   ;;  %v5574_v9 = vld [vmem:[%s7355_s5 + $0x2a0] ss:$8 sps:$4 sm:$0xff]  }
 0x2ae   : > { %3978 = vmatprep.subr.bf16.mxu0 %v5525_v52  ;;  %v5582_v31 = vld [vmem:[%s7355_s5 + $0x294] ss:$8 sps:$4 sm:$0xff]   ;;  %v2701_v59 = vld [vmem:[#allocation4 + $0x8] sm:$0xf]  ;;  %v5580_v25 = vld [vmem:[%s7355_s5 + $0x290] ss:$8 sps:$4 sm:$0xff]  }
 0x2af   : > { %3926 = vmatpush1.bf16.msra.mxu1 %v5520_v19  ;;  %v2759_v56 = vsel %vm893_vm3, %v2754_v38, %v6934_v27  ;;  %v5577_v27 = vld [vmem:[%s7355_s5 + $0x3a0] ss:$8 sps:$4 sm:$0xff]   ;;  %v4677_v50 = vcombine.low %v2701_v59, %v6909_v54  ;;  %v5585_v11 = vld [vmem:[%s7355_s5 + $0x394] ss:$8 sps:$4 sm:$0xff]   ;;  %v5588_v22 = vld [vmem:[%s7355_s5 + $0x284] ss:$8 sps:$4 sm:$0xff]  }
 0x2b0   : > { %3927 = vmatprep.subr.bf16.mxu1 %v5528_v30  ;;  %v3002_v6 = vshll.u32 %v2759_v56, 16  ;;  %v3007_v52 = vshll.u32 %v6951_v33, 16  ;;  %v5583_v54 = vld [vmem:[%s7355_s5 + $0x390] ss:$8 sps:$4 sm:$0xff]   ;;  %v5591_v30 = vld [vmem:[%s7355_s5 + $0x384] ss:$8 sps:$4 sm:$0xff]  }
 0x2b1   : > { %3979 = vmatpush1.bf16.msra.mxu0 %v5523_v1  ;;  %v3026_v19 = vshll.u32 %v4677_v50, 16  ;;  %v3000_v1 = vshrl.u32 %v2759_v56, 16  ;;  %v5611_v55 = vld [vmem:[%s7355_s5 + $0x410] ss:$8 sps:$4 sm:$0xff]   ;;  %v5633_v59 = vld [vmem:[%s7357_s7] sm:$0xff]  }
 0x2b2   : > { %3980 = vmatprep.subr.bf16.mxu0 %v5531_v2  ;;  %v3004_v53 = vrot.slane %v3002_v6, 1  ;;  %v5586_v2 = vld [vmem:[%s7355_s5 + $0x280] ss:$8 sps:$4 sm:$0xff]   ;;  %v5618_v3 = vld [vmem:[%s7357_s7 + $0x78] sm:$0xff]   ;;  %v5635_v38 = vld [vmem:[%s7359_s9 + $0x10] sm:$0xff]  }
 0x2b3   : > { %3928 = vmatpush1.bf16.msra.mxu1 %v5526_v23  ;;  %v5594_v23 = vld [vmem:[%s7355_s5 + $0x474] ss:$8 sps:$4 sm:$0xff]  }
 0x2b4   : > { %3929 = vmatprep.subr.bf16.mxu1 %v5534_v47  ;;  %v3009_v47 = vrot.slane %v3007_v52, 1  ;;  %v5634_v60 = vld [vmem:[%s7359_s9 + $0x18] sm:$0xff]   ;;  %v5629_v56 = vld [vmem:[%s7357_s7 + $0x10] sm:$0xff]  }
 0x2b5   : > { %3981 = vmatpush1.bf16.msra.mxu0 %v5529_v58  ;;  %v5589_v58 = vld [vmem:[%s7355_s5 + $0x380] ss:$8 sps:$4 sm:$0xff]  }
 0x2b6   : > { %3982 = vmatprep.subr.bf16.mxu0 %v5537_v51  ;;  %v3005_v51 = vor.u32 %v3004_v53, %v3000_v1 }
 0x2b7   : > { %3930 = vmatpush1.bf16.msra.mxu1 %v5532_v40  ;;  %v3028_v40 = vrot.slane %v3026_v19, 1 }
 0x2b8   : > { %3931 = vmatprep.subr.bf16.mxu1 %v5540_v34  ;;  %v5592_v34 = vld [vmem:[%s7355_s5 + $0x470] ss:$8 sps:$4 sm:$0xff]  }
 0x2b9   : > { %3983 = vmatpush1.bf16.msra.mxu0 %v5535_v61  ;;  %v3064_v61 = vshrl.u32 %v6929_v37, 16 }
 0x2ba   : > { %3984 = vmatprep.subr.bf16.mxu0 %v5543_v42  ;;  %v3024_v42 = vshrl.u32 %v4677_v50, 16 }
 0x2bb   : > { %3932 = vmatpush1.bf16.msra.mxu1 %v5538_v49  ;;  %v5598_v49 = vld [vmem:[%s7355_s5 + $0x464] ss:$8 sps:$4 sm:$0xff]  }
 0x2bc   : > { %3933 = vmatprep.subr.bf16.mxu1 %v5546_v26  ;;  %v3010_v26 = vsel %vm893_vm3, %v3005_v51, %v3009_v47 }
 0x2bd   : > { %3985 = vmatpush1.bf16.msra.mxu0 %v5541_v32  ;;  %v3066_v32 = vor.u32 %v3064_v61, %v6984_v29  ;;  %v5601_v29 = vld [vmem:[%s7355_s5 + $0x454] ss:$8 sps:$4 sm:$0xff]  }
 0x2be   : > { %3986 = vmatprep.subr.bf16.mxu0 %v5549_v7  ;;  %v3029_v7 = vor.u32 %v3028_v40, %v3024_v42 }
 0x2bf   : > { %3934 = vmatpush2.bf16.msra.mxu1 %v5544_v24  ;;  %v3067_v24 = vshrl.u32 %v6963_v13, 16 }
 0x2c0   : > { %3935 = vmatprep.subr.bf16.mxu1 %v5552_v44  ;;  %v3030_v37 = vsel %vm893_vm3, %v3029_v7, %v6943_v0  ;;  %v5599_v0 = vld [vmem:[%s7355_s5 + $0x450] ss:$8 sps:$4 sm:$0xff]  }
 0x2c1   : > { %3987 = vmatpush2.bf16.msra.mxu0 %v5547_v63  ;;  %v3069_v44 = vor.u32 %v3067_v24, %v6986_v5  ;;  %v5596_v63 = vld [vmem:[%s7355_s5 + $0x460] ss:$8 sps:$4 sm:$0xff]   ;;  %v5604_v5 = vld [vmem:[%s7355_s5 + $0x444] ss:$8 sps:$4 sm:$0xff]  }
 0x2c2   : > { %3988 = vmatprep.subr.bf16.mxu0 %v5555_v41  ;;  %v3061_v41 = vshrl.u32 %v6951_v33, 16  ;;  %v5607_v33 = vld [vmem:[%s7355_s5 + $0x434] ss:$8 sps:$4 sm:$0xff]  }
 0x2c3   : > { %3936 = vmatpush2.bf16.msra.mxu1 %v5550_v48 }
 0x2c4   : > { %3937 = vmatprep.subr.bf16.mxu1 %v5558_v62  ;;  %v3063_v48 = vor.u32 %v3061_v41, %v3009_v47  ;;  %v5602_v62 = vld [vmem:[%s7355_s5 + $0x440] ss:$8 sps:$4 sm:$0xff]  }
 0x2c5   : > { %3989 = vmatpush2.bf16.msra.mxu0 %v5553_v18  ;;  %v5605_v18 = vld [vmem:[%s7355_s5 + $0x430] ss:$8 sps:$4 sm:$0xff]  }
 0x2c6   : > { %3990 = vmatprep.subr.bf16.mxu0 %v5561_v10  ;;  %v5610_v10 = vld [vmem:[%s7355_s5 + $0x424] ss:$8 sps:$4 sm:$0xff]  }
 0x2c7   : > { %3938 = vmatpush2.bf16.msra.mxu1 %v5556_v43  ;;  %v5613_v43 = vld [vmem:[%s7355_s5 + $0x414] ss:$8 sps:$4 sm:$0xff]  }
 0x2c8   : > { %3939 = vmatprep.subr.bf16.mxu1 %v5564_v46  ;;  %v5616_v46 = vld [vmem:[%s7355_s5 + $0x404] ss:$8 sps:$4 sm:$0xff]  }
 0x2c9   : > { %3991 = vmatpush2.bf16.msra.mxu0 %v5559_v15  ;;  %v5614_v15 = vld [vmem:[%s7355_s5 + $0x400] ss:$8 sps:$4 sm:$0xff]  }
 0x2ca   : > { %3992 = vmatprep.subr.bf16.mxu0 %v5567_v12  ;;  %v3070_v12 = vshrl.u32 %v6981_v16, 16  ;;  %v5622_v16 = vld [vmem:[%s7357_s7 + $0x68] sm:$0xff]  }
 0x2cb   : > { %3940 = vmatpush2.bf16.msra.mxu1 %v5562_v8 }
 0x2cc   : > { %3941 = vmatprep.subr.bf16.mxu1 %v5570_v21  ;;  %v3072_v8 = vor.u32 %v3070_v12, %v7017_v4  ;;  %v5619_v21 = vld [vmem:[%s7357_s7 + $0x38] sm:$0xff]   ;;  %v5623_v4 = vld [vmem:[%s7357_s7 + $0x28] sm:$0xff]  }
 0x2cd   : > { %3993 = vmatpush2.bf16.msra.mxu0 %v5565_v57  ;;  %v5624_v57 = vld [vmem:[%s7357_s7 + $0x60] sm:$0xff]  }
 0x2ce   : > { %3994 = vmatprep.subr.bf16.mxu0 %v5573_v14  ;;  %v5625_v14 = vld [vmem:[%s7357_s7 + $0x20] sm:$0xff]  }
 0x2cf   : > { %3942 = vmatpush2.bf16.msra.mxu1 %v5568_v28  ;;  %v5626_v28 = vld [vmem:[%s7357_s7 + $0x58] sm:$0xff]  }
 0x2d0   : > { %3943 = vmatprep.subr.bf16.mxu1 %v5576_v45  ;;  %v5627_v45 = vld [vmem:[%s7357_s7 + $0x18] sm:$0xff]  }
 0x2d1   : > { %3995 = vmatpush2.bf16.msra.mxu0 %v5571_v39  ;;  %v5628_v39 = vld [vmem:[%s7357_s7 + $0x50] sm:$0xff]  }
 0x2d2   : > { %3996 = vmatprep.subr.bf16.mxu0 %v5579_v35  ;;  %v5630_v35 = vld [vmem:[%s7357_s7 + $0x48] sm:$0xff]  }
 0x2d3   : > { %3944 = vmatpush2.bf16.msra.mxu1 %v5574_v9  ;;  %v5631_v9 = vld [vmem:[%s7357_s7 + $0x8] sm:$0xff]  }
 0x2d4   : > { %3945 = vmatprep.subr.bf16.mxu1 %v5582_v31  ;;  %v5632_v31 = vld [vmem:[%s7357_s7 + $0x40] sm:$0xff]  }
 0x2d5   : > { %3997 = vmatpush2.bf16.msra.mxu0 %v5577_v27 }
 0x2d6   : > { %3998 = vmatprep.subr.bf16.mxu0 %v5585_v11 }
 0x2d7   : > { %3946 = vmatpush2.bf16.msra.mxu1 %v5580_v25 }
 0x2d8   : > { %3947 = vmatprep.subr.bf16.mxu1 %v5588_v22 }
 0x2d9   : > { %3999 = vmatpush2.bf16.msra.mxu0 %v5583_v54 }
 0x2da   : > { %4000 = vmatprep.subr.bf16.mxu0 %v5591_v30 }
 0x2db   : > { %3948 = vmatpush2.bf16.msra.mxu1 %v5586_v2 }
 0x2dc   : > { %4023 = vmatprep.subr.bf16.mxu1 %v5594_v23 }
 0x2dd   : > { %4001 = vmatpush2.bf16.msra.mxu0 %v5589_v58 }
 0x2de   : > { %3950 = vmatmul.mubr.bf16.vlgmr.msra.gmra.mxu1 %v3010_v26  ;;  %5223 = vmatprep.subr.bf16.mxu0 %v5701_v17 }
 0x2df   : > { %3959 = vmatprep.mubr.bf16.mxu1 %v3066_v32  ;;  %4024 = vmatpush1.bf16.msra.mxu1 %v5592_v34  ;;  %v2949_v34 = vlaneseq }
 0x2e0   : > { %4003 = vmatmul.mubr.bf16.vlgmr.msra.gmra.mxu0 %v3030_v37  ;;  %4025 = vmatprep.subr.bf16.mxu1 %v5598_v49  ;;  %v2947_v37 = vld [vmem:[%s7356_s6] sm:$0x3] }
 0x2e1   : > { %4012 = vmatprep.mubr.bf16.mxu0 %v3069_v44  ;;  %5224 = vmatpush3.bf16.msra.mxu0 %v5634_v60  ;;  %v2950_v26 = vshrl.u32 %v2949_v34, 7 }
 0x2e2   : > { %5225 = vmatprep.subr.bf16.mxu0 %v5701_v17 }
 0x2e3   : > { %4026 = vmatpush1.bf16.msra.mxu1 %v5596_v63  ;;  %v2951_v24 = vsub.s32 0, %v2950_v26  ;;  %v2955_v44 = vsub.s32 1, %v2950_v26 }
 0x2e4   : > { %4027 = vmatprep.subr.bf16.mxu1 %v5601_v29 }
 0x2e5   : > { %5226 = vmatpush3.bf16.msra.mxu0 %v5635_v38  ;;  %v2952_v41 = vrot.slane %v2947_v37, %v2951_v24 }
 0x2e6   : > { %3960 = vmatmul.mubr.bf16.gmra.mxu1 %v3063_v48  ;;  %5227 = vmatprep.subr.bf16.mxu0 %v5701_v17 }
 0x2e7   : > { %4028 = vmatpush1.bf16.msra.mxu1 %v5599_v0  ;;  %4055 = vmatprep.mubr.bf16.mxu1 %v5702_v20  ;;  %v2956_v0 = vrot.slane %v2947_v37, %v2955_v44 }
 0x2e8   : > { %4013 = vmatmul.mubr.bf16.gmra.mxu0 %v6963_v13  ;;  %4029 = vmatprep.subr.bf16.mxu1 %v5604_v5  ;;  %v5608_v13 = vld [vmem:[%s7355_s5 + $0x420] ss:$8 sps:$4 sm:$0xff]  }
 0x2e9   : > { %5231 = vmatprep.mubr.msk.bf16.mxu0 %vm5703_vm1, %v5701_v17 }
 0x2eb   : > { %4030 = vmatpush1.bf16.msra.mxu1 %v5602_v62 }
 0x2ec   : > { %4031 = vmatprep.subr.bf16.mxu1 %v5607_v33 }
 0x2ef   : > { %4032 = vmatpush1.bf16.msra.mxu1 %v5605_v18 }
 0x2f0   : > { %4033 = vmatprep.subr.bf16.mxu1 %v5610_v10 }
 0x2f3   : > { %4034 = vmatpush1.bf16.msra.mxu1 %v5608_v13 }
 0x2f4   : > { %4035 = vmatprep.subr.bf16.mxu1 %v5613_v43 }
 0x2f7   : > { %4036 = vmatpush1.bf16.msra.mxu1 %v5611_v55 }
 0x2f8   : > { %4037 = vmatprep.subr.bf16.mxu1 %v5616_v46 }
 0x2fb   : > { %4038 = vmatpush1.bf16.msra.mxu1 %v5614_v15 }
 0x2fc   : > { %5054 = vmatprep.subr.bf16.mxu1 %v5618_v3 }
 0x2fe   : > { %4056 = vmatmul.mubr.bf16.vlgmr.msra.gmra.mxu1 %v7027_v36  ;;  %v5620_v36 = vld [vmem:[%s7357_s7 + $0x70] sm:$0xff]  }
 0x2ff   : > { %4065 = vmatprep.mubr.bf16.mxu1 %v5702_v20  ;;  %5055 = vmatpush3.bf16.msra.mxu1 %v5619_v21  ;;  %v5621_v20 = vld [vmem:[%s7357_s7 + $0x30] sm:$0xff]  }
 0x300   : > { %5056 = vmatprep.subr.bf16.mxu1 %v5620_v36 }
 0x303   : > { %5057 = vmatpush3.bf16.msra.mxu1 %v5621_v20 }
 0x304   : > { %5058 = vmatprep.subr.bf16.mxu1 %v5622_v16 }
 0x306   : > { %4066 = vmatmul.mubr.bf16.gmra.mxu1 %v3072_v8 }
 0x307   : > { %5059 = vmatpush3.bf16.msra.mxu1 %v5623_v4 }
 0x308   : > { %5060 = vmatprep.subr.bf16.mxu1 %v5624_v57 }
 0x30b   : > { %5061 = vmatpush3.bf16.msra.mxu1 %v5625_v14 }
 0x30c   : > { %5062 = vmatprep.subr.bf16.mxu1 %v5626_v28 }
 0x30f   : > { %5063 = vmatpush3.bf16.msra.mxu1 %v5627_v45 }
 0x310   : > { %5064 = vmatprep.subr.bf16.mxu1 %v5628_v39 }
 0x313   : > { %5065 = vmatpush3.bf16.msra.mxu1 %v5629_v56 }
 0x314   : > { %5066 = vmatprep.subr.bf16.mxu1 %v5630_v35 }
 0x317   : > { %5067 = vmatpush3.bf16.msra.mxu1 %v5631_v9 }
 0x318   : > { %5068 = vmatprep.subr.bf16.mxu1 %v5632_v31 }
 0x31b   : > { %5069 = vmatpush3.bf16.msra.mxu1 %v5633_v59 }
 0x35e   : > { %v3845_v6 = vpop.f32.mrf.mxu1 }
 0x35f   : > { %v3846_v33 = vadd.f32 %v3845_v6, %v2952_v41 }
 0x360   : > { %v3847_v27 = vpop.f32.mrf.mxu1  ;;  %v3898_v11 = vpop.f32.mrf.mxu0 }
 0x361   : > { %v3848_v10 = vadd.f32 %v3847_v27, %v2956_v0  ;;  %v3899_v15 = vadd.f32 %v3898_v11, %v3846_v33 }
 0x362   : > { %v3849_v50 = vpop.f32.mrf.mxu1  ;;  %v3900_v22 = vpop.f32.mrf.mxu0 }
 0x363   : > { %v3850_v48 = vadd.f32 %v3849_v50, %v2952_v41  ;;  %v3901_v20 = vadd.f32 %v3900_v22, %v3848_v10 }
 0x364   : > { %v3851_v25 = vpop.f32.mrf.mxu1  ;;  %v3902_v54 = vpop.f32.mrf.mxu0 }
 0x365   : > { %v3852_v18 = vadd.f32 %v3851_v25, %v2956_v0  ;;  %v3903_v13 = vadd.f32 %v3902_v54, %v3850_v48 }
 0x366   : > { %v3855_v52 = vpop.f32.mrf.mxu1  ;;  %v3904_v19 = vpop.f32.mrf.mxu0 }
 0x367   : > { %v3856_v43 = vadd.f32 %v3855_v52, %v2952_v41  ;;  %v3905_v12 = vadd.f32 %v3904_v19, %v3852_v18 }
 0x368   : > { %v3857_v53 = vpop.f32.mrf.mxu1  ;;  %v3908_v1 = vpop.f32.mrf.mxu0 }
 0x369   : > { %v3858_v8 = vadd.f32 %v3857_v53, %v2956_v0  ;;  %v3909_v16 = vadd.f32 %v3908_v1, %v3856_v43 }
 0x36a   : > { %v3859_v30 = vpop.f32.mrf.mxu1  ;;  %v3910_v47 = vpop.f32.mrf.mxu0 }
 0x36b   : > { %v3860_v21 = vadd.f32 %v3859_v30, %v2952_v41  ;;  %v3911_v38 = vadd.f32 %v3910_v47, %v3858_v8 }
 0x36c   : > { %v3861_v2 = vpop.f32.mrf.mxu1  ;;  %v3912_v51 = vpop.f32.mrf.mxu0 }
 0x36d   : > { %v3862_v14 = vadd.f32 %v3861_v2, %v2956_v0  ;;  %v3913_v35 = vadd.f32 %v3912_v51, %v3860_v21 }
 0x36e   : > { %v3914_v61 = vpop.f32.mrf.mxu0 }
 0x36f   : > { %v3915_v11 = vadd.f32 %v3914_v61, %v3862_v14 }
 0x39e   : > { %v3951_v23 = vpop.f32.mrf.mxu1 }
 0x39f   : > { %v3952_v4 = vadd.f32 %v3951_v23, %v3899_v15 }
 0x3a0   : > { %v3953_v58 = vpop.f32.mrf.mxu1  ;;  %v4004_v42 = vpop.f32.mrf.mxu0 }
 0x3a1   : > { %v3954_v45 = vadd.f32 %v3953_v58, %v3901_v20  ;;  %v4005_v31 = vadd.f32 %v4004_v42, %v3952_v4 }
 0x3a2   : > { %v3955_v40 = vpop.f32.mrf.mxu1  ;;  %v4006_v32 = vpop.f32.mrf.mxu0 }
 0x3a3   : > { %v3956_v3 = vadd.f32 %v3955_v40, %v3903_v13  ;;  %v4007_v52 = vadd.f32 %v4006_v32, %v3954_v45  ;;  %v5636_v45 = vld [vmem:[%s7359_s9 + $0x8] sm:$0xff]  }
 0x3a4   : > { %v3957_v49 = vpop.f32.mrf.mxu1  ;;  %v4008_v63 = vpop.f32.mrf.mxu0  ;;  %5228 = vmatpush3.bf16.msra.mxu0 %v5636_v45 }
 0x3a5   : > { %v3958_v57 = vadd.f32 %v3957_v49, %v3905_v12  ;;  %v4009_v39 = vadd.f32 %v4008_v63, %v3956_v3  ;;  %5229 = vmatprep.subr.bf16.mxu0 %v5701_v17  ;;  %v4288_v17 = vld [vmem:[%s7360_s10] sm:$0x1] }
 0x3a6   : > { %v3961_v7 = vpop.f32.mrf.mxu1  ;;  %v4010_v5 = vpop.f32.mrf.mxu0 }
 0x3a7   : > { %v3962_v56 = vadd.f32 %v3961_v7, %v3909_v16  ;;  %v4011_v59 = vadd.f32 %v4010_v5, %v3958_v57 }
 0x3a8   : > { %v3963_v29 = vpop.f32.mrf.mxu1  ;;  %v4014_v55 = vpop.f32.mrf.mxu0 }
 0x3a9   : > { %v3964_v6 = vadd.f32 %v3963_v29, %v3911_v38  ;;  %v4015_v54 = vadd.f32 %v4014_v55, %v3962_v56 }
 0x3aa   : > { %v3965_v62 = vpop.f32.mrf.mxu1  ;;  %v4016_v60 = vpop.f32.mrf.mxu0 }
 0x3ab   : > { %v3966_v25 = vadd.f32 %v3965_v62, %v3913_v35  ;;  %v4017_v2 = vadd.f32 %v4016_v60, %v3964_v6  ;;  %v4141_v35 = vld [vmem:[%s7358_s8] sm:$0x1] }
 0x3ac   : > { %v3967_v46 = vpop.f32.mrf.mxu1  ;;  %v4018_v27 = vpop.f32.mrf.mxu0 }
 0x3ad   : > { %v3968_v30 = vadd.f32 %v3967_v46, %v3915_v11  ;;  %v4019_v40 = vadd.f32 %v4018_v27, %v3966_v25 }
 0x3ae   : > { %v4020_v23 = vpop.f32.mrf.mxu0 }
 0x3af   : > { %v4021_v61 = vadd.f32 %v4020_v23, %v3968_v30 }
 0x3be   : > { %v4057_v36 = vpop.f32.mrf.mxu1 }
 0x3bf   : > { %v4058_v53 = vadd.f32 %v4057_v36, %v4005_v31 }
 0x3c0   : > { %v4059_v28 = vpop.f32.mrf.mxu1 }
 0x3c1   : > { %v4060_v47 = vadd.f32 %v4059_v28, %v4007_v52  ;;  %v4076_v42 = vmax.f32 %v4058_v53, 0.0 }
 0x3c2   : > { %v4061_v9 = vpop.f32.mrf.mxu1 }
 0x3c3   : > { %v4062_v50 = vadd.f32 %v4061_v9, %v4009_v39  ;;  %v4077_v37 = vmax.f32 %v4060_v47, 0.0  ;;  %v5637_v39 = vld [vmem:[%s7359_s9] sm:$0xff]  }
 0x3c4   : > { %v4063_v22 = vpop.f32.mrf.mxu1  ;;  %5230 = vmatpush3.bf16.msra.mxu0 %v5637_v39 }
 0x3c5   : > { %v4064_v19 = vadd.f32 %v4063_v22, %v4011_v59  ;;  %v4078_v58 = vmax.f32 %v4062_v50, 0.0 }
 0x3c6   : > { %v4067_v1 = vpop.f32.mrf.mxu1 }
 0x3c7   : > { %v4068_v51 = vadd.f32 %v4067_v1, %v4015_v54  ;;  %v4079_v49 = vmax.f32 %v4064_v19, 0.0  ;;  %v4084_v32 = vadd.f32 %v4078_v58, %v4076_v42 }
 0x3c8   : > { %v4069_v34 = vpop.f32.mrf.mxu1 }
 0x3c9   : > { %v4080_v26 = vmax.f32 %v4068_v51, 0.0  ;;  %v4070_v7 = vadd.f32 %v4069_v34, %v4017_v2  ;;  %v4085_v41 = vadd.f32 %v4079_v49, %v4077_v37 }
 0x3ca   : > { %v4071_v24 = vpop.f32.mrf.mxu1 }
 0x3cb   : > { %v4081_v44 = vmax.f32 %v4070_v7, 0.0  ;;  %v4072_v63 = vadd.f32 %v4071_v24, %v4019_v40  ;;  %v4086_v0 = vadd.f32 %v4084_v32, %v4080_v26 }
 0x3cc   : > { %v4073_v29 = vpop.f32.mrf.mxu1 }
 0x3cd   : > { %v4082_v48 = vmax.f32 %v4072_v63, 0.0  ;;  %v4074_v5 = vadd.f32 %v4073_v29, %v4021_v61  ;;  %v4087_v62 = vadd.f32 %v4085_v41, %v4081_v44 }
 0x3cf   : > { %v4088_v33 = vadd.f32 %v4086_v0, %v4082_v48  ;;  %v4083_v18 = vmax.f32 %v4074_v5, 0.0 }
 0x3d1   : > { %v4091_v10 = vsel %vm4090_vm6, %v4088_v33, 0.0  ;;  %v4089_v13 = vadd.f32 %v4087_v62, %v4083_v18 }
 0x3d2   : > { %v4092_v43 = vrot.slane %v4091_v10, 4 }
 0x3d3   : > { %v4098_v55 = vsel %vm4090_vm6, %v4089_v13, 0.0 }
 0x3d4   : > { %v4093_v46 = vadd.f32 %v4092_v43, %v4091_v10  ;;  %v4099_v15 = vrot.slane %v4098_v55, 4 }
 0x3d6   : > { %v4094_v12 = vrot.slane %v4093_v46, 2  ;;  %v4100_v8 = vadd.f32 %v4099_v15, %v4098_v55 }
 0x3d8   : > { %v4095_v3 = vadd.f32 %v4094_v12, %v4093_v46  ;;  %v4101_v21 = vrot.slane %v4100_v8, 2 }
 0x3da   : > { %v4096_v36 = vrot.slane %v4095_v3, 1  ;;  %v4102_v20 = vadd.f32 %v4101_v21, %v4100_v8 }
 0x3dc   : > { %v4097_v16 = vadd.f32 %v4096_v36, %v4095_v3  ;;  %v4103_v4 = vrot.slane %v4102_v20, 1 }
 0x3de   : > { %v4104_v57 = vadd.f32 %v4103_v4, %v4102_v20  ;;  %v4105_v60 = vmul.f32 0.0625, %v4097_v16 }
 0x3e0   : > { %v4106_v14 = vmul.f32 0.0625, %v4104_v57  ;;  %v4107_v38 = vpack.c.bf16 %v4105_v60, %v4105_v60 }
 0x3e2   : > { %v4108_v28 = vpack.c.bf16 %v4106_v14, %v4106_v14 }
 0x3e4   : > { %4270 = vmatprep.mubr.bf16.mxu1 %v4108_v28 }
 0x3e5   : > { %4271 = vmatmul.mubr.bf16.vlgmr.msra.gmra.mxu1 %v4107_v38 }
 0x4a5   : > { %v5070_v56 = vpop.f32.mrf.mxu1 }
 0x4a7   : > { %v5071_v9 = vpop.f32.mrf.mxu1 }
 0x4a8   : > { %v5072_v31 = vadd.f32 %v5071_v9, %v5070_v56 }
 0x4a9   : > { %v5073_v59 = vpop.f32.mrf.mxu1 }
 0x4aa   : > { %v4273_v6 = vadd.f32 %v5072_v31, %v4141_v35 }
 0x4ab   : > { %v5074_v27 = vpop.f32.mrf.mxu1 }
 0x4ac   : > { %v4278_v50 = vmax.f32 %v4273_v6, 0.0 }
 0x4ae   : > { %v4279_v11 = vpack.c.bf16 %v4278_v50, %v4278_v50 }
 0x4b0   : > { %5232 = vmatmul.mubr.msk.bf16.vlgmr.msra.gmra.mxu0 %vm4313_vm7, %v4279_v11 }
 0x570   : > { %v4351_v25 = vpop.f32.mrf.mxu0 }
 0x571   : > { %v4352_v22 = vadd.f32 %v4351_v25, %v4288_v17 }
 0x572   : > { %v5233_v52 = vpop.f32.mrf.mxu0 }
 0x573   : > { %4357 = vst [vmem:[%s378_s30] sm:$0x1] %v4352_v22 }
 0x574   : > { %v4354_v54 = vpop.f32.mrf.mxu0 }
 0x575   : > { %5652 = shalt.err (!%p5649_p3)
}
 0x576   : > { %s5653_s29 = scalar_lea.hbm %s7309_s15, 16  ;;  %s5657_s14 = scalar_lea.hbm %s7361_s11, 32 }
 0x577   : > { %p5654_p4 = scmp.ne.s32.totalorder %s7309_s15, %s5653_s29  ;;  %p5658_p9 = scmp.lt.s32.totalorder %s7309_s15, %s7361_s11 }
 0x578   : > { %p5659_p10 = scmp.lt.s32.totalorder %s5657_s14, %s5653_s29 }
 0x579   : > { %p5655_p7 = pnand %p5654_p4, %p5803_p5 }
 0x57a   : > { %p5660_p11 = por %p5659_p10, %p5658_p9 }
 0x57b   : > { %p5656_p8 = pneg %p5655_p7 }
 0x57d   : > { %p5661_p12 = pnand %p5660_p11, %p5656_p8 }
 0x57f   : > { %5664 = shalt.err (!%p5661_p12)
}
 0x580   : > { %5235 = dma.vmem_to_hbm [thread:$0]  (%p5803_p5), %s7311_s12, 16, %s7309_s15, %s4359_s16   ;;  %v5234_v53 = vpop.f32.mrf.mxu0 }
 0x581 PF: > { %p5241_p13 = scmp.ge.s32.totalorder %s5699_s20, 2  ;;  %s4383_s24 = sand.u32 1, %s5687_s17  }
 0x582   : > { %s4384_s0 = scalar_lea.sflag [#allocation6], %s4383_s24 }
 0x583   : > { %p5238_p0 = pnand %p5241_p13, %p5807_p6 }
 0x585   : > { %p5239_p1 = pneg %p5238_p0 }
 0x587   : > { %5682 = dma.done.wait (%p5239_p1), %s4384_s0, 16  }
 0x588   : > { %5684 = vsyncadd (%p5239_p1), %s4384_s0, 4294967280  ;;  %p21_p2 = scmp.ge.s32.totalorder %s5790_s23, 4   ;;  %s7366_s17 = smov %s5691_s18 }
 0x589   : > { %s7367_s18 = smov %s5695_s19  ;;  %s7368_s19 = smov %s5801_s26 }
 0x58a   : > { %s7369_s20 = smov %s5790_s23  ;;  %23 = sbr.rel (!%p21_p2) target bundleno = 5 (0x5), region = 116 }
 0x58f   :  { %4388 = vsyncpa [#allocation6], 1 }
 0x590   :  { %4390 = vsyncpa [#allocation6 + $0x1], 1 }

</bundles_post_ra>
